<compile_context>
chip_gen: v6e
topology: v6e:2x2x1
jax: 0.10.0
libtpu: 0.0.40
codegen_flags: <defaults>
</compile_context>

<pallas_src>
import functools

import jax
import jax.numpy as jnp
from jax import lax
from jax.experimental import pallas as pl
from jax.experimental.pallas import tpu as pltpu


def _sigmoid(z, bf16_act=False):
    # Single-EUP-op form: sigmoid(x) == 0.5 * tanh(0.5 * x) + 0.5.
    if bf16_act:
        z = z.astype(jnp.bfloat16)
    return (0.5 * jnp.tanh(0.5 * z) + 0.5).astype(jnp.float32)


def saznet_kernel(x_ref,
                  w1_ref, b1_ref,
                  w2_ref, b2_ref,
                  w3_ref, b3_ref,
                  w4_ref, b4_ref,
                  o_ref,
                  *, bf16_act=False):
    x = x_ref[...]                                             # [TB, 7] natural layout

    dot_kw = dict(preferred_element_type=jnp.float32,
                  precision=lax.Precision.HIGHEST)

    # fc1: W1 [64,7] contracted with x [TB,7] over the feature dim -> [64, TB].
    # (on-chip transpose of x; result is batch-on-lanes from here on)
    h = lax.dot_general(w1_ref[...], x, (((1,), (1,)), ((), ())), **dot_kw)
    h = _sigmoid(h + b1_ref[...], bf16_act)                    # [64, TB]

    # fc2: [16,64] @ [64,TB]
    h = jnp.dot(w2_ref[...], h, **dot_kw)
    h = _sigmoid(h + b2_ref[...], bf16_act)                    # [16, TB]

    # fc3: [8,16] @ [16,TB]
    h = jnp.dot(w3_ref[...], h, **dot_kw)
    h = _sigmoid(h + b3_ref[...], bf16_act)                    # [8, TB]

    # fc4: 8 -> 1 as VPU broadcast-multiply + sublane reduce (avoid N=1 MXU tile).
    out = jnp.sum(w4_ref[...] * h, axis=0, keepdims=True) + b4_ref[...]
    o_ref[...] = out.astype(o_ref.dtype)                       # [1, TB] lane-dense store


def init_params(key):
    """PyTorch nn.Linear default init: U(-1/sqrt(fan_in), 1/sqrt(fan_in)).

    Weights kept in torch layout [out, in]; biases as [out, 1] (lane-broadcast).
    """
    dims = [(7, 64), (64, 16), (16, 8), (8, 1)]
    params = []
    for fan_in, fan_out in dims:
        key, kw, kb = jax.random.split(key, 3)
        bound = 1.0 / jnp.sqrt(jnp.float32(fan_in))
        w = jax.random.uniform(kw, (fan_out, fan_in), jnp.float32, -bound, bound)
        b = jax.random.uniform(kb, (fan_out, 1), jnp.float32, -bound, bound)
        params.append((w, b))
    return params


def saznet_forward(x, params, tb=4096, bf16_act=False):
    """x: [B, 7] float32 -> [B, 1] float32."""
    B = x.shape[0]
    (w1, b1), (w2, b2), (w3, b3), (w4, b4) = params

    # Batch tile: multiple of 128 (lane-dense output stores), capped at 8192
    # (keeps v5e's 16 MiB scoped-VMEM default safe) and at the lane-rounded
    # batch so we never allocate a tile far larger than B.
    lane = 128
    tb = max(lane, min(int(tb), 8192))
    tb = (tb // lane) * lane
    tb = min(tb, pl.cdiv(B, lane) * lane)
    n_tiles = pl.cdiv(B, tb)
    # TODO(synk): on v7x prefer an even n_tiles >= 2 so the "parallel" batch
    # axis actually shards across both TensorCores.

    w4c = w4.T  # [8, 1] column form for the in-kernel broadcast-FMA reduction.

    def resident(arr):
        # Whole (tiny) array as one block with a constant index_map: DMA'd
        # once, stays VMEM-resident across all grid steps.
        return pl.BlockSpec(arr.shape, lambda i: (0, 0))

    # Per-sample: 2*(7*64 + 64*16 + 16*8 + 8*1) = 3216 flops, 88 sigmoids,
    # ~32 bytes of true HBM traffic (28 in + 4 out).
    cost = pl.CostEstimate(flops=3216 * B,
                           transcendentals=88 * B,
                           bytes_accessed=32 * B)

    out_t = pl.pallas_call(
        functools.partial(saznet_kernel, bf16_act=bf16_act),
        out_shape=jax.ShapeDtypeStruct((1, B), jnp.float32),
        grid=(n_tiles,),
        in_specs=[
            pl.BlockSpec((tb, 7), lambda i: (i, 0)),   # x streamed in natural [B,7] layout
            resident(w1), resident(b1),
            resident(w2), resident(b2),
            resident(w3), resident(b3),
            resident(w4c), resident(b4),
        ],
        out_specs=pl.BlockSpec((1, tb), lambda i: (0, i)),
        compiler_params=pltpu.CompilerParams(
            dimension_semantics=("parallel",)),
        cost_estimate=cost,
    )(x, w1, b1, w2, b2, w3, b3, w4c, b4)

    return out_t[0, :].reshape(B, 1)


def saznet_reference(x, params):
    h = x
    for i, (w, b) in enumerate(params):
        h = h @ w.T + b[:, 0]
        if i < 3:
            h = jax.nn.sigmoid(h)
    return h


if __name__ == "__main__":
    key = jax.random.PRNGKey(0)
    kp, kx = jax.random.split(key)
    params = init_params(kp)

    B = 300  # non-multiple of 128: exercises the masked partial last block
    x = jax.random.normal(kx, (B, 7), jnp.float32)

    ref = saznet_reference(x, params)

    # Default (large-tile) path: tb clamps to 384, grid=(1,).
    out = saznet_forward(x, params)
    out = jax.block_until_ready(out)
    assert out.shape == (B, 1)
    assert jnp.allclose(out, ref, atol=1e-5, rtol=1e-5), float(
        jnp.max(jnp.abs(out - ref)))

    # Multi-tile path: tb=128 -> grid=(3,) with a masked partial final block.
    out2 = saznet_forward(x, params, tb=128)
    out2 = jax.block_until_ready(out2)
    assert jnp.allclose(out2, ref, atol=1e-5, rtol=1e-5), float(
        jnp.max(jnp.abs(out2 - ref)))

    print("KERNEL_OK")
</pallas_src>

<mosaic_0001>
module attributes {stable_mosaic.version = 11 : i64} {
  func.func @saznet_kernel(%arg0: i32, %arg1: memref<384x7xf32, #tpu.memory_space<vmem>>, %arg2: memref<64x7xf32, #tpu.memory_space<vmem>>, %arg3: memref<64x1xf32, #tpu.memory_space<vmem>>, %arg4: memref<16x64xf32, #tpu.memory_space<vmem>>, %arg5: memref<16x1xf32, #tpu.memory_space<vmem>>, %arg6: memref<8x16xf32, #tpu.memory_space<vmem>>, %arg7: memref<8x1xf32, #tpu.memory_space<vmem>>, %arg8: memref<8x1xf32, #tpu.memory_space<vmem>>, %arg9: memref<1x1xf32, #tpu.memory_space<vmem>>, %arg10: memref<1x384xf32, #tpu.memory_space<vmem>>) attributes {dimension_semantics = [#tpu.dimension_semantics<parallel>], iteration_bounds = array<i64: 1>, scalar_prefetch = 0 : i64, scratch_operands = 0 : i64, tpu.core_type = #tpu.core_type<tc>, window_params = [{transform_indices = @transform_0, window_bounds = array<i64: 384, 7>}, {pipeline_mode = #tpu.pipeline_mode<synchronous>, transform_indices = @transform_1, window_bounds = array<i64: 64, 7>}, {pipeline_mode = #tpu.pipeline_mode<synchronous>, transform_indices = @transform_2, window_bounds = array<i64: 64, 1>}, {pipeline_mode = #tpu.pipeline_mode<synchronous>, transform_indices = @transform_3, window_bounds = array<i64: 16, 64>}, {pipeline_mode = #tpu.pipeline_mode<synchronous>, transform_indices = @transform_4, window_bounds = array<i64: 16, 1>}, {pipeline_mode = #tpu.pipeline_mode<synchronous>, transform_indices = @transform_5, window_bounds = array<i64: 8, 16>}, {pipeline_mode = #tpu.pipeline_mode<synchronous>, transform_indices = @transform_6, window_bounds = array<i64: 8, 1>}, {pipeline_mode = #tpu.pipeline_mode<synchronous>, transform_indices = @transform_7, window_bounds = array<i64: 8, 1>}, {pipeline_mode = #tpu.pipeline_mode<synchronous>, transform_indices = @transform_8, window_bounds = array<i64: 1, 1>}, {transform_indices = @transform_9, window_bounds = array<i64: 1, 384>}]} {
    %c0 = arith.constant 0 : index
    %c0_0 = arith.constant 0 : index
    %0 = vector.load %arg1[%c0, %c0_0] : memref<384x7xf32, #tpu.memory_space<vmem>>, vector<384x7xf32>
    %c0_1 = arith.constant 0 : index
    %c0_2 = arith.constant 0 : index
    %1 = vector.load %arg2[%c0_1, %c0_2] : memref<64x7xf32, #tpu.memory_space<vmem>>, vector<64x7xf32>
    %cst = arith.constant dense<0.000000e+00> : vector<64x384xf32>
    %2 = tpu.matmul %1, %0, %cst {dimension_numbers = #tpu.dot_dimension_numbers<[1], [1], [0], [0], [0, 0, 1, 0], [], []>, precision = #tpu.contract_precision<fp32>} : vector<64x7xf32>, vector<384x7xf32>, vector<64x384xf32> -> vector<64x384xf32>
    %c0_3 = arith.constant 0 : index
    %c0_4 = arith.constant 0 : index
    %3 = vector.load %arg3[%c0_3, %c0_4] : memref<64x1xf32, #tpu.memory_space<vmem>>, vector<64x1xf32>
    %4 = vector.broadcast %3 : vector<64x1xf32> to vector<64x384xf32>
    %5 = arith.addf %2, %4 : vector<64x384xf32>
    %cst_5 = arith.constant 5.000000e-01 : f32
    %6 = vector.broadcast %cst_5 : f32 to vector<64x384xf32>
    %7 = arith.mulf %6, %5 : vector<64x384xf32>
    %8 = math.tanh %7 : vector<64x384xf32>
    %cst_6 = arith.constant 5.000000e-01 : f32
    %9 = vector.broadcast %cst_6 : f32 to vector<64x384xf32>
    %10 = arith.mulf %9, %8 : vector<64x384xf32>
    %cst_7 = arith.constant 5.000000e-01 : f32
    %11 = vector.broadcast %cst_7 : f32 to vector<64x384xf32>
    %12 = arith.addf %10, %11 : vector<64x384xf32>
    %c0_8 = arith.constant 0 : index
    %c0_9 = arith.constant 0 : index
    %13 = vector.load %arg4[%c0_8, %c0_9] : memref<16x64xf32, #tpu.memory_space<vmem>>, vector<16x64xf32>
    %cst_10 = arith.constant dense<0.000000e+00> : vector<16x384xf32>
    %14 = tpu.matmul %13, %12, %cst_10 {dimension_numbers = #tpu.dot_dimension_numbers<[1], [0], [0], [1], [0, 0, 1, 1], [], []>, precision = #tpu.contract_precision<fp32>} : vector<16x64xf32>, vector<64x384xf32>, vector<16x384xf32> -> vector<16x384xf32>
    %c0_11 = arith.constant 0 : index
    %c0_12 = arith.constant 0 : index
    %15 = vector.load %arg5[%c0_11, %c0_12] : memref<16x1xf32, #tpu.memory_space<vmem>>, vector<16x1xf32>
    %16 = vector.broadcast %15 : vector<16x1xf32> to vector<16x384xf32>
    %17 = arith.addf %14, %16 : vector<16x384xf32>
    %cst_13 = arith.constant 5.000000e-01 : f32
    %18 = vector.broadcast %cst_13 : f32 to vector<16x384xf32>
    %19 = arith.mulf %18, %17 : vector<16x384xf32>
    %20 = math.tanh %19 : vector<16x384xf32>
    %cst_14 = arith.constant 5.000000e-01 : f32
    %21 = vector.broadcast %cst_14 : f32 to vector<16x384xf32>
    %22 = arith.mulf %21, %20 : vector<16x384xf32>
    %cst_15 = arith.constant 5.000000e-01 : f32
    %23 = vector.broadcast %cst_15 : f32 to vector<16x384xf32>
    %24 = arith.addf %22, %23 : vector<16x384xf32>
    %c0_16 = arith.constant 0 : index
    %c0_17 = arith.constant 0 : index
    %25 = vector.load %arg6[%c0_16, %c0_17] : memref<8x16xf32, #tpu.memory_space<vmem>>, vector<8x16xf32>
    %cst_18 = arith.constant dense<0.000000e+00> : vector<8x384xf32>
    %26 = tpu.matmul %25, %24, %cst_18 {dimension_numbers = #tpu.dot_dimension_numbers<[1], [0], [0], [1], [0, 0, 1, 1], [], []>, precision = #tpu.contract_precision<fp32>} : vector<8x16xf32>, vector<16x384xf32>, vector<8x384xf32> -> vector<8x384xf32>
    %c0_19 = arith.constant 0 : index
    %c0_20 = arith.constant 0 : index
    %27 = vector.load %arg7[%c0_19, %c0_20] : memref<8x1xf32, #tpu.memory_space<vmem>>, vector<8x1xf32>
    %28 = vector.broadcast %27 : vector<8x1xf32> to vector<8x384xf32>
    %29 = arith.addf %26, %28 : vector<8x384xf32>
    %cst_21 = arith.constant 5.000000e-01 : f32
    %30 = vector.broadcast %cst_21 : f32 to vector<8x384xf32>
    %31 = arith.mulf %30, %29 : vector<8x384xf32>
    %32 = math.tanh %31 : vector<8x384xf32>
    %cst_22 = arith.constant 5.000000e-01 : f32
    %33 = vector.broadcast %cst_22 : f32 to vector<8x384xf32>
    %34 = arith.mulf %33, %32 : vector<8x384xf32>
    %cst_23 = arith.constant 5.000000e-01 : f32
    %35 = vector.broadcast %cst_23 : f32 to vector<8x384xf32>
    %36 = arith.addf %34, %35 : vector<8x384xf32>
    %c0_24 = arith.constant 0 : index
    %c0_25 = arith.constant 0 : index
    %37 = vector.load %arg8[%c0_24, %c0_25] : memref<8x1xf32, #tpu.memory_space<vmem>>, vector<8x1xf32>
    %38 = vector.broadcast %37 : vector<8x1xf32> to vector<8x384xf32>
    %39 = arith.mulf %38, %36 : vector<8x384xf32>
    %cst_26 = arith.constant dense<0.000000e+00> : vector<384xf32>
    %40 = vector.multi_reduction <add>, %39, %cst_26 [0] : vector<8x384xf32> to vector<384xf32>
    %41 = vector.shape_cast %40 : vector<384xf32> to vector<1x384xf32>
    %c0_27 = arith.constant 0 : index
    %c0_28 = arith.constant 0 : index
    %42 = vector.load %arg9[%c0_27, %c0_28] : memref<1x1xf32, #tpu.memory_space<vmem>>, vector<1x1xf32>
    %43 = vector.broadcast %42 : vector<1x1xf32> to vector<1x384xf32>
    %44 = arith.addf %41, %43 : vector<1x384xf32>
    %c0_29 = arith.constant 0 : index
    %c0_30 = arith.constant 0 : index
    %45 = vector.load %arg10[%c0_29, %c0_30] : memref<1x384xf32, #tpu.memory_space<vmem>>, vector<1x384xf32>
    tpu.vector_store %arg10[%c0_29, %c0_30], %44 {strides = array<i32>} : memref<1x384xf32, #tpu.memory_space<vmem>>, vector<1x384xf32>,
    return
  }
  func.func @transform_0(%arg0: i32) -> (i32, i32) {
    %c0_i32 = arith.constant 0 : i32
    %c0_i32_0 = arith.constant 0 : i32
    return %arg0, %c0_i32 : i32, i32
  }
  func.func @transform_1(%arg0: i32) -> (i32, i32) {
    %c0_i32 = arith.constant 0 : i32
    %c0_i32_0 = arith.constant 0 : i32
    %c0_i32_1 = arith.constant 0 : i32
    return %c0_i32, %c0_i32_0 : i32, i32
  }
  func.func @transform_2(%arg0: i32) -> (i32, i32) {
    %c0_i32 = arith.constant 0 : i32
    %c0_i32_0 = arith.constant 0 : i32
    %c0_i32_1 = arith.constant 0 : i32
    return %c0_i32, %c0_i32_0 : i32, i32
  }
  func.func @transform_3(%arg0: i32) -> (i32, i32) {
    %c0_i32 = arith.constant 0 : i32
    %c0_i32_0 = arith.constant 0 : i32
    %c0_i32_1 = arith.constant 0 : i32
    return %c0_i32, %c0_i32_0 : i32, i32
  }
  func.func @transform_4(%arg0: i32) -> (i32, i32) {
    %c0_i32 = arith.constant 0 : i32
    %c0_i32_0 = arith.constant 0 : i32
    %c0_i32_1 = arith.constant 0 : i32
    return %c0_i32, %c0_i32_0 : i32, i32
  }
  func.func @transform_5(%arg0: i32) -> (i32, i32) {
    %c0_i32 = arith.constant 0 : i32
    %c0_i32_0 = arith.constant 0 : i32
    %c0_i32_1 = arith.constant 0 : i32
    return %c0_i32, %c0_i32_0 : i32, i32
  }
  func.func @transform_6(%arg0: i32) -> (i32, i32) {
    %c0_i32 = arith.constant 0 : i32
    %c0_i32_0 = arith.constant 0 : i32
    %c0_i32_1 = arith.constant 0 : i32
    return %c0_i32, %c0_i32_0 : i32, i32
  }
  func.func @transform_7(%arg0: i32) -> (i32, i32) {
    %c0_i32 = arith.constant 0 : i32
    %c0_i32_0 = arith.constant 0 : i32
    %c0_i32_1 = arith.constant 0 : i32
    return %c0_i32, %c0_i32_0 : i32, i32
  }
  func.func @transform_8(%arg0: i32) -> (i32, i32) {
    %c0_i32 = arith.constant 0 : i32
    %c0_i32_0 = arith.constant 0 : i32
    %c0_i32_1 = arith.constant 0 : i32
    return %c0_i32, %c0_i32_0 : i32, i32
  }
  func.func @transform_9(%arg0: i32) -> (i32, i32) {
    %c0_i32 = arith.constant 0 : i32
    %c0_i32_0 = arith.constant 0 : i32
    return %c0_i32, %arg0 : i32, i32
  }
}

</mosaic_0001>

<bundles_post_ra>
// kernel: tpu_custom_call.1
= control target key start
LH: loop header
LB: loop body
LE: loop exit
PB: predicated region body
PF: predicated region fallthrough
CT: control target
= control target key end

     0   :  { %s8036_s0 = inlined_call_operand.vmem [shape: f32[300,7], index: 0, kind: input, shape index: {}]   ;;  %s8037_s1 = inlined_call_operand.vmem [shape: f32[64,7], index: 1, kind: input, shape index: {}]   ;;  %s8038_s2 = inlined_call_operand.vmem [shape: f32[64,1], index: 2, kind: input, shape index: {}]   ;;  %s8039_s3 = inlined_call_operand.vmem [shape: f32[16,64], index: 3, kind: input, shape index: {}]   ;;  %s8040_s4 = inlined_call_operand.vmem [shape: f32[16,1], index: 4, kind: input, shape index: {}]   ;;  %s8041_s5 = inlined_call_operand.vmem [shape: f32[8,16], index: 5, kind: input, shape index: {}]   ;;  %s8042_s6 = inlined_call_operand.vmem [shape: f32[8,1], index: 6, kind: input, shape index: {}]   ;;  %s8043_s7 = inlined_call_operand.vmem [shape: f32[8,1], index: 7, kind: input, shape index: {}]   ;;  %s8044_s8 = inlined_call_operand.<no memory space> [shape: f32[1,1], index: 8, kind: input, shape index: {}]   ;;  %s8045_s9 = inlined_call_operand.hbm [shape: f32[1,300], index: 9, kind: output, shape index: {}]  }
   0x1   :  { %v14_v0 = vstv %s8044_s8 }
   0x2   :  { %15 = vst [vmem:[#allocation2] sm:$0x1] %v14_v0 }
   0x3   :  { %v66_v1 = vld [vmem:[%s8036_s0 + $0xf8] sm:$0xff]  ;;  %vm139_vm0 = vcmask 56320   ;;  %v65_v3 = vld [vmem:[%s8036_s0 + $0xf0] sm:$0xff]  ;;  %v64_v8 = vld [vmem:[%s8036_s0 + $0xe8] sm:$0xff] }
   0x4   :  { %v50_v2 = vld [vmem:[%s8036_s0 + $0x78] sm:$0xff]  ;;  %v258_v4 = vsel %vm139_vm0, %v66_v1, 0  ;;  %v255_v6 = vsel %vm139_vm0, %v65_v3, 0  ;;  %v49_v7 = vld [vmem:[%s8036_s0 + $0x70] sm:$0xff]  ;;  %v48_v9 = vld [vmem:[%s8036_s0 + $0x68] sm:$0xff]  ;;  %v252_v17 = vsel %vm139_vm0, %v64_v8, 0 }
   0x5   :  { %v210_v5 = vsel %vm139_vm0, %v50_v2, 0  ;;  %v6028_v10 = vand.u32 4294901760, %v258_v4  ;;  %v6032_v12 = vand.u32 4294901760, %v255_v6  ;;  %v207_v13 = vsel %vm139_vm0, %v49_v7, 0  ;;  %v63_v14 = vld [vmem:[%s8036_s0 + $0xe0] sm:$0xff]  ;;  %v62_v20 = vld [vmem:[%s8036_s0 + $0xd8] sm:$0xff] }
   0x6   :  { %v6030_v11 = vand.u32 4294901760, %v210_v5  ;;  %v47_v15 = vld [vmem:[%s8036_s0 + $0x60] sm:$0xff]  ;;  %v6041_v16 = vand.u32 4294901760, %v207_v13  ;;  %v204_v18 = vsel %vm139_vm0, %v48_v9, 0  ;;  %v249_v19 = vsel %vm139_vm0, %v63_v14, 0  ;;  %v46_v28 = vld [vmem:[%s8036_s0 + $0x58] sm:$0xff] }
   0x7   :  { %4924 = vmatprep.subr.mxu0 %v6028_v10  ;;  %v6050_v21 = vand.u32 4294901760, %v252_v17  ;;  %v6053_v22 = vsub.f32 %v258_v4, %v6028_v10  ;;  %v6055_v23 = vand.u32 4294901760, %v204_v18  ;;  %v6062_v25 = vsub.f32 %v255_v6, %v6032_v12  ;;  %v61_v37 = vld [vmem:[%s8036_s0 + $0xd0] sm:$0xff]  ;;  %v60_v51 = vld [vmem:[%s8036_s0 + $0xc8] sm:$0xff]  ;;  %v59_v61 = vld [vmem:[%s8036_s0 + $0xc0] sm:$0xff] }
   0x8   :  { %v6058_v24 = vsub.f32 %v210_v5, %v6030_v11  ;;  %4925 = vmatpush3.xpose.msra.mxu0 %v6030_v11  ;;  %v201_v26 = vsel %vm139_vm0, %v47_v15, 0  ;;  %v6066_v27 = vsub.f32 %v207_v13, %v6041_v16  ;;  %v6074_v31 = vand.u32 4294901760, %v249_v19  ;;  %v45_v46 = vld [vmem:[%s8036_s0 + $0x50] sm:$0xff]  ;;  %v44_v60 = vld [vmem:[%s8036_s0 + $0x48] sm:$0xff]  ;;  %v43_v6 = vld [vmem:[%s8036_s0 + $0x40] sm:$0xff] }
   0x9   :  { %4926 = vmatprep.subr.mxu0 %v6032_v12  ;;  %v8062_v29 = vand.u32 4294901760, %v6053_v22  ;;  %v246_v32 = vsel %vm139_vm0, %v62_v20, 0  ;;  %v8059_v33 = vand.u32 4294901760, %v6062_v25  ;;  %v6078_v34 = vand.u32 4294901760, %v201_v26 }
   0xa   :  { %v8061_v30 = vand.u32 4294901760, %v6058_v24  ;;  %v8058_v35 = vand.u32 4294901760, %v6066_v27  ;;  %v6082_v36 = vsub.f32 %v252_v17, %v6050_v21  ;;  %v198_v40 = vsel %vm139_vm0, %v46_v28, 0 }
   0xb   :  { %v609_v38 = vsub.f32 %v6053_v22, %v8062_v29  ;;  %v6095_v41 = vsub.f32 %v204_v18, %v6055_v23  ;;  %v616_v42 = vsub.f32 %v6062_v25, %v8059_v33  ;;  %v6104_v44 = vand.u32 4294901760, %v246_v32 }
   0xc   :  { %v497_v39 = vsub.f32 %v6058_v24, %v8061_v30  ;;  %4927 = vmatpush3.xpose.msra.mxu0 %v6041_v16  ;;  %v504_v43 = vsub.f32 %v6066_v27, %v8058_v35  ;;  %v8057_v45 = vand.u32 4294901760, %v6082_v36  ;;  %v243_v50 = vsel %vm139_vm0, %v61_v37, 0 }
   0xd   :  { %4928 = vmatprep.subr.mxu0 %v6050_v21  ;;  %v610_v47 = vand.u32 4294901760, %v609_v38  ;;  %v8055_v49 = vand.u32 4294901760, %v6095_v41  ;;  %v617_v52 = vand.u32 4294901760, %v616_v42  ;;  %v6119_v55 = vand.u32 4294901760, %v198_v40 }
   0xe   :  { %v498_v48 = vand.u32 4294901760, %v497_v39  ;;  %v505_v53 = vand.u32 4294901760, %v504_v43  ;;  %v623_v54 = vsub.f32 %v6082_v36, %v8057_v45  ;;  %v6125_v57 = vsub.f32 %v249_v19, %v6074_v31  ;;  %v58_v19 = vld [vmem:[%s8036_s0 + $0xb8] sm:$0xff] }
   0xf   :  { %4972 = vmatprep.subr.mxu1 %v610_v47  ;;  %v511_v56 = vsub.f32 %v6095_v41, %v8055_v49  ;;  %v195_v58 = vsel %vm139_vm0, %v45_v46, 0  ;;  %v6129_v59 = vsub.f32 %v201_v26, %v6078_v34  ;;  %v6138_v63 = vand.u32 4294901760, %v243_v50 }
  0x10   :  { %4929 = vmatpush3.xpose.msra.mxu0 %v6055_v23  ;;  %4973 = vmatpush3.xpose.msra.mxu1 %v498_v48  ;;  %v624_v62 = vand.u32 4294901760, %v623_v54  ;;  %v240_v0 = vsel %vm139_vm0, %v60_v51, 0  ;;  %v6142_v1 = vsub.f32 %v246_v32, %v6104_v44  ;;  %v8054_v3 = vand.u32 4294901760, %v6125_v57 }
  0x11   :  { %4930 = vmatprep.subr.mxu0 %v6074_v31  ;;  %4974 = vmatprep.subr.mxu1 %v617_v52  ;;  %v512_v2 = vand.u32 4294901760, %v511_v56  ;;  %v6146_v4 = vand.u32 4294901760, %v195_v58  ;;  %v8052_v5 = vand.u32 4294901760, %v6129_v59  ;;  %v192_v8 = vsel %vm139_vm0, %v44_v60, 0 }
  0x12   :  { %v8050_v7 = vand.u32 4294901760, %v6142_v1  ;;  %v6155_v9 = vsub.f32 %v198_v40, %v6119_v55  ;;  %v237_v13 = vsel %vm139_vm0, %v59_v61, 0  ;;  %v630_v14 = vsub.f32 %v6125_v57, %v8054_v3 }
  0x13   :  { %v518_v15 = vsub.f32 %v6129_v59, %v8052_v5  ;;  %v6164_v17 = vand.u32 4294901760, %v240_v0  ;;  %v6166_v18 = vand.u32 4294901760, %v192_v8 }
  0x15   :  { %8207 = vst [vmem:[#allocation6_spill] sm:$0xff] %v6166_v18 }
  0x16   :  { %16 = vsyncpa [#allocation4], 0  ;;  %4931 = vmatpush3.xpose.msra.mxu0 %v6078_v34  ;;  %4975 = vmatpush3.xpose.msra.mxu1 %v505_v53  ;;  %v637_v20 = vsub.f32 %v6142_v1, %v8050_v7  ;;  %v8049_v26 = vand.u32 4294901760, %v6155_v9  ;;  %v6177_v28 = vsub.f32 %v243_v50, %v6138_v63  ;;  %v189_v32 = vsel %vm139_vm0, %v43_v6, 0  ;;  %v42_v46 = vld [vmem:[%s8036_s0 + $0x38] sm:$0xff]  ;;  %v57_v47 = vld [vmem:[%s8036_s0 + $0xb0] sm:$0xff] }
  0x17   :  { %4932 = vmatprep.subr.mxu0 %v6104_v44  ;;  %4976 = vmatprep.subr.mxu1 %v624_v62  ;;  %v631_v37 = vand.u32 4294901760, %v630_v14  ;;  %v6181_v38 = vand.u32 4294901760, %v237_v13  ;;  %v6184_v39 = vsub.f32 %v195_v58, %v6146_v4  ;;  %v519_v40 = vand.u32 4294901760, %v518_v15  ;;  %v41_v60 = vld [vmem:[%s8036_s0 + $0x30] sm:$0xff]  ;;  %v56_v6 = vld [vmem:[%s8036_s0 + $0xa8] sm:$0xff]  ;;  %v38_v33 = vld [vmem:[%s8036_s0 + $0x18] sm:$0xff] }
  0x18   :  { %v8047_v42 = vand.u32 4294901760, %v6177_v28  ;;  %v234_v43 = vsel %vm139_vm0, %v58_v19, 0  ;;  %v525_v48 = vsub.f32 %v6155_v9, %v8049_v26  ;;  %v6197_v50 = vand.u32 4294901760, %v189_v32 }
  0x19   :  { %8208 = vst [vmem:[#allocation7_spill] sm:$0xff] %v6181_v38  ;;  %v8046_v51 = vand.u32 4294901760, %v6184_v39  ;;  %v6201_v52 = vsub.f32 %v240_v0, %v6164_v17  ;;  %v638_v53 = vand.u32 4294901760, %v637_v20  ;;  %v6207_v56 = vand.u32 4294901760, %v234_v43 }
  0x1a   :  { %8209 = vst [vmem:[#allocation8_spill] sm:$0xff] %v6197_v50  ;;  %4933 = vmatpush3.xpose.msra.mxu0 %v6119_v55  ;;  %4977 = vmatpush3.xpose.msra.mxu1 %v512_v2  ;;  %v644_v54 = vsub.f32 %v6177_v28, %v8047_v42  ;;  %v6210_v58 = vsub.f32 %v192_v8, %v6166_v18  ;;  %v186_v62 = vsel %vm139_vm0, %v42_v46, 0  ;;  %v231_v0 = vsel %vm139_vm0, %v57_v47, 0  ;;  %v40_v47 = vld [vmem:[%s8036_s0 + $0x28] sm:$0xff] }
  0x1b   :  { %8210 = vst [vmem:[#allocation9_spill] sm:$0xff] %v6207_v56  ;;  %4934 = vmatprep.subr.mxu0 %v6138_v63  ;;  %4978 = vmatprep.subr.mxu1 %v631_v37  ;;  %v8048_v61 = vand.u32 4294901760, %v6201_v52  ;;  %v6220_v2 = vsub.f32 %v237_v13, %v6181_v38  ;;  %v526_v8 = vand.u32 4294901760, %v525_v48  ;;  %v532_v14 = vsub.f32 %v6184_v39, %v8046_v51 }
  0x1c   :  { %v8051_v15 = vand.u32 4294901760, %v6210_v58  ;;  %v183_v19 = vsel %vm139_vm0, %v41_v60, 0  ;;  %v645_v20 = vand.u32 4294901760, %v644_v54  ;;  %v6231_v37 = vand.u32 4294901760, %v186_v62 }
  0x1d   :  { %v6233_v13 = vand.u32 4294901760, %v231_v0  ;;  %v6236_v46 = vsub.f32 %v189_v32, %v6197_v50  ;;  %v651_v48 = vsub.f32 %v6201_v52, %v8048_v61  ;;  %v228_v54 = vsel %vm139_vm0, %v56_v6, 0  ;;  %v55_v32 = vld [vmem:[%s8036_s0 + $0xa0] sm:$0xff] }
  0x1e   :  { %4935 = vmatpush3.xpose.msra.mxu0 %v6146_v4  ;;  %4979 = vmatpush3.xpose.msra.mxu1 %v519_v40  ;;  %8211 = vst [vmem:[#allocation10_spill] sm:$0xff] %v6231_v37  ;;  %v8053_v40 = vand.u32 4294901760, %v6220_v2  ;;  %v6248_v60 = vsub.f32 %v234_v43, %v6207_v56  ;;  %v6253_v51 = vand.u32 4294901760, %v183_v19  ;;  %v533_v42 = vand.u32 4294901760, %v532_v14 }
  0x1f   :  { %8212 = vst [vmem:[#allocation11_spill] sm:$0xff] %v6233_v13  ;;  %4936 = vmatprep.subr.mxu0 %v6164_v17  ;;  %4980 = vmatprep.subr.mxu1 %v638_v53  ;;  %v539_v53 = vsub.f32 %v6210_v58, %v8051_v15  ;;  %v8056_v61 = vand.u32 4294901760, %v6236_v46  ;;  %v180_v26 = vsel %vm139_vm0, %v40_v47, 0  ;;  %v6261_v43 = vand.u32 4294901760, %v228_v54 }
  0x20   :  { %8213 = vst [vmem:[#allocation12_spill] sm:$0xff] %v6253_v51  ;;  %v6264_v6 = vsub.f32 %v186_v62, %v6231_v37  ;;  %v225_v7 = vsel %vm139_vm0, %v55_v32, 0  ;;  %v6268_v14 = vsub.f32 %v231_v0, %v6233_v13  ;;  %v652_v15 = vand.u32 4294901760, %v651_v48  ;;  %v39_v62 = vld [vmem:[%s8036_s0 + $0x20] sm:$0xff] }
  0x21   :  { %8214 = vst [vmem:[#allocation13_spill] sm:$0xff] %v6261_v43  ;;  %v658_v47 = vsub.f32 %v6220_v2, %v8053_v40  ;;  %v6278_v5 = vand.u32 4294901760, %v180_v26  ;;  %v6281_v32 = vsub.f32 %v183_v19, %v6253_v51  ;;  %v540_v0 = vand.u32 4294901760, %v539_v53  ;;  %v54_v40 = vld [vmem:[%s8036_s0 + $0x98] sm:$0xff] }
  0x22   :  { %4937 = vmatpush3.xpose.msra.mxu0 %v6166_v18  ;;  %4981 = vmatpush3.xpose.msra.mxu1 %v526_v8  ;;  %8215 = vst [vmem:[#allocation14_spill] sm:$0xff] %v6268_v14  ;;  %v8060_v8 = vand.u32 4294901760, %v6248_v60  ;;  %v6286_v48 = vand.u32 4294901760, %v225_v7  ;;  %v8063_v3 = vand.u32 4294901760, %v6264_v6  ;;  %v8066_v49 = vand.u32 4294901760, %v6268_v14 }
  0x23   :  { %4938 = vmatprep.subr.mxu0 %v6181_v38  ;;  %4982 = vmatprep.subr.mxu1 %v645_v20  ;;  %8216 = vst [vmem:[#allocation15_spill] sm:$0xff] %v6278_v5  ;;  %8217 = vst [vmem:[#allocation16_spill] sm:$0xff] %v6281_v32  ;;  %v546_v20 = vsub.f32 %v6236_v46, %v8056_v61  ;;  %v177_v19 = vsel %vm139_vm0, %v39_v62, 0  ;;  %v6296_v53 = vsub.f32 %v228_v54, %v6261_v43  ;;  %vm2558_vm1 = vcmask 523264  }
  0x24   :  { %8218 = vst [vmem:[#allocation17_spill] sm:$0xff] %v6286_v48  ;;  %v659_v61 = vand.u32 4294901760, %v658_v47  ;;  %v665_v45 = vsub.f32 %v6248_v60, %v8060_v8  ;;  %v6308_v62 = vsub.f32 %v180_v26, %v6278_v5  ;;  %v6310_v54 = vand.u32 4294901760, %v177_v19 }
  0x25   :  { %8219 = vst [vmem:[#allocation18_spill] sm:$0xff] %v6296_v53  ;;  %v6316_v47 = vsub.f32 %v225_v7, %v6286_v48  ;;  %v553_v8 = vsub.f32 %v6264_v6, %v8063_v3  ;;  %v672_v26 = vsub.f32 %v6268_v14, %v8066_v49  ;;  %v8073_v30 = vand.u32 4294901760, %v6296_v53  ;;  %v37_v49 = vld [vmem:[%s8036_s0 + $0x10] sm:$0xff] }
  0x26   :  { %4939 = vmatpush3.xpose.msra.mxu0 %v6197_v50  ;;  %4983 = vmatpush3.xpose.msra.mxu1 %v533_v42  ;;  %v222_v42 = vsel %vm139_vm0, %v54_v40, 0  ;;  %8220 = vst [vmem:[#allocation19_spill] sm:$0xff] %v6308_v62  ;;  %8221 = vst [vmem:[#allocation20_spill] sm:$0xff] %v6310_v54  ;;  %v547_v40 = vand.u32 4294901760, %v546_v20  ;;  %v666_v29 = vand.u32 4294901760, %v665_v45  ;;  %v174_v35 = vsel %vm139_vm0, %v38_v33, 0 }
  0x27   :  { %4940 = vmatprep.subr.mxu0 %v6207_v56  ;;  %4984 = vmatprep.subr.mxu1 %v652_v15  ;;  %v53_v15 = vld [vmem:[%s8036_s0 + $0x90] sm:$0xff]  ;;  %8222 = vst [vmem:[#allocation21_spill] sm:$0xff] %v6316_v47  ;;  %v6327_v7 = vand.u32 4294901760, %v222_v42  ;;  %v52_v45 = vld [vmem:[%s8036_s0 + $0x88] sm:$0xff]  ;;  %v6343_v33 = vsub.f32 %v177_v19, %v6310_v54  ;;  %v673_v3 = vand.u32 4294901760, %v672_v26  ;;  %v6352_v56 = vand.u32 4294901760, %v174_v35 }
  0x28   :  { %v36_v19 = vld [vmem:[%s8036_s0 + $0x8] sm:$0xff]  ;;  %v51_v50 = vld [vmem:[%s8036_s0 + $0x80] sm:$0xff]  ;;  %vm3872_vm2 = vcmask 130048   ;;  %vm5951_vm3 = vmmov 0  }
  0x29   :  { %8223 = vst [vmem:[#allocation22_spill] sm:$0xff] %v6327_v7  ;;  %8225 = vst [vmem:[#allocation23_spill] sm:$0xff] %v6343_v33 }
  0x2a   :  { %4941 = vmatpush3.xpose.msra.mxu0 %v6231_v37  ;;  %4985 = vmatpush3.xpose.msra.mxu1 %v540_v0  ;;  %v8224_v0 = vand.u32 4294901760, %v6281_v32  ;;  %v219_v37 = vsel %vm139_vm0, %v53_v15, 0  ;;  %v554_v15 = vand.u32 4294901760, %v553_v8  ;;  %8226 = vst [vmem:[#allocation24_spill] sm:$0xff] %v6352_v56  ;;  %v216_v8 = vsel %vm139_vm0, %v52_v45, 0 }
  0x2b   :  { %4942 = vmatprep.subr.mxu0 %v6233_v13  ;;  %4986 = vmatprep.subr.mxu1 %v659_v61  ;;  %v679_v13 = vsub.f32 %v6296_v53, %v8073_v30  ;;  %v6358_v61 = vand.u32 4294901760, %v219_v37  ;;  %v8229_v30 = vand.u32 4294901760, %v6308_v62  ;;  %v213_v45 = vsel %vm139_vm0, %v51_v50, 0 }
  0x2c   :  { %v560_v20 = vsub.f32 %v6281_v32, %v8224_v0  ;;  %v83_v0 = vld [vmem:[%s8037_s1] sm:$0xff] }
  0x2d   :  { %8227 = vst [vmem:[#allocation25_spill] sm:$0xff] %v6358_v61  ;;  %v567_v53 = vsub.f32 %v6308_v62, %v8229_v30  ;;  %v680_v30 = vand.u32 4294901760, %v679_v13  ;;  %v6382_v62 = vand.u32 4294901760, %v216_v8  ;;  %v6394_v13 = vsub.f32 %v219_v37, %v6358_v61 }
  0x2e   :  { %4943 = vmatpush3.xpose.msra.mxu0 %v6253_v51  ;;  %4987 = vmatpush3.xpose.msra.mxu1 %v547_v40  ;;  %v171_v51 = vsel %vm139_vm0, %v37_v49, 0  ;;  %v6363_v40 = vsub.f32 %v222_v42, %v6327_v7  ;;  %v561_v26 = vand.u32 4294901760, %v560_v20  ;;  %v168_v42 = vsel %vm139_vm0, %v36_v19, 0 }
  0x2f   :  { %4944 = vmatprep.subr.mxu0 %v6261_v43  ;;  %4988 = vmatprep.subr.mxu1 %v666_v29  ;;  %v141_v29 = vsel %vm139_vm0, %v83_v0, 0  ;;  %v8230_v43 = vand.u32 4294901760, %v6316_v47  ;;  %v6380_v20 = vand.u32 4294901760, %v171_v51  ;;  %8233 = vst [vmem:[#allocation29_spill] sm:$0xff] %v6382_v62  ;;  %v6385_v0 = vsub.f32 %v174_v35, %v6352_v56  ;;  %8235 = vst [vmem:[#allocation31_spill] sm:$0xff] %v6394_v13 }
  0x30   :  { %8228 = vst [vmem:[#allocation26_spill] sm:$0xff] %v6363_v40  ;;  %v6377_v32 = vand.u32 4294901760, %v141_v29  ;;  %v8237_v19 = vand.u32 4294901760, %v6343_v33 }
  0x31   :  { %v686_v49 = vsub.f32 %v6316_v47, %v8230_v43  ;;  %8232 = vst [vmem:[#allocation28_spill] sm:$0xff] %v6380_v20  ;;  %8234 = vst [vmem:[#allocation30_spill] sm:$0xff] %v6385_v0  ;;  %v84_v43 = vld [vmem:[%s8037_s1 + $0x8] sm:$0xff]  ;;  %v6402_v47 = vand.u32 4294901760, %v168_v42 }
  0x32   :  { %8231 = vst [vmem:[#allocation27_spill] sm:$0xff] %v6377_v32  ;;  %4945 = vmatpush3.xpose.msra.mxu0 %v6278_v5  ;;  %4989 = vmatpush3.xpose.msra.mxu1 %v554_v15  ;;  %v35_v15 = vld [vmem:[%s8036_s0] sm:$0xff]  ;;  %v6400_v35 = vsub.f32 %v141_v29, %v6377_v32  ;;  %v568_v5 = vand.u32 4294901760, %v567_v53  ;;  %v574_v50 = vsub.f32 %v6343_v33, %v8237_v19  ;;  %v6414_v53 = vand.u32 4294901760, %v213_v45  ;;  %v85_v19 = vld [vmem:[%s8037_s1 + $0x10] sm:$0xff] }
  0x33   :  { %4946 = vmatprep.subr.mxu0 %v6286_v48  ;;  %4990 = vmatprep.subr.mxu1 %v673_v3  ;;  %8236 = vst [vmem:[#allocation32_spill] sm:$0xff] %v6402_v47  ;;  %v687_v3 = vand.u32 4294901760, %v686_v49  ;;  %v144_v48 = vsel %vm139_vm0, %v84_v43, 0  ;;  %v165_v38 = vsel %vm139_vm0, %v35_v15, 0  ;;  %v6418_v49 = vsub.f32 %v171_v51, %v6380_v20 }
  0x34   :  { %5004 = vmatprep.mubr.f32.mxu1 %v6377_v32  ;;  %v6409_v37 = vand.u32 4294901760, %v6400_v35  ;;  %8239 = vst [vmem:[#allocation34_spill] sm:$0xff] %v6414_v53  ;;  %v8240_v43 = vand.u32 4294901760, %v6363_v40  ;;  %v6431_v15 = vsub.f32 %v216_v8, %v6382_v62  ;;  %v6433_v51 = vand.u32 4294901760, %v144_v48 }
  0x35   :  { %v575_v33 = vand.u32 4294901760, %v574_v50  ;;  %v6442_v29 = vand.u32 4294901760, %v165_v38  ;;  %v6446_v8 = vsub.f32 %v168_v42, %v6402_v47 }
  0x36   :  { %8238 = vst [vmem:[#allocation33_spill] sm:$0xff] %v6409_v37  ;;  %4947 = vmatpush3.xpose.msra.mxu0 %v6310_v54  ;;  %4991 = vmatpush3.xpose.msra.mxu1 %v561_v26  ;;  %v693_v26 = vsub.f32 %v6363_v40, %v8240_v43  ;;  %v408_v54 = vsub.f32 %v6400_v35, %v6409_v37  ;;  %8241 = vst [vmem:[#allocation35_spill] sm:$0xff] %v6431_v15  ;;  %v8252_v37 = vand.u32 4294901760, %v6431_v15 }
  0x37   :  { %4948 = vmatprep.subr.mxu0 %v6327_v7  ;;  %4992 = vmatprep.subr.mxu1 %v680_v30  ;;  %8242 = vst [vmem:[#allocation36_spill] sm:$0xff] %v6433_v51  ;;  %v147_v7 = vsel %vm139_vm0, %v85_v19, 0  ;;  %v8244_v30 = vand.u32 4294901760, %v6385_v0  ;;  %8245 = vst [vmem:[#allocation38_spill] sm:$0xff] %v6446_v8  ;;  %v6461_v42 = vsub.f32 %v144_v48, %v6433_v51  ;;  %v98_v48 = vld [vmem:[%s8038_s2 + $0x38] sm:$0xff] }
  0x38   :  { %v6435_v14 = vand.u32 4294901760, %v408_v54  ;;  %v86_v54 = vld [vmem:[%s8037_s1 + $0x18] sm:$0xff]  ;;  %v694_v50 = vand.u32 4294901760, %v693_v26  ;;  %v6463_v40 = vand.u32 4294901760, %v147_v7  ;;  %v5949_v26 = vmov 0  }
  0x39   :  { %v581_v43 = vsub.f32 %v6385_v0, %v8244_v30  ;;  %8248 = vst [vmem:[#allocation40_spill] sm:$0xff] %v6461_v42  ;;  %5860 = vset.pattern.permute.xlu1 %v5949_v26  ;;  %5859 = vset.pattern.permute.xlu0 %v5949_v26  ;;  %v6481_v0 = vsub.f32 %v165_v38, %v6442_v29 }
  0x3a   :  { %8243 = vst [vmem:[#allocation37_spill] sm:$0xff] %v6435_v14  ;;  %4949 = vmatpush3.xpose.msra.mxu0 %v6352_v56  ;;  %4993 = vmatpush3.xpose.msra.mxu1 %v568_v5  ;;  %v8246_v5 = vand.u32 4294901760, %v6394_v13  ;;  %v6457_v56 = vsub.f32 %v213_v45, %v6414_v53  ;;  %8249 = vst [vmem:[#allocation41_spill] sm:$0xff] %v6463_v40  ;;  %v96_v45 = vld [vmem:[%s8038_s2 + $0x28] sm:$0xff]  ;;  %v707_v18 = vsub.f32 %v6431_v15, %v8252_v37  ;;  %v95_v37 = vld [vmem:[%s8038_s2 + $0x20] sm:$0xff] }
  0x3b   :  { %4950 = vmatprep.subr.mxu0 %v6358_v61  ;;  %4994 = vmatprep.subr.mxu1 %v687_v3  ;;  %v150_v61 = vsel %vm139_vm0, %v86_v54, 0  ;;  %v87_v3 = vld [vmem:[%s8037_s1 + $0x20] sm:$0xff]  ;;  %v8250_v54 = vand.u32 4294901760, %v6418_v49  ;;  %8251 = vst [vmem:[#allocation42_spill] sm:$0xff] %v6481_v0 }
  0x3c   :  { %v700_v19 = vsub.f32 %v6394_v13, %v8246_v5  ;;  %8247 = vst [vmem:[#allocation39_spill] sm:$0xff] %v6457_v56  ;;  %4956 = vmatprep.mubr.f32.mxu0 %v6435_v14  ;;  %v582_v5 = vand.u32 4294901760, %v581_v43  ;;  %v6489_v43 = vand.u32 4294901760, %v6461_v42  ;;  %v6494_v13 = vand.u32 4294901760, %v150_v61  ;;  %126 = vperm.xlu1 %5860, %v96_v45  }
  0x3d   :  { %v588_v30 = vsub.f32 %v6418_v49, %v8250_v54  ;;  %v6492_v54 = vsub.f32 %v147_v7, %v6463_v40  ;;  %v153_v38 = vsel %vm139_vm0, %v87_v3, 0  ;;  %136 = vperm.xlu0 %5859, %v98_v48   ;;  %v8255_v3 = vand.u32 4294901760, %v6446_v8 }
  0x3e   :  { %4951 = vmatpush3.xpose.msra.mxu0 %v6380_v20  ;;  %4995 = vmatpush3.xpose.msra.mxu1 %v575_v33  ;;  %v701_v26 = vand.u32 4294901760, %v700_v19  ;;  %8253 = vst [vmem:[#allocation43_spill] sm:$0xff] %v6489_v43  ;;  %8254 = vst [vmem:[#allocation44_spill] sm:$0xff] %v6494_v13  ;;  %v97_v19 = vld [vmem:[%s8038_s2 + $0x30] sm:$0xff]  ;;  %v708_v33 = vand.u32 4294901760, %v707_v18  ;;  %v6515_v15 = vand.u32 4294901760, %v153_v38 }
  0x3f   :  { %4952 = vmatprep.subr.mxu0 %v6382_v62  ;;  %4996 = vmatprep.subr.mxu1 %v694_v50  ;;  %v88_v50 = vld [vmem:[%s8037_s1 + $0x28] sm:$0xff]  ;;  %v589_v7 = vand.u32 4294901760, %v588_v30  ;;  %v595_v45 = vsub.f32 %v6446_v8, %v8255_v3  ;;  %v8256_v62 = vand.u32 4294901760, %v6457_v56  ;;  %v6520_v30 = vand.u32 4294901760, %v6492_v54  ;;  %v89_v18 = vld [vmem:[%s8037_s1 + $0x30] sm:$0xff] }
  0x40   :  { %8257 = vst [vmem:[#allocation45_spill] sm:$0xff] %v6515_v15  ;;  %v6523_v3 = vsub.f32 %v150_v61, %v6494_v13  ;;  %v156_v48 = vsel %vm139_vm0, %v88_v50, 0  ;;  %121 = vperm.xlu1 %5860, %v95_v37   ;;  %v8259_v50 = vand.u32 4294901760, %v6481_v0 }
  0x41   :  { %v714_v20 = vsub.f32 %v6457_v56, %v8256_v62  ;;  %8258 = vst [vmem:[#allocation46_spill] sm:$0xff] %v6520_v30  ;;  %131 = vperm.xlu0 %5859, %v97_v19   ;;  %v93_v62 = vld [vmem:[%s8038_s2 + $0x10] sm:$0xff]  ;;  %v596_v61 = vand.u32 4294901760, %v595_v45  ;;  %v6540_v19 = vand.u32 4294901760, %v156_v48  ;;  %v6551_v45 = vsub.f32 %v153_v38, %v6515_v15  ;;  %v92_v38 = vld [vmem:[%s8038_s2 + $0x8] sm:$0xff] }
  0x42   :  { %4953 = vmatpush3.xpose.msra.mxu0 %v6402_v47  ;;  %4997 = vmatpush3.xpose.msra.mxu1 %v582_v5  ;;  %v419_v5 = vsub.f32 %v6461_v42, %v6489_v43  ;;  %v602_v43 = vsub.f32 %v6481_v0, %v8259_v50  ;;  %v430_v47 = vsub.f32 %v6492_v54, %v6520_v30 }
  0x43   :  { %4954 = vmatprep.subr.mxu0 %v6414_v53  ;;  %4998 = vmatprep.subr.mxu1 %v701_v26  ;;  %v94_v26 = vld [vmem:[%s8038_s2 + $0x18] sm:$0xff]  ;;  %v715_v37 = vand.u32 4294901760, %v714_v20  ;;  %8260 = vst [vmem:[#allocation47_spill] sm:$0xff] %v6540_v19  ;;  %v159_v53 = vsel %vm139_vm0, %v89_v18, 0  ;;  %v91_v20 = vld [vmem:[%s8038_s2] sm:$0xff] }
  0x44   :  { %v6543_v42 = vand.u32 4294901760, %v419_v5  ;;  %111 = vperm.xlu1 %5860, %v93_v62   ;;  %v90_v5 = vld [vmem:[%s8037_s1 + $0x38] sm:$0xff]  ;;  %v6565_v18 = vand.u32 4294901760, %v159_v53  ;;  %v6568_v62 = vand.u32 4294901760, %v430_v47 }
  0x45   :  { %116 = vperm.xlu0 %5859, %v94_v26   ;;  %v6573_v26 = vand.u32 4294901760, %v6551_v45  ;;  %v162_v50 = vsel %vm139_vm0, %v90_v5, 0 }
  0x46   :  { %4955 = vmatpush3.xpose.msra.mxu0 %v6442_v29  ;;  %4999 = vmatpush3.xpose.msra.mxu1 %v589_v7  ;;  %8261 = vst [vmem:[#allocation48_spill] sm:$0xff] %v6543_v42  ;;  %v6548_v7 = vand.u32 4294901760, %v6523_v3  ;;  %8263 = vst [vmem:[#allocation50_spill] sm:$0xff] %v6565_v18  ;;  %v6584_v47 = vsub.f32 %v159_v53, %v6565_v18 }
  0x47   :  { %5000 = vmatprep.subr.mxu1 %v708_v33  ;;  %5020 = vmatprep.subr.mxu0 %v6053_v22  ;;  %v603_v33 = vand.u32 4294901760, %v602_v43  ;;  %8264 = vst [vmem:[#allocation51_spill] sm:$0xff] %v6568_v62  ;;  %8265 = vst [vmem:[#allocation52_spill] sm:$0xff] %v6573_v26 }
  0x48   :  { %8262 = vst [vmem:[#allocation49_spill] sm:$0xff] %v6548_v7  ;;  %v441_v43 = vsub.f32 %v6523_v3, %v6548_v7  ;;  %101 = vperm.xlu1 %5860, %v91_v20   ;;  %8267 = vst [vmem:[#allocation54_spill] sm:$0xff] %v6584_v47 }
  0x49   :  { %4957 = vmatmul.mubr.f32.vlgmr.msra.gmra.mxu0 %v6435_v14  ;;  %106 = vperm.xlu0 %5859, %v92_v38   ;;  %v6609_v38 = vand.u32 4294901760, %v6584_v47  ;;  %v8284_v14 = vld [vmem:[#allocation9_spill] sm:$0xff] }
  0x4a   :  { %5001 = vmatpush3.xpose.msra.mxu1 %v596_v61  ;;  %5021 = vmatpush3.xpose.msra.mxu0 %v6058_v24  ;;  %v6576_v61 = vsub.f32 %v156_v48, %v6540_v19  ;;  %v6587_v48 = vand.u32 4294901760, %v441_v43 }
  0x4b   :  { %5002 = vmatprep.subr.mxu1 %v715_v37  ;;  %5022 = vmatprep.subr.mxu0 %v6062_v25  ;;  %v452_v37 = vsub.f32 %v6551_v45, %v6573_v26  ;;  %8272 = vst [vmem:[#allocation59_spill] sm:$0xff] %v6609_v38 }
  0x4c   :  { %4958 = vmatprep.mubr.f32.mxu0 %v6543_v42  ;;  %8266 = vst [vmem:[#allocation53_spill] sm:$0xff] %v6576_v61  ;;  %8268 = vst [vmem:[#allocation55_spill] sm:$0xff] %v6587_v48  ;;  %v6592_v20 = vand.u32 4294901760, %v6576_v61 }
  0x4d   :  { %4959 = vmatmul.mubr.f32.gmra.mxu0 %v6543_v42  ;;  %v6604_v53 = vand.u32 4294901760, %v452_v37  ;;  %v8283_v42 = vld [vmem:[#allocation18_spill] sm:$0xff] }
  0x4e   :  { %5003 = vmatpush3.xpose.msra.mxu1 %v603_v33  ;;  %5023 = vmatpush3.xpose.msra.mxu0 %v6066_v27  ;;  %8269 = vst [vmem:[#allocation56_spill] sm:$0xff] %v6592_v20  ;;  %v6594_v33 = vand.u32 4294901760, %v162_v50  ;;  %v463_v5 = vsub.f32 %v6576_v61, %v6592_v20 }
  0x4f   :  { %5024 = vmatprep.subr.mxu0 %v6082_v36  ;;  %5068 = vmatprep.subr.mxu1 %v6028_v10  ;;  %8271 = vst [vmem:[#allocation58_spill] sm:$0xff] %v6604_v53 }
  0x50   :  { %4960 = vmatprep.mubr.f32.mxu0 %v6568_v62  ;;  %8270 = vst [vmem:[#allocation57_spill] sm:$0xff] %v6594_v33  ;;  %v6612_v43 = vsub.f32 %v162_v50, %v6594_v33  ;;  %v6622_v37 = vand.u32 4294901760, %v463_v5  ;;  %v474_v50 = vsub.f32 %v6584_v47, %v6609_v38 }
  0x51   :  { %5005 = vmatmul.mubr.f32.vlgmr.msra.gmra.mxu1 %v6377_v32  ;;  %4961 = vmatmul.mubr.f32.gmra.mxu0 %v6568_v62 }
  0x52   :  { %5025 = vmatpush3.xpose.msra.mxu0 %v6095_v41  ;;  %5069 = vmatpush3.xpose.msra.mxu1 %v6030_v11  ;;  %8273 = vst [vmem:[#allocation60_spill] sm:$0xff] %v6612_v43  ;;  %8274 = vst [vmem:[#allocation61_spill] sm:$0xff] %v6622_v37  ;;  %v6627_v62 = vand.u32 4294901760, %v6612_v43  ;;  %v6637_v5 = vand.u32 4294901760, %v474_v50 }
  0x53   :  { %5026 = vmatprep.subr.mxu0 %v6125_v57  ;;  %5070 = vmatprep.subr.mxu1 %v6032_v12 }
  0x54   :  { %5006 = vmatprep.mubr.f32.mxu1 %v6433_v51  ;;  %4962 = vmatprep.mubr.f32.mxu0 %v6587_v48  ;;  %8275 = vst [vmem:[#allocation62_spill] sm:$0xff] %v6627_v62  ;;  %8276 = vst [vmem:[#allocation63_spill] sm:$0xff] %v6637_v5 }
  0x55   :  { %5007 = vmatmul.mubr.f32.gmra.mxu1 %v6433_v51  ;;  %4963 = vmatmul.mubr.f32.gmra.mxu0 %v6587_v48  ;;  %v485_v48 = vsub.f32 %v6612_v43, %v6627_v62  ;;  %v8290_v51 = vld [vmem:[#allocation23_spill] sm:$0xff] }
  0x56   :  { %5027 = vmatpush3.xpose.msra.mxu0 %v6129_v59  ;;  %5071 = vmatpush3.xpose.msra.mxu1 %v6041_v16 }
  0x57   :  { %5028 = vmatprep.subr.mxu0 %v6142_v1  ;;  %5072 = vmatprep.subr.mxu1 %v6050_v21  ;;  %v6649_v50 = vand.u32 4294901760, %v485_v48  ;;  %v8278_v48 = vld [vmem:[#allocation6_spill] sm:$0xff] }
  0x58   :  { %5008 = vmatprep.mubr.f32.mxu1 %v6463_v40  ;;  %4964 = vmatprep.mubr.f32.mxu0 %v6604_v53 }
  0x59   :  { %5009 = vmatmul.mubr.f32.gmra.mxu1 %v6463_v40  ;;  %4965 = vmatmul.mubr.f32.gmra.mxu0 %v6604_v53  ;;  %8277 = vst [vmem:[#allocation64_spill] sm:$0xff] %v6649_v50  ;;  %v8282_v53 = vld [vmem:[#allocation8_spill] sm:$0xff]  ;;  %v8289_v40 = vld [vmem:[#allocation11_spill] sm:$0xff] }
  0x5a   :  { %5029 = vmatpush3.xpose.msra.mxu0 %v6155_v9  ;;  %5073 = vmatpush3.xpose.msra.mxu1 %v6055_v23 }
  0x5b   :  { %5030 = vmatprep.subr.mxu0 %v6177_v28  ;;  %5074 = vmatprep.subr.mxu1 %v6074_v31 }
  0x5c   :  { %5010 = vmatprep.mubr.f32.mxu1 %v6494_v13  ;;  %4966 = vmatprep.mubr.f32.mxu0 %v6622_v37 }
  0x5d   :  { %5011 = vmatmul.mubr.f32.gmra.mxu1 %v6494_v13  ;;  %4967 = vmatmul.mubr.f32.gmra.mxu0 %v6622_v37  ;;  %v8281_v37 = vld [vmem:[#allocation16_spill] sm:$0xff]  ;;  %v8288_v13 = vld [vmem:[#allocation21_spill] sm:$0xff] }
  0x5e   :  { %5031 = vmatpush3.xpose.msra.mxu0 %v6184_v39  ;;  %5075 = vmatpush3.xpose.msra.mxu1 %v6078_v34 }
  0x5f   :  { %5032 = vmatprep.subr.mxu0 %v6201_v52  ;;  %5076 = vmatprep.subr.mxu1 %v6104_v44 }
  0x60   :  { %5012 = vmatprep.mubr.f32.mxu1 %v6515_v15  ;;  %4968 = vmatprep.mubr.f32.mxu0 %v6637_v5 }
  0x61   :  { %5013 = vmatmul.mubr.f32.gmra.mxu1 %v6515_v15  ;;  %4969 = vmatmul.mubr.f32.gmra.mxu0 %v6637_v5  ;;  %v8279_v5 = vld [vmem:[#allocation14_spill] sm:$0xff] }
  0x62   :  { %5033 = vmatpush3.xpose.msra.mxu0 %v6210_v58  ;;  %5077 = vmatpush3.xpose.msra.mxu1 %v6119_v55  ;;  %v8287_v15 = vld [vmem:[#allocation10_spill] sm:$0xff] }
  0x63   :  { %5034 = vmatprep.subr.mxu0 %v6220_v2  ;;  %5078 = vmatprep.subr.mxu1 %v6138_v63 }
  0x64   :  { %5014 = vmatprep.mubr.f32.mxu1 %v6540_v19  ;;  %4970 = vmatprep.mubr.f32.mxu0 %v6649_v50 }
  0x65   :  { %5015 = vmatmul.mubr.f32.gmra.mxu1 %v6540_v19  ;;  %4971 = vmatmul.mubr.f32.gmra.mxu0 %v6649_v50  ;;  %v8280_v50 = vld [vmem:[#allocation7_spill] sm:$0xff] }
  0x66   :  { %5035 = vmatpush3.xpose.msra.mxu0 %v6236_v46  ;;  %5079 = vmatpush3.xpose.msra.mxu1 %v6146_v4  ;;  %v8286_v19 = vld [vmem:[#allocation19_spill] sm:$0xff] }
  0x67   :  { %5036 = vmatprep.subr.mxu0 %v6248_v60  ;;  %5080 = vmatprep.subr.mxu1 %v6164_v17 }
  0x68   :  { %5016 = vmatprep.mubr.f32.mxu1 %v6565_v18  ;;  %5052 = vmatprep.mubr.f32.mxu0 %v6400_v35 }
  0x69   :  { %5017 = vmatmul.mubr.f32.gmra.mxu1 %v6565_v18  ;;  %v8285_v18 = vld [vmem:[#allocation33_spill] sm:$0xff] }
  0x6a   :  { %5037 = vmatpush3.xpose.msra.mxu0 %v6264_v6  ;;  %5081 = vmatpush3.xpose.msra.mxu1 %v8278_v48 }
  0x6b   :  { %5038 = vmatprep.subr.mxu0 %v8279_v5  ;;  %5082 = vmatprep.subr.mxu1 %v8280_v50  ;;  %v8296_v50 = vld [vmem:[#allocation31_spill] sm:$0xff] }
  0x6c   :  { %5018 = vmatprep.mubr.f32.mxu1 %v6594_v33 }
  0x6d   :  { %5019 = vmatmul.mubr.f32.gmra.mxu1 %v6594_v33  ;;  %v8291_v33 = vld [vmem:[#allocation12_spill] sm:$0xff] }
  0x6e   :  { %5039 = vmatpush3.xpose.msra.mxu0 %v8281_v37  ;;  %5083 = vmatpush3.xpose.msra.mxu1 %v8282_v53  ;;  %v8292_v37 = vld [vmem:[#allocation26_spill] sm:$0xff]  ;;  %v8293_v53 = vld [vmem:[#allocation13_spill] sm:$0xff] }
  0x6f   :  { %5040 = vmatprep.subr.mxu0 %v8283_v42  ;;  %5084 = vmatprep.subr.mxu1 %v8284_v14  ;;  %v8294_v42 = vld [vmem:[#allocation30_spill] sm:$0xff]  ;;  %v8295_v14 = vld [vmem:[#allocation15_spill] sm:$0xff] }
  0x70   :  { %5100 = vmatprep.mubr.f32.mxu1 %v8285_v18 }
  0x72   :  { %5041 = vmatpush3.xpose.msra.mxu0 %v8286_v19  ;;  %5085 = vmatpush3.xpose.msra.mxu1 %v8287_v15  ;;  %v8297_v19 = vld [vmem:[#allocation17_spill] sm:$0xff] }
  0x73   :  { %5042 = vmatprep.subr.mxu0 %v8288_v13  ;;  %5086 = vmatprep.subr.mxu1 %v8289_v40  ;;  %v8298_v13 = vld [vmem:[#allocation20_spill] sm:$0xff]  ;;  %v8299_v40 = vld [vmem:[#allocation35_spill] sm:$0xff] }
  0x76   :  { %5043 = vmatpush3.xpose.msra.mxu0 %v8290_v51  ;;  %5087 = vmatpush3.xpose.msra.mxu1 %v8291_v33  ;;  %v8300_v51 = vld [vmem:[#allocation22_spill] sm:$0xff] }
  0x77   :  { %5044 = vmatprep.subr.mxu0 %v8292_v37  ;;  %5088 = vmatprep.subr.mxu1 %v8293_v53  ;;  %v8301_v37 = vld [vmem:[#allocation24_spill] sm:$0xff] }
  0x7a   :  { %5045 = vmatpush3.xpose.msra.mxu0 %v8294_v42  ;;  %5089 = vmatpush3.xpose.msra.mxu1 %v8295_v14  ;;  %v8302_v42 = vld [vmem:[#allocation25_spill] sm:$0xff] }
  0x7b   :  { %5046 = vmatprep.subr.mxu0 %v8296_v50  ;;  %5090 = vmatprep.subr.mxu1 %v8297_v19  ;;  %v8303_v50 = vld [vmem:[#allocation28_spill] sm:$0xff]  ;;  %v8304_v19 = vld [vmem:[#allocation29_spill] sm:$0xff] }
  0x7e   :  { %5047 = vmatpush3.xpose.msra.mxu0 %v6418_v49  ;;  %5091 = vmatpush3.xpose.msra.mxu1 %v8298_v13  ;;  %v8305_v13 = vand.u32 4294901760, %v6053_v22  ;;  %v8311_v22 = vand.u32 4294901760, %v6066_v27  ;;  %v8315_v27 = vand.u32 4294901760, %v6125_v57  ;;  %v8328_v57 = vld [vmem:[#allocation7_spill] sm:$0xff] }
  0x7f   :  { %5048 = vmatprep.subr.mxu0 %v8299_v40  ;;  %5092 = vmatprep.subr.mxu1 %v8300_v51  ;;  %v8306_v51 = vld [vmem:[#allocation32_spill] sm:$0xff] }
  0x82   :  { %5049 = vmatpush3.xpose.msra.mxu0 %v6446_v8  ;;  %5093 = vmatpush3.xpose.msra.mxu1 %v8301_v37  ;;  %v8307_v8 = vand.u32 4294901760, %v6058_v24  ;;  %v8308_v37 = vld [vmem:[#allocation40_spill] sm:$0xff]  ;;  %v8313_v24 = vand.u32 4294901760, %v6095_v41  ;;  %v8325_v41 = vand.u32 4294901760, %v6248_v60 }
  0x83   :  { %5050 = vmatprep.subr.mxu0 %v6457_v56  ;;  %5094 = vmatprep.subr.mxu1 %v8302_v42  ;;  %v8309_v56 = vld [vmem:[#allocation34_spill] sm:$0xff] }
  0x86   :  { %5051 = vmatpush3.xpose.msra.mxu0 %v6481_v0  ;;  %5095 = vmatpush3.xpose.msra.mxu1 %v8303_v50  ;;  %v8310_v0 = vand.u32 4294901760, %v6062_v25  ;;  %v8314_v25 = vld [vmem:[#allocation43_spill] sm:$0xff] }
  0x87   :  { %5096 = vmatprep.subr.mxu1 %v8304_v19  ;;  %5116 = vmatprep.subr.mxu0 %v8305_v13  ;;  %v8312_v13 = vand.u32 4294901760, %v6082_v36  ;;  %v8324_v36 = vand.u32 4294901760, %v6236_v46  ;;  %v8340_v46 = vld [vmem:[#allocation23_spill] sm:$0xff] }
  0x88   :  { %v8341_v60 = vand.u32 4294901760, %v8340_v46 }
  0x89   :  { %5053 = vmatmul.mubr.f32.vlgmr.msra.gmra.mxu0 %v6400_v35 }
  0x8a   :  { %5097 = vmatpush3.xpose.msra.mxu1 %v8306_v51  ;;  %5117 = vmatpush3.xpose.msra.mxu0 %v8307_v8 }
  0x8b   :  { %5054 = vmatprep.mubr.f32.mxu0 %v8308_v37  ;;  %5098 = vmatprep.subr.mxu1 %v8309_v56 }
  0x8c   :  { %5118 = vmatprep.subr.mxu0 %v8310_v0  ;;  %v8342_v0 = vld [vmem:[#allocation26_spill] sm:$0xff] }
  0x8d   :  { %5055 = vmatmul.mubr.f32.gmra.mxu0 %v8308_v37  ;;  %v8343_v8 = vand.u32 4294901760, %v8342_v0  ;;  %v8362_v0 = vld [vmem:[#allocation41_spill] sm:$0xff] }
  0x8e   :  { %5099 = vmatpush3.xpose.msra.mxu1 %v6442_v29  ;;  %5119 = vmatpush3.xpose.msra.mxu0 %v8311_v22  ;;  %v8346_v22 = vld [vmem:[#allocation31_spill] sm:$0xff] }
  0x8f   :  { %5056 = vmatprep.mubr.f32.mxu0 %v6492_v54  ;;  %5120 = vmatprep.subr.mxu0 %v8312_v13  ;;  %v8347_v13 = vand.u32 4294901760, %v8346_v22  ;;  %v75_v22 = vld [vmem:[%s8036_s0 + $0x140] sm:$0xff] }
  0x90   :  { %5164 = vmatprep.subr.mxu1 %v6028_v10  ;;  %v8316_v10 = vand.u32 4294901760, %v6129_v59  ;;  %v8329_v59 = vld [vmem:[#allocation16_spill] sm:$0xff] }
  0x91   :  { %5057 = vmatmul.mubr.f32.gmra.mxu0 %v6492_v54  ;;  %5101 = vmatmul.mubr.f32.vlgmr.msra.gmra.mxu1 %v8285_v18 }
  0x92   :  { %5121 = vmatpush3.xpose.msra.mxu0 %v8313_v24  ;;  %5165 = vmatpush3.xpose.msra.mxu1 %v6030_v11  ;;  %v8317_v11 = vand.u32 4294901760, %v6142_v1  ;;  %v8331_v1 = vld [vmem:[#allocation8_spill] sm:$0xff]  ;;  %v8348_v24 = vld [vmem:[#allocation17_spill] sm:$0xff] }
  0x93   :  { %5058 = vmatprep.mubr.f32.mxu0 %v6523_v3  ;;  %5102 = vmatprep.mubr.f32.mxu1 %v8314_v25 }
  0x94   :  { %5122 = vmatprep.subr.mxu0 %v8315_v27  ;;  %5166 = vmatprep.subr.mxu1 %v6032_v12  ;;  %v8318_v12 = vand.u32 4294901760, %v6155_v9 }
  0x95   :  { %5059 = vmatmul.mubr.f32.gmra.mxu0 %v6523_v3  ;;  %5103 = vmatmul.mubr.f32.gmra.mxu1 %v8314_v25  ;;  %v8391_v25 = vld [vmem:[#allocation55_spill] sm:$0xff] }
  0x96   :  { %5123 = vmatpush3.xpose.msra.mxu0 %v8316_v10  ;;  %5167 = vmatpush3.xpose.msra.mxu1 %v6041_v16  ;;  %v8319_v16 = vand.u32 4294901760, %v6177_v28  ;;  %v8335_v28 = vld [vmem:[#allocation19_spill] sm:$0xff]  ;;  %v8349_v10 = vand.u32 4294901760, %v6418_v49  ;;  %v79_v49 = vld [vmem:[%s8036_s0 + $0x160] sm:$0xff] }
  0x97   :  { %5060 = vmatprep.mubr.f32.mxu0 %v6551_v45  ;;  %5104 = vmatprep.mubr.f32.mxu1 %v6520_v30 }
  0x98   :  { %5124 = vmatprep.subr.mxu0 %v8317_v11  ;;  %5168 = vmatprep.subr.mxu1 %v6050_v21  ;;  %v8320_v21 = vand.u32 4294901760, %v6184_v39  ;;  %v8336_v39 = vand.u32 4294901760, %v8335_v28  ;;  %v8350_v11 = vld [vmem:[#allocation20_spill] sm:$0xff] }
  0x99   :  { %5061 = vmatmul.mubr.f32.gmra.mxu0 %v6551_v45  ;;  %5105 = vmatmul.mubr.f32.gmra.mxu1 %v6520_v30 }
  0x9a   :  { %5125 = vmatpush3.xpose.msra.mxu0 %v8318_v12  ;;  %5169 = vmatpush3.xpose.msra.mxu1 %v6055_v23  ;;  %v8321_v23 = vand.u32 4294901760, %v6201_v52  ;;  %v8337_v52 = vld [vmem:[#allocation21_spill] sm:$0xff]  ;;  %v8351_v12 = vand.u32 4294901760, %v8299_v40  ;;  %v8356_v40 = vld [vmem:[#allocation39_spill] sm:$0xff] }
  0x9b   :  { %5062 = vmatprep.mubr.f32.mxu0 %v6576_v61  ;;  %5106 = vmatprep.mubr.f32.mxu1 %v6548_v7 }
  0x9c   :  { %5126 = vmatprep.subr.mxu0 %v8319_v16  ;;  %5170 = vmatprep.subr.mxu1 %v6074_v31  ;;  %v8322_v31 = vand.u32 4294901760, %v6210_v58  ;;  %v8338_v58 = vand.u32 4294901760, %v8337_v52  ;;  %v8352_v16 = vld [vmem:[#allocation22_spill] sm:$0xff] }
  0x9d   :  { %5063 = vmatmul.mubr.f32.gmra.mxu0 %v6576_v61  ;;  %5107 = vmatmul.mubr.f32.gmra.mxu1 %v6548_v7  ;;  %v8393_v61 = vld [vmem:[#allocation58_spill] sm:$0xff] }
  0x9e   :  { %5127 = vmatpush3.xpose.msra.mxu0 %v8320_v21  ;;  %5171 = vmatpush3.xpose.msra.mxu1 %v6078_v34  ;;  %v8323_v34 = vand.u32 4294901760, %v6220_v2  ;;  %v8339_v2 = vld [vmem:[#allocation11_spill] sm:$0xff] }
  0x9f   :  { %5064 = vmatprep.mubr.f32.mxu0 %v6584_v47  ;;  %5108 = vmatprep.mubr.f32.mxu1 %v6573_v26 }
  0xa0   :  { %5128 = vmatprep.subr.mxu0 %v8321_v23  ;;  %5172 = vmatprep.subr.mxu1 %v6104_v44  ;;  %v8326_v44 = vand.u32 4294901760, %v6264_v6  ;;  %v82_v6 = vld [vmem:[%s8036_s0 + $0x178] sm:$0xff] }
  0xa1   :  { %5065 = vmatmul.mubr.f32.gmra.mxu0 %v6584_v47  ;;  %5109 = vmatmul.mubr.f32.gmra.mxu1 %v6573_v26  ;;  %v8390_v47 = vld [vmem:[#allocation51_spill] sm:$0xff] }
  0xa2   :  { %5129 = vmatpush3.xpose.msra.mxu0 %v8322_v31  ;;  %5173 = vmatpush3.xpose.msra.mxu1 %v6119_v55  ;;  %v8327_v55 = vand.u32 4294901760, %v8279_v5  ;;  %v8344_v5 = vld [vmem:[#allocation30_spill] sm:$0xff] }
  0xa3   :  { %5066 = vmatprep.mubr.f32.mxu0 %v6612_v43  ;;  %5110 = vmatprep.mubr.f32.mxu1 %v6592_v20 }
  0xa4   :  { %5130 = vmatprep.subr.mxu0 %v8323_v34  ;;  %5174 = vmatprep.subr.mxu1 %v6138_v63  ;;  %v8330_v63 = vand.u32 4294901760, %v8329_v59  ;;  %v8353_v34 = vld [vmem:[#allocation38_spill] sm:$0xff]  ;;  %v297_v59 = vsel %vm139_vm0, %v79_v49, 0 }
  0xa5   :  { %5067 = vmatmul.mubr.f32.gmra.mxu0 %v6612_v43  ;;  %5111 = vmatmul.mubr.f32.gmra.mxu1 %v6592_v20 }
  0xa6   :  { %5131 = vmatpush3.xpose.msra.mxu0 %v8324_v36  ;;  %5175 = vmatpush3.xpose.msra.mxu1 %v6146_v4  ;;  %v8332_v4 = vld [vmem:[#allocation18_spill] sm:$0xff]  ;;  %v8354_v36 = vand.u32 4294901760, %v8353_v34 }
  0xa7   :  { %5112 = vmatprep.mubr.f32.mxu1 %v6609_v38  ;;  %5132 = vmatprep.subr.mxu0 %v8325_v41  ;;  %v8333_v9 = vand.u32 4294901760, %v8332_v4  ;;  %v8355_v41 = vld [vmem:[#allocation24_spill] sm:$0xff]  ;;  %v8358_v4 = vld [vmem:[#allocation42_spill] sm:$0xff] }
  0xa8   :  { %5176 = vmatprep.subr.mxu1 %v6164_v17  ;;  %5148 = vmatprep.mubr.f32.mxu0 %v6377_v32  ;;  %v8334_v17 = vld [vmem:[#allocation9_spill] sm:$0xff] }
  0xa9   :  { %5113 = vmatmul.mubr.f32.gmra.mxu1 %v6609_v38 }
  0xaa   :  { %5133 = vmatpush3.xpose.msra.mxu0 %v8326_v44  ;;  %5177 = vmatpush3.xpose.msra.mxu1 %v8278_v48  ;;  %v8345_v48 = vand.u32 4294901760, %v8344_v5  ;;  %v8357_v44 = vand.u32 4294901760, %v8356_v40 }
  0xab   :  { %5114 = vmatprep.mubr.f32.mxu1 %v6627_v62  ;;  %5134 = vmatprep.subr.mxu0 %v8327_v55 }
  0xac   :  { %5178 = vmatprep.subr.mxu1 %v8328_v57 }
  0xad   :  { %5115 = vmatmul.mubr.f32.gmra.mxu1 %v6627_v62  ;;  %v69_v62 = vld [vmem:[%s8036_s0 + $0x110] sm:$0xff] }
  0xae   :  { %5135 = vmatpush3.xpose.msra.mxu0 %v8330_v63  ;;  %5179 = vmatpush3.xpose.msra.mxu1 %v8331_v1  ;;  %v78_v1 = vld [vmem:[%s8036_s0 + $0x158] sm:$0xff] }
  0xaf   :  { %5136 = vmatprep.subr.mxu0 %v8333_v9  ;;  %5180 = vmatprep.subr.mxu1 %v8334_v17  ;;  %v8359_v9 = vand.u32 4294901760, %v8358_v4 }
  0xb0   :  { %5196 = vmatprep.mubr.f32.mxu1 %v6377_v32 }
  0xb2   :  { %5137 = vmatpush3.xpose.msra.mxu0 %v8336_v39  ;;  %5181 = vmatpush3.xpose.msra.mxu1 %v8287_v15  ;;  %v306_v15 = vsel %vm139_vm0, %v82_v6, 0  ;;  %v294_v39 = vsel %vm139_vm0, %v78_v1, 0  ;;  %v8368_v1 = vld [vmem:[#allocation47_spill] sm:$0xff] }
  0xb3   :  { %5138 = vmatprep.subr.mxu0 %v8338_v58  ;;  %5182 = vmatprep.subr.mxu1 %v8339_v2  ;;  %v6821_v27 = vand.u32 4294901760, %v306_v15  ;;  %v6884_v58 = vand.u32 4294901760, %v294_v39 }
  0xb5   :  { %v6836_v23 = vsub.f32 %v306_v15, %v6821_v27  ;;  %v6908_v15 = vsub.f32 %v294_v39, %v6884_v58 }
  0xb6   :  { %5139 = vmatpush3.xpose.msra.mxu0 %v8341_v60  ;;  %5183 = vmatpush3.xpose.msra.mxu1 %v8291_v33  ;;  %v81_v33 = vld [vmem:[%s8036_s0 + $0x170] sm:$0xff] }
  0xb7   :  { %5140 = vmatprep.subr.mxu0 %v8343_v8  ;;  %5184 = vmatprep.subr.mxu1 %v8293_v53  ;;  %v303_v53 = vsel %vm139_vm0, %v81_v33, 0  ;;  %v6851_v57 = vand.u32 4294901760, %v6836_v23  ;;  %v7099_v7 = vpop.permute.xlu1 %126 }
  0xb8   :  { %v6833_v21 = vand.u32 4294901760, %v303_v53  ;;  %8380 = vst [vmem:[#allocation40_spill] sm:$0xff] %v7099_v7 }
  0xb9   :  { %v1671_v17 = vsub.f32 %v6836_v23, %v6851_v57 }
  0xba   :  { %5141 = vmatpush3.xpose.msra.mxu0 %v8345_v48  ;;  %5185 = vmatpush3.xpose.msra.mxu1 %v8295_v14  ;;  %v80_v14 = vld [vmem:[%s8036_s0 + $0x168] sm:$0xff]  ;;  %v6855_v63 = vsub.f32 %v303_v53, %v6833_v21  ;;  %v6926_v53 = vand.u32 4294901760, %v6908_v15 }
  0xbb   :  { %5142 = vmatprep.subr.mxu0 %v8347_v13  ;;  %5186 = vmatprep.subr.mxu1 %v8348_v24  ;;  %v300_v31 = vsel %vm139_vm0, %v80_v14, 0  ;;  %v1672_v46 = vand.u32 4294901760, %v1671_v17  ;;  %v8364_v13 = vld [vmem:[#allocation44_spill] sm:$0xff]  ;;  %v7115_v43 = vpop.permute.xlu1 %121 }
  0xbc   :  { %v6848_v55 = vand.u32 4294901760, %v300_v31  ;;  %v6870_v28 = vand.u32 4294901760, %v6855_v63  ;;  %8365 = vst [vmem:[#allocation33_spill] sm:$0xff] %v6926_v53  ;;  %v1699_v34 = vsub.f32 %v6908_v15, %v6926_v53  ;;  %8383 = vst [vmem:[#allocation16_spill] sm:$0xff] %v7115_v43 }
  0xbe   :  { %5143 = vmatpush3.xpose.msra.mxu0 %v8349_v10  ;;  %5187 = vmatpush3.xpose.msra.mxu1 %v8350_v11  ;;  %v6874_v52 = vsub.f32 %v300_v31, %v6848_v55  ;;  %v8366_v31 = vld [vmem:[#allocation45_spill] sm:$0xff]  ;;  %v1700_v4 = vand.u32 4294901760, %v1699_v34 }
  0xbf   :  { %5144 = vmatprep.subr.mxu0 %v8351_v12  ;;  %5188 = vmatprep.subr.mxu1 %v8352_v16  ;;  %v285_v12 = vsel %vm139_vm0, %v75_v22, 0  ;;  %v74_v16 = vld [vmem:[%s8036_s0 + $0x138] sm:$0xff] }
  0xc0   :  { %v6893_v60 = vand.u32 4294901760, %v6874_v52  ;;  %v282_v40 = vsel %vm139_vm0, %v74_v16, 0 }
  0xc2   :  { %5145 = vmatpush3.xpose.msra.mxu0 %v8354_v36  ;;  %5189 = vmatpush3.xpose.msra.mxu1 %v8355_v41  ;;  %8361 = vst [vmem:[#allocation6_spill] sm:$0xff] %v6893_v60  ;;  %v6946_v36 = vand.u32 4294901760, %v285_v12 }
  0xc3   :  { %5146 = vmatprep.subr.mxu0 %v8357_v44  ;;  %5190 = vmatprep.subr.mxu1 %v8302_v42  ;;  %v6865_v42 = vand.u32 4294901760, %v297_v59 }
  0xc5   :  { %v6887_v2 = vsub.f32 %v297_v59, %v6865_v42  ;;  %v73_v59 = vld [vmem:[%s8036_s0 + $0x130] sm:$0xff] }
  0xc6   :  { %5147 = vmatpush3.xpose.msra.mxu0 %v8359_v9  ;;  %5191 = vmatpush3.xpose.msra.mxu1 %v8303_v50  ;;  %v8360_v50 = vld [vmem:[#allocation36_spill] sm:$0xff]  ;;  %v6963_v9 = vand.u32 4294901760, %v282_v40 }
  0xc7   :  { %5192 = vmatprep.subr.mxu1 %v8304_v19  ;;  %5434 = vmatprep.subr.mxu0 %v6821_v27  ;;  %v77_v19 = vld [vmem:[%s8036_s0 + $0x150] sm:$0xff]  ;;  %v6905_v8 = vand.u32 4294901760, %v6887_v2 }
  0xc8   :  { %v291_v6 = vsel %vm139_vm0, %v77_v19, 0  ;;  %v279_v19 = vsel %vm139_vm0, %v73_v59, 0 }
  0xc9   :  { %5149 = vmatmul.mubr.f32.vlgmr.msra.gmra.mxu0 %v6377_v32  ;;  %8363 = vst [vmem:[#allocation14_spill] sm:$0xff] %v6905_v8  ;;  %v6912_v48 = vand.u32 4294901760, %v291_v6  ;;  %v1692_v24 = vsub.f32 %v6887_v2, %v6905_v8  ;;  %v8387_v8 = vld [vmem:[#allocation48_spill] sm:$0xff] }
  0xca   :  { %5193 = vmatpush3.xpose.msra.mxu1 %v8306_v51  ;;  %5435 = vmatpush3.xpose.msra.mxu0 %v6821_v27  ;;  %v1678_v51 = vsub.f32 %v6855_v63, %v6870_v28 }
  0xcb   :  { %5150 = vmatprep.mubr.f32.mxu0 %v8360_v50  ;;  %5194 = vmatprep.subr.mxu1 %v8309_v56  ;;  %v76_v56 = vld [vmem:[%s8036_s0 + $0x148] sm:$0xff]  ;;  %v6932_v14 = vsub.f32 %v291_v6, %v6912_v48  ;;  %v1693_v49 = vand.u32 4294901760, %v1692_v24 }
  0xcc   :  { %5436 = vmatprep.subr.mxu0 %v6833_v21  ;;  %v1679_v5 = vand.u32 4294901760, %v1678_v51  ;;  %v288_v33 = vsel %vm139_vm0, %v76_v56, 0  ;;  %v72_v51 = vld [vmem:[%s8036_s0 + $0x128] sm:$0xff]  ;;  %v6983_v56 = vand.u32 4294901760, %v279_v19 }
  0xcd   :  { %5151 = vmatmul.mubr.f32.gmra.mxu0 %v8360_v50  ;;  %v6929_v11 = vand.u32 4294901760, %v288_v33  ;;  %v6949_v41 = vand.u32 4294901760, %v6932_v14  ;;  %v8370_v6 = vld [vmem:[#allocation50_spill] sm:$0xff]  ;;  %v276_v24 = vsel %vm139_vm0, %v72_v51, 0 }
  0xce   :  { %5195 = vmatpush3.xpose.msra.mxu1 %v6442_v29  ;;  %5437 = vmatpush3.xpose.msra.mxu0 %v6833_v21  ;;  %v1685_v29 = vsub.f32 %v6874_v52, %v6893_v60  ;;  %v7003_v16 = vand.u32 4294901760, %v276_v24 }
  0xcf   :  { %5152 = vmatprep.mubr.f32.mxu0 %v8362_v0  ;;  %5438 = vmatprep.subr.mxu0 %v6848_v55  ;;  %8367 = vst [vmem:[#allocation10_spill] sm:$0xff] %v6949_v41  ;;  %v6953_v44 = vsub.f32 %v288_v33, %v6929_v11  ;;  %v1706_v17 = vsub.f32 %v6932_v14, %v6949_v41  ;;  %v267_v41 = vsel %vm139_vm0, %v69_v62, 0 }
  0xd0   :  { %5478 = vmatprep.subr.mxu1 %v1672_v46  ;;  %v1686_v10 = vand.u32 4294901760, %v1685_v29  ;;  %v7064_v62 = vand.u32 4294901760, %v267_v41 }
  0xd1   :  { %5153 = vmatmul.mubr.f32.gmra.mxu0 %v8362_v0  ;;  %5197 = vmatmul.mubr.f32.vlgmr.msra.gmra.mxu1 %v6377_v32  ;;  %v6969_v39 = vand.u32 4294901760, %v6953_v44  ;;  %v1707_v29 = vand.u32 4294901760, %v1706_v17  ;;  %v70_v17 = vld [vmem:[%s8036_s0 + $0x118] sm:$0xff] }
  0xd2   :  { %5439 = vmatpush3.xpose.msra.mxu0 %v6848_v55  ;;  %5479 = vmatpush3.xpose.msra.mxu1 %v1672_v46  ;;  %v6973_v46 = vsub.f32 %v285_v12, %v6946_v36  ;;  %v8372_v12 = vld [vmem:[#allocation57_spill] sm:$0xff] }
  0xd3   :  { %5154 = vmatprep.mubr.f32.mxu0 %v8364_v13  ;;  %5198 = vmatprep.mubr.f32.mxu1 %v8360_v50  ;;  %8369 = vst [vmem:[#allocation12_spill] sm:$0xff] %v6969_v39  ;;  %v1713_v33 = vsub.f32 %v6953_v44, %v6969_v39  ;;  %v270_v39 = vsel %vm139_vm0, %v70_v17, 0 }
  0xd4   :  { %5440 = vmatprep.subr.mxu0 %v6865_v42  ;;  %5480 = vmatprep.subr.mxu1 %v1679_v5  ;;  %v6992_v22 = vand.u32 4294901760, %v6973_v46  ;;  %v7047_v17 = vand.u32 4294901760, %v270_v39 }
  0xd5   :  { %5155 = vmatmul.mubr.f32.gmra.mxu0 %v8364_v13  ;;  %5199 = vmatmul.mubr.f32.gmra.mxu1 %v8360_v50  ;;  %v1714_v59 = vand.u32 4294901760, %v1713_v33 }
  0xd6   :  { %5441 = vmatpush3.xpose.msra.mxu0 %v6865_v42  ;;  %5481 = vmatpush3.xpose.msra.mxu1 %v1679_v5  ;;  %v6986_v5 = vsub.f32 %v282_v40, %v6963_v9  ;;  %8371 = vst [vmem:[#allocation13_spill] sm:$0xff] %v6992_v22  ;;  %v7010_v40 = vsub.f32 %v279_v19, %v6983_v56 }
  0xd7   :  { %5156 = vmatprep.mubr.f32.mxu0 %v8366_v31  ;;  %5200 = vmatprep.mubr.f32.mxu1 %v8362_v0  ;;  %v7067_v38 = vsub.f32 %v270_v39, %v7047_v17 }
  0xd8   :  { %5442 = vmatprep.subr.mxu0 %v6884_v58  ;;  %5482 = vmatprep.subr.mxu1 %v1686_v10  ;;  %v7028_v33 = vand.u32 4294901760, %v7010_v40 }
  0xd9   :  { %5157 = vmatmul.mubr.f32.gmra.mxu0 %v8366_v31  ;;  %5201 = vmatmul.mubr.f32.gmra.mxu1 %v8362_v0 }
  0xda   :  { %5443 = vmatpush3.xpose.msra.mxu0 %v6884_v58  ;;  %5483 = vmatpush3.xpose.msra.mxu1 %v1686_v10  ;;  %v71_v10 = vld [vmem:[%s8036_s0 + $0x120] sm:$0xff]  ;;  %8374 = vst [vmem:[#allocation35_spill] sm:$0xff] %v7028_v33 }
  0xdb   :  { %5158 = vmatprep.mubr.f32.mxu0 %v8368_v1  ;;  %5202 = vmatprep.mubr.f32.mxu1 %v8364_v13  ;;  %v273_v34 = vsel %vm139_vm0, %v71_v10, 0  ;;  %v7031_v10 = vsub.f32 %v276_v24, %v7003_v16 }
  0xdc   :  { %5444 = vmatprep.subr.mxu0 %v6912_v48  ;;  %5484 = vmatprep.subr.mxu1 %v1693_v49  ;;  %v7021_v19 = vand.u32 4294901760, %v273_v34 }
  0xdd   :  { %5159 = vmatmul.mubr.f32.gmra.mxu0 %v8368_v1  ;;  %5203 = vmatmul.mubr.f32.gmra.mxu1 %v8364_v13 }
  0xde   :  { %5445 = vmatpush3.xpose.msra.mxu0 %v6912_v48  ;;  %5485 = vmatpush3.xpose.msra.mxu1 %v1693_v49  ;;  %v7006_v49 = vand.u32 4294901760, %v6986_v5 }
  0xdf   :  { %5160 = vmatprep.mubr.f32.mxu0 %v8370_v6  ;;  %5204 = vmatprep.mubr.f32.mxu1 %v8366_v31 }
  0xe0   :  { %5446 = vmatprep.subr.mxu0 %v6929_v11  ;;  %5486 = vmatprep.subr.mxu1 %v1700_v4  ;;  %8373 = vst [vmem:[#allocation15_spill] sm:$0xff] %v7006_v49  ;;  %v1727_v51 = vsub.f32 %v6986_v5, %v7006_v49  ;;  %v7041_v49 = vsub.f32 %v273_v34, %v7021_v19  ;;  %v68_v34 = vld [vmem:[%s8036_s0 + $0x108] sm:$0xff] }
  0xe1   :  { %5161 = vmatmul.mubr.f32.gmra.mxu0 %v8370_v6  ;;  %5205 = vmatmul.mubr.f32.gmra.mxu1 %v8366_v31  ;;  %v264_v20 = vsel %vm139_vm0, %v68_v34, 0  ;;  %v7081_v34 = vand.u32 4294901760, %v7067_v38 }
  0xe2   :  { %5447 = vmatpush3.xpose.msra.mxu0 %v6929_v11  ;;  %5487 = vmatpush3.xpose.msra.mxu1 %v1700_v4  ;;  %v1720_v4 = vsub.f32 %v6973_v46, %v6992_v22  ;;  %v1728_v24 = vand.u32 4294901760, %v1727_v51  ;;  %v7078_v39 = vand.u32 4294901760, %v264_v20 }
  0xe3   :  { %5162 = vmatprep.mubr.f32.mxu0 %v8372_v12  ;;  %5206 = vmatprep.mubr.f32.mxu1 %v8368_v1  ;;  %8378 = vst [vmem:[#allocation29_spill] sm:$0xff] %v7081_v34 }
  0xe4   :  { %5448 = vmatprep.subr.mxu0 %v6946_v36  ;;  %5488 = vmatprep.subr.mxu1 %v1707_v29  ;;  %v1721_v22 = vand.u32 4294901760, %v1720_v4  ;;  %v1734_v4 = vsub.f32 %v7010_v40, %v7028_v33 }
  0xe5   :  { %5163 = vmatmul.mubr.f32.gmra.mxu0 %v8372_v12  ;;  %5207 = vmatmul.mubr.f32.gmra.mxu1 %v8368_v1 }
  0xe6   :  { %5449 = vmatpush3.xpose.msra.mxu0 %v6946_v36  ;;  %5489 = vmatpush3.xpose.msra.mxu1 %v1707_v29  ;;  %v8375_v29 = vld [vmem:[#allocation37_spill] sm:$0xff]  ;;  %v1735_v51 = vand.u32 4294901760, %v1734_v4 }
  0xe7   :  { %5208 = vmatprep.mubr.f32.mxu1 %v8370_v6  ;;  %5450 = vmatprep.subr.mxu0 %v6963_v9 }
  0xe8   :  { %5490 = vmatprep.subr.mxu1 %v1714_v59  ;;  %5466 = vmatprep.mubr.f32.mxu0 %v8375_v29  ;;  %v7050_v29 = vand.u32 4294901760, %v7031_v10 }
  0xe9   :  { %5209 = vmatmul.mubr.f32.gmra.mxu1 %v8370_v6 }
  0xea   :  { %5451 = vmatpush3.xpose.msra.mxu0 %v6963_v9  ;;  %5491 = vmatpush3.xpose.msra.mxu1 %v1714_v59  ;;  %8376 = vst [vmem:[#allocation25_spill] sm:$0xff] %v7050_v29  ;;  %v7059_v59 = vand.u32 4294901760, %v7041_v49  ;;  %v1741_v33 = vsub.f32 %v7031_v10, %v7050_v29 }
  0xeb   :  { %5210 = vmatprep.mubr.f32.mxu1 %v8372_v12  ;;  %5452 = vmatprep.subr.mxu0 %v6983_v56 }
  0xec   :  { %5492 = vmatprep.subr.mxu1 %v1721_v22  ;;  %8377 = vst [vmem:[#allocation28_spill] sm:$0xff] %v7059_v59  ;;  %v1748_v4 = vsub.f32 %v7041_v49, %v7059_v59  ;;  %v1742_v29 = vand.u32 4294901760, %v1741_v33  ;;  %v1755_v33 = vsub.f32 %v7067_v38, %v7081_v34 }
  0xed   :  { %5211 = vmatmul.mubr.f32.gmra.mxu1 %v8372_v12 }
  0xee   :  { %5453 = vmatpush3.xpose.msra.mxu0 %v6983_v56  ;;  %5493 = vmatpush3.xpose.msra.mxu1 %v1721_v22  ;;  %v67_v22 = vld [vmem:[%s8036_s0 + $0x100] sm:$0xff] }
  0xef   :  { %5454 = vmatprep.subr.mxu0 %v7003_v16  ;;  %5494 = vmatprep.subr.mxu1 %v1728_v24  ;;  %v261_v53 = vsel %vm139_vm0, %v67_v22, 0 }
  0xf0   :  { %5510 = vmatprep.mubr.f32.mxu1 %v6377_v32  ;;  %v7084_v32 = vsub.f32 %v267_v41, %v7064_v62  ;;  %v7091_v59 = vand.u32 4294901760, %v261_v53  ;;  %v7097_v41 = vsub.f32 %v264_v20, %v7078_v39  ;;  %v7111_v20 = vpop.permute.xlu0 %136 }
  0xf1   :  { %8382 = vst [vmem:[#allocation7_spill] sm:$0xff] %v7111_v20 }
  0xf2   :  { %5455 = vmatpush3.xpose.msra.mxu0 %v7003_v16  ;;  %5495 = vmatpush3.xpose.msra.mxu1 %v1728_v24  ;;  %v1749_v24 = vand.u32 4294901760, %v1748_v4  ;;  %v7094_v26 = vand.u32 4294901760, %v7084_v32  ;;  %v7106_v4 = vand.u32 4294901760, %v7097_v41  ;;  %v7109_v34 = vsub.f32 %v261_v53, %v7091_v59 }
  0xf3   :  { %5456 = vmatprep.subr.mxu0 %v7021_v19  ;;  %5496 = vmatprep.subr.mxu1 %v1735_v51 }
  0xf4   :  { %8379 = vst [vmem:[#allocation32_spill] sm:$0xff] %v7094_v26  ;;  %v1762_v22 = vsub.f32 %v7084_v32, %v7094_v26  ;;  %8381 = vst [vmem:[#allocation34_spill] sm:$0xff] %v7106_v4  ;;  %v7120_v26 = vand.u32 4294901760, %v7109_v34  ;;  %v7126_v20 = vpop.permute.xlu0 %131 }
  0xf5   :  { %8385 = vst [vmem:[#allocation18_spill] sm:$0xff] %v7126_v20 }
  0xf6   :  { %5457 = vmatpush3.xpose.msra.mxu0 %v7021_v19  ;;  %5497 = vmatpush3.xpose.msra.mxu1 %v1735_v51  ;;  %v1756_v51 = vand.u32 4294901760, %v1755_v33  ;;  %v1769_v33 = vsub.f32 %v7097_v41, %v7106_v4  ;;  %8384 = vst [vmem:[#allocation8_spill] sm:$0xff] %v7120_v26 }
  0xf7   :  { %5458 = vmatprep.subr.mxu0 %v7047_v17  ;;  %5498 = vmatprep.subr.mxu1 %v1742_v29 }
  0xf8   :  { %v1770_v53 = vand.u32 4294901760, %v1769_v33  ;;  %v7133_v30 = vpop.permute.xlu0 %116 }
  0xf9   :  { %8388 = vst [vmem:[#allocation19_spill] sm:$0xff] %v7133_v30 }
  0xfa   :  { %5459 = vmatpush3.xpose.msra.mxu0 %v7047_v17  ;;  %5499 = vmatpush3.xpose.msra.mxu1 %v1742_v29  ;;  %v1763_v29 = vand.u32 4294901760, %v1762_v22  ;;  %v7128_v22 = vpop.permute.xlu1 %111 }
  0xfb   :  { %5460 = vmatprep.subr.mxu0 %v7064_v62  ;;  %5500 = vmatprep.subr.mxu1 %v1749_v24  ;;  %8386 = vst [vmem:[#allocation9_spill] sm:$0xff] %v7128_v22 }
  0xfe   :  { %5461 = vmatpush3.xpose.msra.mxu0 %v7064_v62  ;;  %5501 = vmatpush3.xpose.msra.mxu1 %v1749_v24  ;;  %v1776_v24 = vsub.f32 %v7109_v34, %v7120_v26  ;;  %v7137_v33 = vpop.permute.xlu1 %101 }
  0xff   :  { %5462 = vmatprep.subr.mxu0 %v7078_v39  ;;  %5502 = vmatprep.subr.mxu1 %v1756_v51  ;;  %8389 = vst [vmem:[#allocation21_spill] sm:$0xff] %v7137_v33 }
 0x100   :  { %v1777_v4 = vand.u32 4294901760, %v1776_v24 }
 0x102   :  { %5463 = vmatpush3.xpose.msra.mxu0 %v7078_v39  ;;  %5503 = vmatpush3.xpose.msra.mxu1 %v1756_v51 }
 0x103   :  { %5464 = vmatprep.subr.mxu0 %v7091_v59  ;;  %5504 = vmatprep.subr.mxu1 %v1763_v29 }
 0x106   :  { %5465 = vmatpush3.xpose.msra.mxu0 %v7091_v59  ;;  %5505 = vmatpush3.xpose.msra.mxu1 %v1763_v29 }
 0x107   :  { %5506 = vmatprep.subr.mxu1 %v1770_v53  ;;  %5522 = vmatprep.subr.mxu0 %v6836_v23 }
 0x109   :  { %5467 = vmatmul.mubr.f32.vlgmr.msra.gmra.mxu0 %v8387_v8  ;;  %v411_v51 = vpop.f32.mrf.mxu0 }
 0x10a   :  { %5507 = vmatpush3.xpose.msra.mxu1 %v1770_v53  ;;  %5523 = vmatpush3.xpose.msra.mxu0 %v6836_v23  ;;  %v412_v8 = vadd.f32 %v411_v51, %v7137_v33  ;;  %v7145_v53 = vpop.permute.xlu0 %106 }
 0x10b   :  { %5508 = vmatprep.subr.mxu1 %v1777_v4  ;;  %5524 = vmatprep.subr.mxu0 %v6855_v63  ;;  %v413_v26 = vpop.f32.mrf.mxu0  ;;  %8392 = vst [vmem:[#allocation11_spill] sm:$0xff] %v7145_v53 }
 0x10c   :  { %5469 = vmatprep.mubr.f32.mxu0 %v8390_v47  ;;  %v414_v24 = vadd.f32 %v413_v26, %v7137_v33 }
 0x10d   :  { %v422_v29 = vpop.f32.mrf.mxu0  ;;  %5470 = vmatmul.mubr.f32.gmra.mxu0 %v8391_v25 }
 0x10e   :  { %5509 = vmatpush3.xpose.msra.mxu1 %v1777_v4  ;;  %5525 = vmatpush3.xpose.msra.mxu0 %v6855_v63  ;;  %v8394_v4 = vld [vmem:[#allocation61_spill] sm:$0xff]  ;;  %v423_v51 = vadd.f32 %v422_v29, %v7145_v53 }
 0x10f   :  { %5526 = vmatprep.subr.mxu0 %v6874_v52  ;;  %5566 = vmatprep.subr.mxu1 %v6821_v27  ;;  %v424_v23 = vpop.f32.mrf.mxu0 }
 0x110   :  { %5472 = vmatprep.mubr.f32.mxu0 %v8393_v61  ;;  %v425_v33 = vadd.f32 %v424_v23, %v7145_v53 }
 0x111   :  { %v720_v47 = vpop.f32.mrf.mxu1  ;;  %5511 = vmatmul.mubr.f32.vlgmr.msra.gmra.mxu1 %v8360_v50  ;;  %v433_v25 = vpop.f32.mrf.mxu0  ;;  %5473 = vmatmul.mubr.f32.gmra.mxu0 %v8394_v4  ;;  %v8396_v4 = vld [vmem:[#allocation64_spill] sm:$0xff] }
 0x112   :  { %v7151_v63 = vadd.f32 %v720_v47, %v412_v8  ;;  %5527 = vmatpush3.xpose.msra.mxu0 %v6874_v52  ;;  %5567 = vmatpush3.xpose.msra.mxu1 %v6821_v27  ;;  %v8395_v8 = vld [vmem:[#allocation63_spill] sm:$0xff]  ;;  %v434_v29 = vadd.f32 %v433_v25, %v7128_v22 }
 0x113   :  { %v722_v60 = vpop.f32.mrf.mxu1  ;;  %5528 = vmatprep.subr.mxu0 %v6887_v2  ;;  %5568 = vmatprep.subr.mxu1 %v6833_v21  ;;  %v435_v26 = vpop.f32.mrf.mxu0 }
 0x114   :  { %v7158_v61 = vadd.f32 %v722_v60, %v414_v24  ;;  %5513 = vmatprep.mubr.f32.mxu1 %v8362_v0  ;;  %5475 = vmatprep.mubr.f32.mxu0 %v8395_v8  ;;  %v436_v8 = vadd.f32 %v435_v26, %v7128_v22 }
 0x115   :  { %v727_v47 = vpop.f32.mrf.mxu1  ;;  %v444_v52 = vpop.f32.mrf.mxu0  ;;  %5514 = vmatmul.mubr.f32.gmra.mxu1 %v8364_v13  ;;  %5476 = vmatmul.mubr.f32.gmra.mxu0 %v8396_v4 }
 0x116   :  { %5529 = vmatpush3.xpose.msra.mxu0 %v6887_v2  ;;  %5569 = vmatpush3.xpose.msra.mxu1 %v6833_v21  ;;  %v7168_v60 = vadd.f32 %v727_v47, %v423_v51  ;;  %v445_v25 = vadd.f32 %v444_v52, %v7133_v30  ;;  %v2547_v52 = vld [vmem:[%s8040_s4 + $0x8] sm:$0xff] }
 0x117   :  { %5530 = vmatprep.subr.mxu0 %v6908_v15  ;;  %5570 = vmatprep.subr.mxu1 %v6848_v55  ;;  %v729_v23 = vpop.f32.mrf.mxu1  ;;  %v446_v24 = vpop.f32.mrf.mxu0 }
 0x118   :  { %v7173_v53 = vadd.f32 %v729_v23, %v425_v33  ;;  %5516 = vmatprep.mubr.f32.mxu1 %v8366_v31  ;;  %5554 = vmatprep.mubr.f32.mxu0 %v6400_v35  ;;  %v447_v35 = vadd.f32 %v446_v24, %v7133_v30 }
 0x119   :  { %v734_v2 = vpop.f32.mrf.mxu1  ;;  %v455_v4 = vpop.f32.mrf.mxu0  ;;  %5517 = vmatmul.mubr.f32.gmra.mxu1 %v8368_v1  ;;  %2555 = vperm.xlu0 %5859, %v2547_v52  }
 0x11a   :  { %5531 = vmatpush3.xpose.msra.mxu0 %v6908_v15  ;;  %5571 = vmatpush3.xpose.msra.mxu1 %v6848_v55  ;;  %v7181_v51 = vadd.f32 %v734_v2, %v434_v29  ;;  %v456_v29 = vadd.f32 %v455_v4, %v7115_v43  ;;  %v3866_v4 = vld [vmem:[%s8042_s6] sm:$0xff] }
 0x11b   :  { %5532 = vmatprep.subr.mxu0 %v6932_v14  ;;  %5572 = vmatprep.subr.mxu1 %v6865_v42  ;;  %v736_v33 = vpop.f32.mrf.mxu1  ;;  %v457_v26 = vpop.f32.mrf.mxu0 }
 0x11c   :  { %v7186_v47 = vadd.f32 %v736_v33, %v436_v8  ;;  %5519 = vmatprep.mubr.f32.mxu1 %v8370_v6  ;;  %v458_v8 = vadd.f32 %v457_v26, %v7115_v43  ;;  %v8200_v43 = vmov 0.0  }
 0x11d   :  { %v741_v23 = vpop.f32.mrf.mxu1  ;;  %v466_v15 = vpop.f32.mrf.mxu0  ;;  %5520 = vmatmul.mubr.f32.gmra.mxu1 %v8372_v12  ;;  %3869 = vperm.xlu0 %5859, %v3866_v4  }
 0x11e   :  { %5533 = vmatpush3.xpose.msra.mxu0 %v6932_v14  ;;  %5573 = vmatpush3.xpose.msra.mxu1 %v6865_v42  ;;  %v7196_v2 = vadd.f32 %v741_v23, %v445_v25  ;;  %v467_v25 = vadd.f32 %v466_v15, %v7099_v7 }
 0x11f   :  { %5534 = vmatprep.subr.mxu0 %v6953_v44  ;;  %5574 = vmatprep.subr.mxu1 %v6884_v58  ;;  %v743_v24 = vpop.f32.mrf.mxu1  ;;  %v468_v22 = vpop.f32.mrf.mxu0 }
 0x120   :  { %v7201_v33 = vadd.f32 %v743_v24, %v447_v35  ;;  %5598 = vmatprep.mubr.f32.mxu1 %v8285_v18  ;;  %v469_v26 = vadd.f32 %v468_v22, %v7099_v7  ;;  %v8426_v7 = vld [vmem:[#allocation7_spill] sm:$0xff] }
 0x121   :  { %v748_v14 = vpop.f32.mrf.mxu1  ;;  %v477_v52 = vpop.f32.mrf.mxu0 }
 0x122   :  { %5535 = vmatpush3.xpose.msra.mxu0 %v6953_v44  ;;  %5575 = vmatpush3.xpose.msra.mxu1 %v6884_v58  ;;  %v7210_v23 = vadd.f32 %v748_v14, %v456_v29  ;;  %v478_v44 = vadd.f32 %v477_v52, %v7126_v20  ;;  %v4865_v29 = vld [vmem:[#allocation2] sm:$0x1] }
 0x123   :  { %5536 = vmatprep.subr.mxu0 %v6973_v46  ;;  %5576 = vmatprep.subr.mxu1 %v6912_v48  ;;  %v750_v18 = vpop.f32.mrf.mxu1  ;;  %v2546_v14 = vld [vmem:[%s8040_s4] sm:$0xff] }
 0x124   :  { %v7215_v35 = vadd.f32 %v750_v18, %v458_v8  ;;  %4868 = vperm.xlu0 %5859, %v4865_v29   ;;  %2550 = vperm.xlu1 %5860, %v2546_v14  }
 0x125   :  { %v755_v24 = vpop.f32.mrf.mxu1 }
 0x126   :  { %5537 = vmatpush3.xpose.msra.mxu0 %v6973_v46  ;;  %5577 = vmatpush3.xpose.msra.mxu1 %v6912_v48  ;;  %v7220_v15 = vadd.f32 %v755_v24, %v467_v25  ;;  %v4838_v25 = vld [vmem:[%s8043_s7] sm:$0xff] }
 0x127   :  { %5538 = vmatprep.subr.mxu0 %v6986_v5  ;;  %5578 = vmatprep.subr.mxu1 %v6929_v11  ;;  %v757_v22 = vpop.f32.mrf.mxu1  ;;  %v8398_v24 = vld [vmem:[#allocation53_spill] sm:$0xff] }
 0x128   :  { %v7227_v8 = vadd.f32 %v757_v22, %v469_v26  ;;  %4841 = vperm.xlu1 %5860, %v4838_v25   ;;  %v8403_v22 = vld [vmem:[#allocation60_spill] sm:$0xff] }
 0x129   :  { %v762_v46 = vpop.f32.mrf.mxu1 }
 0x12a   :  { %5539 = vmatpush3.xpose.msra.mxu0 %v6986_v5  ;;  %5579 = vmatpush3.xpose.msra.mxu1 %v6929_v11  ;;  %v7231_v4 = vadd.f32 %v762_v46, %v478_v44  ;;  %v7254_v5 = vpop.f32.mrf.mxu0  ;;  %v8404_v46 = vld [vmem:[#allocation49_spill] sm:$0xff] }
 0x12b   :  { %5540 = vmatprep.subr.mxu0 %v7010_v40  ;;  %5580 = vmatprep.subr.mxu1 %v6946_v36 }
 0x12e   :  { %5541 = vmatpush3.xpose.msra.mxu0 %v7010_v40  ;;  %5581 = vmatpush3.xpose.msra.mxu1 %v6946_v36  ;;  %v7268_v40 = vpop.f32.mrf.mxu1 }
 0x12f   :  { %5542 = vmatprep.subr.mxu0 %v7031_v10  ;;  %5582 = vmatprep.subr.mxu1 %v6963_v9 }
 0x132   :  { %5543 = vmatpush3.xpose.msra.mxu0 %v7031_v10  ;;  %5583 = vmatpush3.xpose.msra.mxu1 %v6963_v9  ;;  %v7275_v10 = vpop.f32.mrf.mxu1 }
 0x133   :  { %5544 = vmatprep.subr.mxu0 %v7041_v49  ;;  %5584 = vmatprep.subr.mxu1 %v6983_v56 }
 0x136   :  { %5545 = vmatpush3.xpose.msra.mxu0 %v7041_v49  ;;  %5585 = vmatpush3.xpose.msra.mxu1 %v6983_v56  ;;  %v7260_v49 = vpop.f32.mrf.mxu0 }
 0x137   :  { %5546 = vmatprep.subr.mxu0 %v7067_v38  ;;  %5586 = vmatprep.subr.mxu1 %v7003_v16 }
 0x13a   :  { %5547 = vmatpush3.xpose.msra.mxu0 %v7067_v38  ;;  %5587 = vmatpush3.xpose.msra.mxu1 %v7003_v16  ;;  %v7266_v38 = vpop.f32.mrf.mxu0 }
 0x13b   :  { %5548 = vmatprep.subr.mxu0 %v7084_v32  ;;  %5588 = vmatprep.subr.mxu1 %v7021_v19 }
 0x13e   :  { %5549 = vmatpush3.xpose.msra.mxu0 %v7084_v32  ;;  %5589 = vmatpush3.xpose.msra.mxu1 %v7021_v19 }
 0x13f   :  { %5550 = vmatprep.subr.mxu0 %v7097_v41  ;;  %5590 = vmatprep.subr.mxu1 %v7047_v17 }
 0x142   :  { %5551 = vmatpush3.xpose.msra.mxu0 %v7097_v41  ;;  %5591 = vmatpush3.xpose.msra.mxu1 %v7047_v17 }
 0x143   :  { %5552 = vmatprep.subr.mxu0 %v7109_v34  ;;  %5592 = vmatprep.subr.mxu1 %v7064_v62 }
 0x146   :  { %5553 = vmatpush3.xpose.msra.mxu0 %v7109_v34  ;;  %5593 = vmatpush3.xpose.msra.mxu1 %v7064_v62 }
 0x147   :  { %5594 = vmatprep.subr.mxu1 %v7078_v39  ;;  %5610 = vmatprep.subr.mxu0 %v6851_v57 }
 0x149   :  { %v906_v32 = vpop.f32.mrf.mxu0  ;;  %5555 = vmatmul.mubr.f32.vlgmr.msra.gmra.mxu0 %v8308_v37  ;;  %v7285_v37 = vpop.f32.mrf.mxu1 }
 0x14a   :  { %v907_v41 = vadd.f32 %v906_v32, %v7151_v63  ;;  %5595 = vmatpush3.xpose.msra.mxu1 %v7078_v39  ;;  %5611 = vmatpush3.xpose.msra.mxu0 %v6851_v57  ;;  %v8405_v32 = vld [vmem:[#allocation52_spill] sm:$0xff] }
 0x14b   :  { %v908_v18 = vpop.f32.mrf.mxu0  ;;  %5557 = vmatprep.mubr.f32.mxu0 %v6492_v54  ;;  %5596 = vmatprep.subr.mxu1 %v7091_v59  ;;  %v8397_v54 = vld [vmem:[#allocation6_spill] sm:$0xff] }
 0x14c   :  { %v909_v34 = vadd.f32 %v908_v18, %v7158_v61  ;;  %5612 = vmatprep.subr.mxu0 %v6870_v28 }
 0x14d   :  { %v914_v26 = vpop.f32.mrf.mxu0  ;;  %5558 = vmatmul.mubr.f32.gmra.mxu0 %v6523_v3  ;;  %v8399_v3 = vld [vmem:[#allocation43_spill] sm:$0xff] }
 0x14e   :  { %v915_v63 = vadd.f32 %v914_v26, %v7168_v60  ;;  %5597 = vmatpush3.xpose.msra.mxu1 %v7091_v59  ;;  %5613 = vmatpush3.xpose.msra.mxu0 %v6870_v28  ;;  %v8400_v60 = vld [vmem:[#allocation54_spill] sm:$0xff]  ;;  %v8409_v26 = vld [vmem:[#allocation56_spill] sm:$0xff] }
 0x14f   :  { %v916_v57 = vpop.f32.mrf.mxu0  ;;  %5560 = vmatprep.mubr.f32.mxu0 %v6551_v45  ;;  %5614 = vmatprep.subr.mxu0 %v8397_v54  ;;  %v8401_v45 = vld [vmem:[#allocation46_spill] sm:$0xff] }
 0x150   :  { %v917_v61 = vadd.f32 %v916_v57, %v7173_v53  ;;  %5654 = vmatprep.subr.mxu1 %v6821_v27  ;;  %v8402_v53 = vld [vmem:[#allocation14_spill] sm:$0xff] }
 0x151   :  { %v1068_v52 = vpop.f32.mrf.mxu1  ;;  %5561 = vmatmul.mubr.f32.gmra.mxu0 %v8398_v24  ;;  %5599 = vmatmul.mubr.f32.vlgmr.msra.gmra.mxu1 %v8399_v3  ;;  %v8411_v57 = vld [vmem:[#allocation10_spill] sm:$0xff]  ;;  %v8414_v3 = vld [vmem:[#allocation13_spill] sm:$0xff] }
 0x152   :  { %v7296_v44 = vadd.f32 %v1068_v52, %v907_v41  ;;  %5615 = vmatpush3.xpose.msra.mxu0 %v8397_v54  ;;  %5655 = vmatpush3.xpose.msra.mxu1 %v6821_v27  ;;  %v8406_v41 = vld [vmem:[#allocation33_spill] sm:$0xff]  ;;  %v8412_v54 = vld [vmem:[#allocation62_spill] sm:$0xff]  ;;  %v8413_v52 = vld [vmem:[#allocation12_spill] sm:$0xff] }
 0x153   :  { %v1070_v28 = vpop.f32.mrf.mxu1  ;;  %5563 = vmatprep.mubr.f32.mxu0 %v8400_v60  ;;  %5601 = vmatprep.mubr.f32.mxu1 %v8401_v45  ;;  %v8415_v60 = vld [vmem:[#allocation15_spill] sm:$0xff] }
 0x154   :  { %v7302_v29 = vadd.f32 %v1070_v28, %v909_v34  ;;  %5616 = vmatprep.subr.mxu0 %v8402_v53  ;;  %5656 = vmatprep.subr.mxu1 %v6833_v21  ;;  %v8408_v34 = vld [vmem:[#allocation27_spill] sm:$0xff] }
 0x155   :  { %v1077_v14 = vpop.f32.mrf.mxu1  ;;  %5564 = vmatmul.mubr.f32.gmra.mxu0 %v8403_v22  ;;  %5602 = vmatmul.mubr.f32.gmra.mxu1 %v8404_v46  ;;  %v8417_v22 = vld [vmem:[#allocation25_spill] sm:$0xff] }
 0x156   :  { %v7308_v25 = vadd.f32 %v1077_v14, %v915_v63  ;;  %5617 = vmatpush3.xpose.msra.mxu0 %v8402_v53  ;;  %5657 = vmatpush3.xpose.msra.mxu1 %v6833_v21  ;;  %v7321_v63 = vpop.f32.mrf.mxu0  ;;  %v8410_v21 = vld [vmem:[#allocation59_spill] sm:$0xff] }
 0x157   :  { %v1079_v27 = vpop.f32.mrf.mxu1  ;;  %5604 = vmatprep.mubr.f32.mxu1 %v8405_v32  ;;  %5618 = vmatprep.subr.mxu0 %v8406_v41  ;;  %v8416_v53 = vld [vmem:[#allocation35_spill] sm:$0xff] }
 0x158   :  { %v7314_v18 = vadd.f32 %v1079_v27, %v917_v61  ;;  %5658 = vmatprep.subr.mxu1 %v6848_v55  ;;  %5642 = vmatprep.mubr.f32.mxu0 %v8408_v34  ;;  %v7329_v61 = vpop.f32.mrf.mxu0  ;;  %v8418_v27 = vld [vmem:[#allocation28_spill] sm:$0xff] }
 0x159   :  { %5605 = vmatmul.mubr.f32.gmra.mxu1 %v8409_v26  ;;  %v7338_v24 = vpop.f32.mrf.mxu1  ;;  %v8420_v26 = vld [vmem:[#allocation32_spill] sm:$0xff] }
 0x15a   :  { %8407 = vst [vmem:[#allocation23_spill] sm:$0xff] %v7314_v18  ;;  %5619 = vmatpush3.xpose.msra.mxu0 %v8406_v41  ;;  %5659 = vmatpush3.xpose.msra.mxu1 %v6848_v55  ;;  %v7336_v55 = vpop.f32.mrf.mxu0  ;;  %v8419_v41 = vld [vmem:[#allocation29_spill] sm:$0xff] }
 0x15b   :  { %5607 = vmatprep.mubr.f32.mxu1 %v8410_v21  ;;  %5620 = vmatprep.subr.mxu0 %v8411_v57  ;;  %v7346_v28 = vpop.f32.mrf.mxu1 }
 0x15c   :  { %5660 = vmatprep.subr.mxu1 %v6865_v42 }
 0x15d   :  { %5608 = vmatmul.mubr.f32.gmra.mxu1 %v8412_v54  ;;  %v7354_v45 = vpop.f32.mrf.mxu1 }
 0x15e   :  { %5621 = vmatpush3.xpose.msra.mxu0 %v8411_v57  ;;  %5661 = vmatpush3.xpose.msra.mxu1 %v6865_v42  ;;  %v7344_v42 = vpop.f32.mrf.mxu0  ;;  %v8421_v57 = vld [vmem:[#allocation34_spill] sm:$0xff] }
 0x15f   :  { %5622 = vmatprep.subr.mxu0 %v8413_v52  ;;  %5662 = vmatprep.subr.mxu1 %v6884_v58  ;;  %v7362_v14 = vpop.f32.mrf.mxu1 }
 0x160   :  { %5686 = vmatprep.mubr.f32.mxu1 %v8408_v34 }
 0x161   :  { %v7370_v46 = vpop.f32.mrf.mxu1 }
 0x162   :  { %5623 = vmatpush3.xpose.msra.mxu0 %v8413_v52  ;;  %5663 = vmatpush3.xpose.msra.mxu1 %v6884_v58  ;;  %v7352_v58 = vpop.f32.mrf.mxu0  ;;  %v8422_v52 = vld [vmem:[#allocation8_spill] sm:$0xff] }
 0x163   :  { %5624 = vmatprep.subr.mxu0 %v8414_v3  ;;  %5664 = vmatprep.subr.mxu1 %v6912_v48  ;;  %v7378_v32 = vpop.f32.mrf.mxu1 }
 0x165   :  { %v7386_v34 = vpop.f32.mrf.mxu1 }
 0x166   :  { %5625 = vmatpush3.xpose.msra.mxu0 %v8414_v3  ;;  %5665 = vmatpush3.xpose.msra.mxu1 %v6912_v48  ;;  %v7360_v48 = vpop.f32.mrf.mxu0 }
 0x167   :  { %5626 = vmatprep.subr.mxu0 %v8415_v60  ;;  %5666 = vmatprep.subr.mxu1 %v6929_v11  ;;  %v7394_v21 = vpop.f32.mrf.mxu1 }
 0x169   :  { %v7402_v54 = vpop.f32.mrf.mxu1 }
 0x16a   :  { %5627 = vmatpush3.xpose.msra.mxu0 %v8415_v60  ;;  %5667 = vmatpush3.xpose.msra.mxu1 %v6929_v11  ;;  %v7368_v11 = vpop.f32.mrf.mxu0 }
 0x16b   :  { %5628 = vmatprep.subr.mxu0 %v8416_v53  ;;  %5668 = vmatprep.subr.mxu1 %v6946_v36  ;;  %v7410_v3 = vpop.f32.mrf.mxu1 }
 0x16e   :  { %5629 = vmatpush3.xpose.msra.mxu0 %v8416_v53  ;;  %5669 = vmatpush3.xpose.msra.mxu1 %v6946_v36  ;;  %v7376_v36 = vpop.f32.mrf.mxu0 }
 0x16f   :  { %5630 = vmatprep.subr.mxu0 %v8417_v22  ;;  %5670 = vmatprep.subr.mxu1 %v6963_v9 }
 0x172   :  { %5631 = vmatpush3.xpose.msra.mxu0 %v8417_v22  ;;  %5671 = vmatpush3.xpose.msra.mxu1 %v6963_v9  ;;  %v7384_v9 = vpop.f32.mrf.mxu0 }
 0x173   :  { %5632 = vmatprep.subr.mxu0 %v8418_v27  ;;  %5672 = vmatprep.subr.mxu1 %v6983_v56 }
 0x176   :  { %5633 = vmatpush3.xpose.msra.mxu0 %v8418_v27  ;;  %5673 = vmatpush3.xpose.msra.mxu1 %v6983_v56  ;;  %v7392_v56 = vpop.f32.mrf.mxu0 }
 0x177   :  { %5634 = vmatprep.subr.mxu0 %v8419_v41  ;;  %5674 = vmatprep.subr.mxu1 %v7003_v16 }
 0x17a   :  { %5635 = vmatpush3.xpose.msra.mxu0 %v8419_v41  ;;  %5675 = vmatpush3.xpose.msra.mxu1 %v7003_v16  ;;  %v7400_v16 = vpop.f32.mrf.mxu0 }
 0x17b   :  { %5636 = vmatprep.subr.mxu0 %v8420_v26  ;;  %5676 = vmatprep.subr.mxu1 %v7021_v19 }
 0x17e   :  { %5637 = vmatpush3.xpose.msra.mxu0 %v8420_v26  ;;  %5677 = vmatpush3.xpose.msra.mxu1 %v7021_v19  ;;  %v7408_v19 = vpop.f32.mrf.mxu0 }
 0x17f   :  { %5638 = vmatprep.subr.mxu0 %v8421_v57  ;;  %5678 = vmatprep.subr.mxu1 %v7047_v17 }
 0x182   :  { %5639 = vmatpush3.xpose.msra.mxu0 %v8421_v57  ;;  %5679 = vmatpush3.xpose.msra.mxu1 %v7047_v17  ;;  %v7416_v17 = vpop.f32.mrf.mxu1 }
 0x183   :  { %5640 = vmatprep.subr.mxu0 %v8422_v52  ;;  %5680 = vmatprep.subr.mxu1 %v7064_v62 }
 0x186   :  { %5641 = vmatpush3.xpose.msra.mxu0 %v8422_v52  ;;  %5681 = vmatpush3.xpose.msra.mxu1 %v7064_v62  ;;  %v7422_v62 = vpop.f32.mrf.mxu1 }
 0x187   :  { %5682 = vmatprep.subr.mxu1 %v7078_v39  ;;  %8423 = vst [vmem:[#allocation26_spill] sm:$0xff] %v7422_v62 }
 0x189   :  { %v1299_v60 = vpop.f32.mrf.mxu0  ;;  %5643 = vmatmul.mubr.f32.vlgmr.msra.gmra.mxu0 %v8360_v50 }
 0x18a   :  { %5683 = vmatpush3.xpose.msra.mxu1 %v7078_v39  ;;  %5645 = vmatprep.mubr.f32.mxu0 %v8362_v0 }
 0x18b   :  { %v1301_v53 = vpop.f32.mrf.mxu0  ;;  %5684 = vmatprep.subr.mxu1 %v7091_v59 }
 0x18d   :  { %v1306_v22 = vpop.f32.mrf.mxu0  ;;  %5646 = vmatmul.mubr.f32.gmra.mxu0 %v8364_v13 }
 0x18e   :  { %5685 = vmatpush3.xpose.msra.mxu1 %v7091_v59  ;;  %5648 = vmatprep.mubr.f32.mxu0 %v8366_v31 }
 0x18f   :  { %v7424_v27 = vpop.f32.mrf.mxu0 }
 0x190   :  { %8424 = vst [vmem:[#allocation30_spill] sm:$0xff] %v7424_v27  ;;  %v491_v27 = vadd.f32 %v7266_v38, %v8426_v7  ;;  %v923_v38 = vadd.f32 %v7321_v63, %v7181_v51 }
 0x191   :  { %v7426_v41 = vpop.f32.mrf.mxu0  ;;  %v1452_v39 = vpop.f32.mrf.mxu1  ;;  %5649 = vmatmul.mubr.f32.gmra.mxu0 %v8368_v1  ;;  %5687 = vmatmul.mubr.f32.vlgmr.msra.gmra.mxu1 %v8360_v50  ;;  %v480_v50 = vadd.f32 %v7254_v5, %v7126_v20  ;;  %v925_v5 = vadd.f32 %v7329_v61, %v7186_v47 }
 0x192   :  { %8425 = vst [vmem:[#allocation31_spill] sm:$0xff] %v7426_v41  ;;  %5651 = vmatprep.mubr.f32.mxu0 %v8370_v6  ;;  %5689 = vmatprep.mubr.f32.mxu1 %v8362_v0  ;;  %v489_v0 = vadd.f32 %v7260_v49, %v8426_v7  ;;  %v772_v20 = vadd.f32 %v7285_v37, %v491_v27 }
 0x193   :  { %v1315_v26 = vpop.f32.mrf.mxu0  ;;  %v1454_v57 = vpop.f32.mrf.mxu1  ;;  %v933_v7 = vadd.f32 %v7344_v42, %v7201_v33  ;;  %v1089_v47 = vadd.f32 %v7346_v28, %v925_v5  ;;  %v1087_v51 = vadd.f32 %v7338_v24, %v923_v38  ;;  %v8427_v42 = vmov 0.0  }
 0x195   :  { %v7432_v59 = vpop.f32.mrf.mxu0  ;;  %v1459_v52 = vpop.f32.mrf.mxu1  ;;  %5652 = vmatmul.mubr.f32.gmra.mxu0 %v8372_v12  ;;  %5690 = vmatmul.mubr.f32.gmra.mxu1 %v8364_v13  ;;  %v765_v13 = vadd.f32 %v7268_v40, %v480_v50  ;;  %v939_v40 = vadd.f32 %v7352_v58, %v7210_v23  ;;  %v1098_v33 = vadd.f32 %v7362_v14, %v933_v7 }
 0x196   :  { %5692 = vmatprep.mubr.f32.mxu1 %v8366_v31  ;;  %2645 = vmatprep.mubr.f32.mxu0 %v8200_v43  ;;  %v770_v31 = vadd.f32 %v7275_v10, %v489_v0  ;;  %v1302_v10 = vadd.f32 %v1301_v53, %v7302_v29  ;;  %v947_v23 = vadd.f32 %v7368_v11, %v7220_v15 }
 0x197   :  { %v1322_v30 = vpop.f32.mrf.mxu0  ;;  %v7442_v62 = vpop.f32.mrf.mxu1  ;;  %v1316_v29 = vadd.f32 %v1315_v26, %v1089_v47  ;;  %v949_v7 = vadd.f32 %v7376_v36, %v7227_v8  ;;  %v955_v14 = vadd.f32 %v7384_v9, %v7231_v4  ;;  %v957_v53 = vadd.f32 %v7392_v56, %v765_v13  ;;  %v8430_v47 = vld [vmem:[#allocation30_spill] sm:$0xff] }
 0x198   :  { %v1114_v8 = vadd.f32 %v7386_v34, %v947_v23 }
 0x199   :  { %v1327_v18 = vpop.f32.mrf.mxu0  ;;  %v7446_v41 = vpop.f32.mrf.mxu1  ;;  %5693 = vmatmul.mubr.f32.gmra.mxu1 %v8368_v1  ;;  %v1300_v1 = vadd.f32 %v1299_v60, %v7296_v44  ;;  %v1307_v44 = vadd.f32 %v1306_v22, %v7308_v25  ;;  %v1323_v25 = vadd.f32 %v1322_v30, %v1098_v33  ;;  %v1105_v60 = vadd.f32 %v7370_v46, %v939_v40 }
 0x19a   :  { %5695 = vmatprep.mubr.f32.mxu1 %v8370_v6  ;;  %v931_v6 = vadd.f32 %v7336_v55, %v7196_v2  ;;  %v941_v2 = vadd.f32 %v7360_v48, %v7215_v35  ;;  %v1455_v55 = vadd.f32 %v1454_v57, %v1302_v10  ;;  %v963_v22 = vadd.f32 %v7400_v16, %v770_v31 }
 0x19b   :  { %v1329_v49 = vpop.f32.mrf.mxu0  ;;  %v1468_v43 = vpop.f32.mrf.mxu1  ;;  %v1453_v63 = vadd.f32 %v1452_v39, %v1300_v1  ;;  %v1460_v24 = vadd.f32 %v1459_v52, %v1307_v44  ;;  %v965_v30 = vadd.f32 %v7408_v19, %v772_v20  ;;  %v1116_v46 = vadd.f32 %v7394_v21, %v949_v7 }
 0x19c   :  { %v1107_v35 = vadd.f32 %v7378_v32, %v941_v2  ;;  %v1469_v48 = vadd.f32 %v1468_v43, %v1316_v29  ;;  %v2449_v36 = vmul.f32 0.5, %v1455_v55  ;;  %v1123_v43 = vadd.f32 %v7402_v54, %v955_v14  ;;  %v8431_v2 = vld [vmem:[#allocation26_spill] sm:$0xff] }
 0x19d   :  { %v1334_v61 = vpop.f32.mrf.mxu0  ;;  %v1473_v37 = vpop.f32.mrf.mxu1  ;;  %5696 = vmatmul.mubr.f32.gmra.mxu1 %v8372_v12  ;;  %v1096_v12 = vadd.f32 %v7354_v45, %v931_v6  ;;  %v2448_v45 = vmul.f32 0.5, %v1453_v63  ;;  %v2451_v32 = vmul.f32 0.5, %v1460_v24  ;;  %v1328_v9 = vadd.f32 %v1327_v18, %v1105_v60  ;;  %v8428_v18 = vld [vmem:[#allocation31_spill] sm:$0xff] }
 0x19e   :  { %2812 = vmatprep.mubr.f32.mxu1 %v8427_v42  ;;  %v1330_v39 = vadd.f32 %v1329_v49, %v1107_v35  ;;  %v1125_v56 = vadd.f32 %v7410_v3, %v957_v53  ;;  %v2455_v16 = vmul.f32 0.5, %v1469_v48  ;;  %v1335_v57 = vadd.f32 %v1334_v61, %v1114_v8  ;;  %v2545_v8 = vld [vmem:[%s8039_s3 + $0x8] sm:$0xff] }
 0x19f   :  { %v1336_v28 = vpop.f32.mrf.mxu0  ;;  %v1475_v58 = vpop.f32.mrf.mxu1  ;;  %5861 = vtanh.f32 %v2448_v45  ;;  %v1321_v20 = vadd.f32 %v7432_v59, %v1096_v12  ;;  %v1132_v54 = vadd.f32 %v7416_v17, %v963_v22  ;;  %v1314_v5 = vadd.f32 %v8428_v18, %v1087_v51  ;;  %v8429_v59 = vld [vmem:[#allocation23_spill] sm:$0xff] }
 0x1a0   :  { %v1476_v27 = vadd.f32 %v1475_v58, %v1323_v25  ;;  %5863 = vtanh.f32 %v2449_v36  ;;  %v1337_v0 = vadd.f32 %v1336_v28, %v1116_v46  ;;  %v1309_v10 = vadd.f32 %v8430_v47, %v8429_v59 }
 0x1a1   :  { %v1341_v15 = vpop.f32.mrf.mxu0  ;;  %v1480_v11 = vpop.f32.mrf.mxu1  ;;  %5865 = vtanh.f32 %v2451_v32  ;;  %v1474_v3 = vadd.f32 %v1473_v37, %v1321_v20  ;;  %v1467_v61 = vadd.f32 %v7446_v41, %v1314_v5  ;;  %v2544_v37 = vld [vmem:[%s8039_s3] sm:$0xff]  ;;  %v1134_v23 = vadd.f32 %v8431_v2, %v965_v30 }
 0x1a2   :  { %v2458_v34 = vmul.f32 0.5, %v1476_v27  ;;  %v1481_v19 = vadd.f32 %v1480_v11, %v1328_v9  ;;  %5867 = vtanh.f32 %v2455_v16  ;;  %v1342_v38 = vadd.f32 %v1341_v15, %v1123_v43 }
 0x1a3   :  { %v1482_v4 = vpop.f32.mrf.mxu1  ;;  %v1343_v26 = vpop.f32.mrf.mxu0  ;;  %v1462_v29 = vadd.f32 %v7442_v62, %v1309_v10  ;;  %v2457_v55 = vmul.f32 0.5, %v1474_v3  ;;  %v2454_v24 = vmul.f32 0.5, %v1467_v61  ;;  %v2560_v25 = vsel %vm2558_vm1, %v2544_v37, 0 }
 0x1a4   :  { %v1483_v52 = vadd.f32 %v1482_v4, %v1330_v39  ;;  %5869 = vtanh.f32 %v2458_v34  ;;  %v2460_v33 = vmul.f32 0.5, %v1481_v19  ;;  %v1344_v44 = vadd.f32 %v1343_v26, %v1125_v56 }
 0x1a5   :  { %v1487_v50 = vpop.f32.mrf.mxu1  ;;  %v1348_v49 = vpop.f32.mrf.mxu0  ;;  %v2452_v15 = vmul.f32 0.5, %v1462_v29  ;;  %v7501_v53 = vand.u32 4294901760, %v2560_v25  ;;  %v2563_v46 = vsel %vm2558_vm1, %v2545_v8, 0 }
 0x1a6   :  { %v2461_v13 = vmul.f32 0.5, %v1483_v52  ;;  %v1488_v21 = vadd.f32 %v1487_v50, %v1335_v57  ;;  %v1349_v58 = vadd.f32 %v1348_v49, %v1132_v54  ;;  %v7513_v56 = vand.u32 4294901760, %v2563_v46 }
 0x1a7   :  { %v1489_v31 = vpop.f32.mrf.mxu1  ;;  %v1350_v28 = vpop.f32.mrf.mxu0  ;;  %v7507_v39 = vsub.f32 %v2560_v25, %v7501_v53 }
 0x1a8   :  { %v2463_v1 = vmul.f32 0.5, %v1488_v21  ;;  %v1490_v6 = vadd.f32 %v1489_v31, %v1337_v0  ;;  %5871 = vtanh.f32 %v2461_v13  ;;  %v1351_v14 = vadd.f32 %v1350_v28, %v1134_v23 }
 0x1a9   :  { %v1494_v40 = vpop.f32.mrf.mxu1  ;;  %v7511_v26 = vand.u32 4294901760, %v7507_v39  ;;  %v7518_v18 = vsub.f32 %v2563_v46, %v7513_v56 }
 0x1aa   :  { %v2464_v17 = vmul.f32 0.5, %v1490_v6  ;;  %v1495_v63 = vadd.f32 %v1494_v40, %v1342_v38  ;;  %5873 = vtanh.f32 %v2463_v1 }
 0x1ab   :  { %v1496_v51 = vpop.f32.mrf.mxu1  ;;  %v2649_v54 = vsub.f32 %v7507_v39, %v7511_v26 }
 0x1ac   :  { %5875 = vtanh.f32 %v2464_v17  ;;  %v2466_v41 = vmul.f32 0.5, %v1495_v63  ;;  %v1497_v12 = vadd.f32 %v1496_v51, %v1344_v44  ;;  %v5862_v22 = vpop.eup %5861 }
 0x1ad   :  { %v1501_v7 = vpop.f32.mrf.mxu1  ;;  %5877 = vtanh.f32 %v2460_v33  ;;  %v5864_v27 = vpop.eup %5863  ;;  %v2496_v57 = vmul.f32 0.5, %v5862_v22 }
 0x1ae   :  { %5879 = vtanh.f32 %v2466_v41  ;;  %v2467_v60 = vmul.f32 0.5, %v1497_v12  ;;  %v1502_v35 = vadd.f32 %v1501_v7, %v1349_v58  ;;  %v5866_v30 = vpop.eup %5865  ;;  %v2497_v40 = vmul.f32 0.5, %v5864_v27 }
 0x1af   :  { %v1503_v48 = vpop.f32.mrf.mxu1  ;;  %5881 = vtanh.f32 %v2457_v55  ;;  %v5868_v36 = vpop.eup %5867  ;;  %v7520_v3 = vadd.f32 0.5, %v2496_v57  ;;  %v2499_v33 = vmul.f32 0.5, %v5866_v30 }
 0x1b0   :  { %5883 = vtanh.f32 %v2467_v60  ;;  %v2469_v62 = vmul.f32 0.5, %v1502_v35  ;;  %v1504_v11 = vadd.f32 %v1503_v48, %v1351_v14  ;;  %v2503_v59 = vmul.f32 0.5, %v5868_v36 }
 0x1b1   :  { %5885 = vtanh.f32 %v2454_v24  ;;  %v5870_v4 = vpop.eup %5869 }
 0x1b2   :  { %5887 = vtanh.f32 %v2469_v62  ;;  %v2470_v45 = vmul.f32 0.5, %v1504_v11  ;;  %v2506_v21 = vmul.f32 0.5, %v5870_v4  ;;  %v2527_v7 = vadd.f32 0.5, %v2503_v59 }
 0x1b3   :  { %5889 = vtanh.f32 %v2452_v15  ;;  %v2523_v15 = vadd.f32 0.5, %v2499_v33 }
 0x1b4   :  { %5891 = vtanh.f32 %v2470_v45  ;;  %v2530_v2 = vadd.f32 0.5, %v2506_v21  ;;  %v7552_v4 = vand.u32 4294901760, %v2527_v7 }
 0x1b5   :  { %v5872_v43 = vpop.eup %5871 }
 0x1b6   :  { %v2509_v19 = vmul.f32 0.5, %v5872_v43  ;;  %v7542_v45 = vand.u32 4294901760, %v2530_v2 }
 0x1b7   :  { %v5874_v32 = vpop.eup %5873 }
 0x1b8   :  { %v2511_v20 = vmul.f32 0.5, %v5874_v32  ;;  %v2533_v44 = vadd.f32 0.5, %v2509_v19 }
 0x1b9   :  { %v5876_v9 = vpop.eup %5875 }
 0x1ba   :  { %v5878_v16 = vpop.eup %5877  ;;  %v2512_v52 = vmul.f32 0.5, %v5876_v9  ;;  %v2535_v10 = vadd.f32 0.5, %v2511_v20  ;;  %v7530_v14 = vand.u32 4294901760, %v2533_v44 }
 0x1bb   :  { %v5880_v50 = vpop.eup %5879  ;;  %v2508_v31 = vmul.f32 0.5, %v5878_v16 }
 0x1bc   :  { %v5882_v34 = vpop.eup %5881  ;;  %v2514_v0 = vmul.f32 0.5, %v5880_v50  ;;  %v2536_v49 = vadd.f32 0.5, %v2512_v52  ;;  %v7528_v25 = vand.u32 4294901760, %v2535_v10  ;;  %v7560_v32 = vsub.f32 %v2533_v44, %v7530_v14 }
 0x1bd   :  { %v5884_v13 = vpop.eup %5883  ;;  %v2505_v47 = vmul.f32 0.5, %v5882_v34  ;;  %v2532_v23 = vadd.f32 0.5, %v2508_v31  ;;  %v2521_v52 = vadd.f32 0.5, %v2497_v40  ;;  %v7568_v50 = vand.u32 4294901760, %v2523_v15 }
 0x1be   :  { %v5886_v5 = vpop.eup %5885  ;;  %v2538_v38 = vadd.f32 0.5, %v2514_v0  ;;  %v2515_v1 = vmul.f32 0.5, %v5884_v13  ;;  %v7524_v55 = vand.u32 4294901760, %v2536_v49  ;;  %v7557_v43 = vsub.f32 %v2535_v10, %v7528_v25 }
 0x1bf   :  { %v5888_v6 = vpop.eup %5887  ;;  %v2502_v37 = vmul.f32 0.5, %v5886_v5  ;;  %v2529_v24 = vadd.f32 0.5, %v2505_v47  ;;  %v7537_v11 = vand.u32 4294901760, %v2532_v23  ;;  %v7578_v0 = vsub.f32 %v2530_v2, %v7542_v45 }
 0x1c0   :  { %v5890_v61 = vpop.eup %5889  ;;  %v2539_v17 = vadd.f32 0.5, %v2515_v1  ;;  %v2517_v63 = vmul.f32 0.5, %v5888_v6  ;;  %v7522_v29 = vand.u32 4294901760, %v2538_v38  ;;  %v7545_v27 = vsub.f32 %v2536_v49, %v7524_v55 }
 0x1c1   :  { %v5892_v51 = vpop.eup %5891  ;;  %v2500_v12 = vmul.f32 0.5, %v5890_v61  ;;  %v2526_v62 = vadd.f32 0.5, %v2502_v37  ;;  %v7554_v46 = vand.u32 4294901760, %v2529_v24  ;;  %v7571_v20 = vsub.f32 %v2532_v23, %v7537_v11 }
 0x1c2   :  { %v7526_v28 = vand.u32 4294901760, %v2539_v17  ;;  %v2541_v58 = vadd.f32 0.5, %v2517_v63  ;;  %v2518_v41 = vmul.f32 0.5, %v5892_v51  ;;  %v7540_v22 = vsub.f32 %v2538_v38, %v7522_v29 }
 0x1c3   :  { %v2524_v36 = vadd.f32 0.5, %v2500_v12  ;;  %v7575_v19 = vand.u32 4294901760, %v2526_v62  ;;  %v2710_v21 = vand.u32 4294901760, %v7545_v27  ;;  %v7586_v5 = vsub.f32 %v2529_v24, %v7554_v46 }
 0x1c4   :  { %v7533_v60 = vsub.f32 %v2539_v17, %v7526_v28  ;;  %v7535_v35 = vand.u32 4294901760, %v2541_v58  ;;  %v2542_v48 = vadd.f32 0.5, %v2518_v41  ;;  %v2704_v34 = vand.u32 4294901760, %v7540_v22 }
 0x1c5   :  { %v7583_v31 = vand.u32 4294901760, %v2524_v36  ;;  %v2716_v38 = vand.u32 4294901760, %v7557_v43  ;;  %v7594_v1 = vsub.f32 %v2527_v7, %v7552_v4  ;;  %v2722_v59 = vand.u32 4294901760, %v7560_v32 }
 0x1c6   :  { %v7548_v8 = vsub.f32 %v2541_v58, %v7535_v35  ;;  %v7550_v30 = vand.u32 4294901760, %v2542_v48  ;;  %v2698_v57 = vand.u32 4294901760, %v7533_v60  ;;  %v7605_v47 = vand.u32 4294901760, %v7520_v3 }
 0x1c7   :  { %v7607_v10 = vand.u32 4294901760, %v2521_v52  ;;  %v2705_v61 = vsub.f32 %v7540_v22, %v2704_v34  ;;  %v2728_v33 = vand.u32 4294901760, %v7571_v20  ;;  %v7615_v44 = vsub.f32 %v2526_v62, %v7575_v19 }
 0x1c8   :  { %v7563_v9 = vsub.f32 %v2542_v48, %v7550_v30  ;;  %2582 = vmatprep.subr.mxu0 %v7550_v30  ;;  %v2692_v16 = vand.u32 4294901760, %v7548_v8  ;;  %v2699_v40 = vsub.f32 %v7533_v60, %v2698_v57  ;;  %v2711_v63 = vsub.f32 %v7545_v27, %v2710_v21 }
 0x1c9   :  { %2584 = vmatpush1.msra.mxu0 %v7535_v35  ;;  %v8206_v51 = vand.u32 4294901760, %v7578_v0  ;;  %v7623_v37 = vsub.f32 %v2524_v36, %v7583_v31  ;;  %v2717_v23 = vsub.f32 %v7557_v43, %v2716_v38  ;;  %v8204_v58 = vand.u32 4294901760, %v7586_v5 }
 0x1ca   :  { %2586 = vmatprep.subr.mxu0 %v7526_v28  ;;  %v2686_v13 = vand.u32 4294901760, %v7563_v9  ;;  %v2693_v49 = vsub.f32 %v7548_v8, %v2692_v16  ;;  %v7631_v41 = vsub.f32 %v2523_v15, %v7568_v50  ;;  %v2700_v12 = vand.u32 4294901760, %v2699_v40 }
 0x1cb   :  { %2588 = vmatpush1.msra.mxu0 %v7522_v29  ;;  %v2723_v7 = vsub.f32 %v7560_v32, %v2722_v59  ;;  %v8205_v24 = vand.u32 4294901760, %v7594_v1  ;;  %v7639_v48 = vsub.f32 %v2521_v52, %v7607_v10  ;;  %v2706_v62 = vand.u32 4294901760, %v2705_v61 }
 0x1cc   :  { %2590 = vmatprep.subr.mxu0 %v7524_v55  ;;  %v2687_v6 = vsub.f32 %v7563_v9, %v2686_v13  ;;  %v2694_v2 = vand.u32 4294901760, %v2693_v49  ;;  %v2729_v15 = vsub.f32 %v7571_v20, %v2728_v33  ;;  %v7646_v36 = vand.u32 4294901760, %v7518_v18 }
 0x1cd   :  { %2592 = vmatpush1.msra.mxu0 %v7528_v25  ;;  %v7650_v49 = vsub.f32 %v7520_v3, %v7605_v47  ;;  %v2712_v52 = vand.u32 4294901760, %v2711_v63  ;;  %v2752_v40 = vand.u32 4294901760, %v7615_v44  ;;  %v2718_v61 = vand.u32 4294901760, %v2717_v23 }
 0x1ce   :  { %2594 = vmatprep.subr.mxu0 %v7530_v14  ;;  %v2688_v17 = vand.u32 4294901760, %v2687_v6  ;;  %v2735_v6 = vsub.f32 %v7578_v0, %v8206_v51  ;;  %v2758_v3 = vand.u32 4294901760, %v7623_v37  ;;  %v2724_v63 = vand.u32 4294901760, %v2723_v7 }
 0x1cf   :  { %2596 = vmatpush1.msra.mxu0 %v7537_v11  ;;  %v2764_v23 = vand.u32 4294901760, %v7631_v41  ;;  %v2770_v7 = vand.u32 4294901760, %v7639_v48 }
 0x1d0   :  { %2598 = vmatprep.subr.mxu0 %v7542_v45  ;;  %2689 = vmatprep.subr.mxu1 %v2688_v17  ;;  %v2741_v17 = vsub.f32 %v7586_v5, %v8204_v58  ;;  %v2660_v58 = vsub.f32 %v7518_v18, %v7646_v36 }
 0x1d1   :  { %2600 = vmatpush1.msra.mxu0 %v7554_v46  ;;  %2695 = vmatpush1.msra.mxu1 %v2694_v2  ;;  %v7666_v2 = vand.u32 4294901760, %v2649_v54  ;;  %v2736_v54 = vand.u32 4294901760, %v2735_v6  ;;  %v2765_v6 = vsub.f32 %v7631_v41, %v2764_v23 }
 0x1d2   :  { %2602 = vmatprep.subr.mxu0 %v7552_v4  ;;  %2701 = vmatprep.subr.mxu1 %v2700_v12  ;;  %v2747_v12 = vsub.f32 %v7594_v1, %v8205_v24  ;;  %v2776_v24 = vand.u32 4294901760, %v7650_v49 }
 0x1d3   :  { %2604 = vmatpush1.msra.mxu0 %v7575_v19  ;;  %2707 = vmatpush1.msra.mxu1 %v2706_v62  ;;  %v2730_v62 = vand.u32 4294901760, %v2729_v15  ;;  %v2759_v15 = vsub.f32 %v7623_v37, %v2758_v3 }
 0x1d4   :  { %2606 = vmatprep.subr.mxu0 %v7583_v31  ;;  %2713 = vmatprep.subr.mxu1 %v2712_v52  ;;  %v2753_v52 = vsub.f32 %v7615_v44, %v2752_v40  ;;  %v2748_v51 = vand.u32 4294901760, %v2747_v12  ;;  %v2777_v12 = vsub.f32 %v7650_v49, %v2776_v24 }
 0x1d5   :  { %2608 = vmatpush1.msra.mxu0 %v7568_v50  ;;  %2719 = vmatpush1.msra.mxu1 %v2718_v61  ;;  %v2742_v61 = vand.u32 4294901760, %v2741_v17  ;;  %v2771_v17 = vsub.f32 %v7639_v48, %v2770_v7 }
 0x1d6   :  { %2610 = vmatprep.subr.mxu0 %v7607_v10  ;;  %2725 = vmatprep.subr.mxu1 %v2724_v63  ;;  %v7690_v63 = vand.u32 4294901760, %v2660_v58  ;;  %v2766_v58 = vand.u32 4294901760, %v2765_v6 }
 0x1d7   :  { %2612 = vmatpush1.msra.mxu0 %v7605_v47  ;;  %2731 = vmatpush1.msra.mxu1 %v2730_v62  ;;  %v2754_v62 = vand.u32 4294901760, %v2753_v52 }
 0x1d8   :  { %2651 = vmatmul.mubr.f32.vlgmr.msra.gmra.mxu0 %v7666_v2  ;;  %2737 = vmatprep.subr.mxu1 %v2736_v54  ;;  %v2760_v54 = vand.u32 4294901760, %v2759_v15 }
 0x1d9   :  { %2845 = vmatprep.subr.mxu0 %v7563_v9  ;;  %2743 = vmatpush1.msra.mxu1 %v2742_v61  ;;  %v2772_v61 = vand.u32 4294901760, %v2771_v17 }
 0x1da   :  { %2848 = vmatpush1.msra.mxu0 %v7548_v8  ;;  %2749 = vmatprep.subr.mxu1 %v2748_v51  ;;  %v2778_v51 = vand.u32 4294901760, %v2777_v12  ;;  %v8440_v12 = vld [vmem:[#allocation16_spill] sm:$0xff] }
 0x1db   :  { %2851 = vmatprep.subr.mxu0 %v7533_v60  ;;  %2656 = vmatprep.mubr.f32.mxu0 %v8427_v42  ;;  %v8432_v60 = vand.u32 4294901760, %v7578_v0 }
 0x1dc   :  { %2755 = vmatpush1.msra.mxu1 %v2754_v62  ;;  %2854 = vmatpush1.msra.mxu0 %v7540_v22  ;;  %v8433_v22 = vand.u32 4294901760, %v7586_v5 }
 0x1dd   :  { %2662 = vmatmul.mubr.f32.gmra.mxu0 %v7690_v63  ;;  %2761 = vmatprep.subr.mxu1 %v2760_v54 }
 0x1de   :  { %2857 = vmatprep.subr.mxu0 %v7545_v27  ;;  %2767 = vmatpush1.msra.mxu1 %v2766_v58  ;;  %v8434_v27 = vand.u32 4294901760, %v7594_v1 }
 0x1df   :  { %2860 = vmatpush1.msra.mxu0 %v7557_v43  ;;  %2773 = vmatprep.subr.mxu1 %v2772_v61 }
 0x1e0   :  { %2863 = vmatprep.subr.mxu0 %v7560_v32  ;;  %2779 = vmatpush1.msra.mxu1 %v2778_v51 }
 0x1e1   :  { %2866 = vmatpush1.msra.mxu0 %v7571_v20  ;;  %2814 = vmatmul.mubr.f32.vlgmr.msra.gmra.mxu1 %v7501_v53 }
 0x1e2   :  { %2869 = vmatprep.subr.mxu0 %v7578_v0  ;;  %2957 = vmatprep.subr.mxu1 %v7550_v30 }
 0x1e3   :  { %2872 = vmatpush1.msra.mxu0 %v7586_v5  ;;  %2959 = vmatpush1.msra.mxu1 %v7535_v35 }
 0x1e4   :  { %2875 = vmatprep.subr.mxu0 %v7594_v1  ;;  %2961 = vmatprep.subr.mxu1 %v7526_v28 }
 0x1e5   :  { %2819 = vmatprep.mubr.f32.mxu1 %v8427_v42  ;;  %2878 = vmatpush1.msra.mxu0 %v7615_v44 }
 0x1e6   :  { %2963 = vmatpush1.msra.mxu1 %v7522_v29  ;;  %2881 = vmatprep.subr.mxu0 %v7623_v37  ;;  %v8436_v37 = vld [vmem:[#allocation11_spill] sm:$0xff] }
 0x1e7   :  { %2821 = vmatmul.mubr.f32.gmra.mxu1 %v7513_v56  ;;  %2965 = vmatprep.subr.mxu1 %v7524_v55 }
 0x1e8   :  { %2884 = vmatpush1.msra.mxu0 %v7631_v41  ;;  %2967 = vmatpush1.msra.mxu1 %v7528_v25 }
 0x1e9   :  { %2887 = vmatprep.subr.mxu0 %v7639_v48  ;;  %2969 = vmatprep.subr.mxu1 %v7530_v14 }
 0x1ea   :  { %2890 = vmatpush1.msra.mxu0 %v7650_v49  ;;  %2923 = vmatprep.mubr.f32.mxu0 %v8427_v42  ;;  %v8437_v49 = vld [vmem:[#allocation9_spill] sm:$0xff] }
 0x1eb   :  { %2971 = vmatpush1.msra.mxu1 %v7537_v11  ;;  %2926 = vmatmul.mubr.f32.vlgmr.msra.gmra.mxu0 %v7507_v39 }
 0x1ec   :  { %2973 = vmatprep.subr.mxu1 %v7542_v45  ;;  %3058 = vmatprep.subr.mxu0 %v2686_v13 }
 0x1ed   :  { %2975 = vmatpush1.msra.mxu1 %v7554_v46  ;;  %3062 = vmatpush1.msra.mxu0 %v2692_v16 }
 0x1ee   :  { %2977 = vmatprep.subr.mxu1 %v7552_v4  ;;  %3066 = vmatprep.subr.mxu0 %v2698_v57 }
 0x1ef   :  { %2931 = vmatprep.mubr.f32.mxu0 %v8427_v42  ;;  %2979 = vmatpush1.msra.mxu1 %v7575_v19 }
 0x1f0   :  { %3070 = vmatpush1.msra.mxu0 %v2704_v34  ;;  %2981 = vmatprep.subr.mxu1 %v7583_v31 }
 0x1f1   :  { %2934 = vmatmul.mubr.f32.gmra.mxu0 %v7518_v18  ;;  %3074 = vmatprep.subr.mxu0 %v2710_v21 }
 0x1f2   :  { %2983 = vmatpush1.msra.mxu1 %v7568_v50  ;;  %3078 = vmatpush1.msra.mxu0 %v2716_v38 }
 0x1f3   :  { %2985 = vmatprep.subr.mxu1 %v7607_v10  ;;  %3082 = vmatprep.subr.mxu0 %v2722_v59 }
 0x1f4   :  { %2987 = vmatpush1.msra.mxu1 %v7605_v47  ;;  %3020 = vmatprep.mubr.f32.mxu1 %v8427_v42 }
 0x1f5   :  { %3086 = vmatpush1.msra.mxu0 %v2728_v33  ;;  %3024 = vmatmul.mubr.f32.vlgmr.msra.gmra.mxu1 %v7511_v26  ;;  %v8435_v33 = vld [vmem:[#allocation19_spill] sm:$0xff] }
 0x1f6   :  { %3090 = vmatprep.subr.mxu0 %v8432_v60  ;;  %3183 = vmatprep.subr.mxu1 %v7550_v30  ;;  %v8441_v60 = vld [vmem:[#allocation7_spill] sm:$0xff] }
 0x1f7   :  { %3094 = vmatpush1.msra.mxu0 %v8433_v22  ;;  %3185 = vmatpush1.msra.mxu1 %v7535_v35 }
 0x1f8   :  { %3098 = vmatprep.subr.mxu0 %v8434_v27  ;;  %3187 = vmatprep.subr.mxu1 %v7526_v28 }
 0x1f9   :  { %3029 = vmatprep.mubr.f32.mxu1 %v8427_v42  ;;  %3102 = vmatpush1.msra.mxu0 %v2752_v40 }
 0x1fa   :  { %3189 = vmatpush1.msra.mxu1 %v7522_v29  ;;  %3106 = vmatprep.subr.mxu0 %v2758_v3  ;;  %v5468_v29 = vpop.f32.mrf.mxu0  ;;  %v8438_v3 = vld [vmem:[#allocation21_spill] sm:$0xff] }
 0x1fb   :  { %3033 = vmatmul.mubr.f32.gmra.mxu1 %v7646_v36  ;;  %3191 = vmatprep.subr.mxu1 %v7524_v55  ;;  %v1604_v41 = vadd.f32 %v5468_v29, %v8436_v37  ;;  %v8442_v37 = vld [vmem:[#allocation18_spill] sm:$0xff] }
 0x1fc   :  { %3110 = vmatpush1.msra.mxu0 %v2764_v23  ;;  %3193 = vmatpush1.msra.mxu1 %v7528_v25  ;;  %v1593_v55 = vpop.f32.mrf.mxu0  ;;  %v5512_v25 = vpop.f32.mrf.mxu1 }
 0x1fd   :  { %3114 = vmatprep.subr.mxu0 %v2770_v7  ;;  %3195 = vmatprep.subr.mxu1 %v7530_v14  ;;  %v8439_v7 = vld [vmem:[#allocation40_spill] sm:$0xff]  ;;  %v1821_v6 = vadd.f32 %v5512_v25, %v1604_v41 }
 0x1fe   :  { %3118 = vmatpush1.msra.mxu0 %v2776_v24  ;;  %3151 = vmatprep.mubr.f32.mxu0 %v8427_v42  ;;  %v5471_v28 = vpop.f32.mrf.mxu0  ;;  %v1814_v35 = vpop.f32.mrf.mxu1 }
 0x1ff   :  { %3197 = vmatpush1.msra.mxu1 %v7537_v11  ;;  %3153 = vmatmul.mubr.f32.vlgmr.msra.gmra.mxu0 %v7501_v53  ;;  %v1624_v44 = vadd.f32 %v5471_v28, %v8435_v33 }
 0x200   :  { %3199 = vmatprep.subr.mxu1 %v7542_v45  ;;  %3158 = vmatprep.mubr.f32.mxu0 %v8427_v42  ;;  %v1613_v14 = vpop.f32.mrf.mxu0  ;;  %v5515_v45 = vpop.f32.mrf.mxu1 }
 0x201   :  { %3201 = vmatpush1.msra.mxu1 %v7554_v46  ;;  %3246 = vmatprep.mubr.f32.mxu1 %v8427_v42  ;;  %v1614_v40 = vadd.f32 %v1613_v14, %v8437_v49  ;;  %v1833_v15 = vadd.f32 %v5515_v45, %v1624_v44 }
 0x202   :  { %3203 = vmatprep.subr.mxu1 %v7552_v4  ;;  %v5474_v11 = vpop.f32.mrf.mxu0  ;;  %v1826_v30 = vpop.f32.mrf.mxu1 }
 0x203   :  { %3205 = vmatpush1.msra.mxu1 %v7575_v19  ;;  %3160 = vmatmul.mubr.f32.gmra.mxu0 %v7513_v56  ;;  %v1644_v52 = vadd.f32 %v5474_v11, %v8439_v7  ;;  %v1827_v58 = vadd.f32 %v1826_v30, %v1614_v40 }
 0x204   :  { %3207 = vmatprep.subr.mxu1 %v7583_v31  ;;  %5714 = vmatprep.mubr.f32.mxu0 %v7666_v2  ;;  %v1633_v8 = vpop.f32.mrf.mxu0  ;;  %v5518_v46 = vpop.f32.mrf.mxu1  ;;  %v1594_v2 = vadd.f32 %v1593_v55, %v8438_v3 }
 0x205   :  { %3209 = vmatpush1.msra.mxu1 %v7568_v50  ;;  %v1634_v54 = vadd.f32 %v1633_v8, %v8440_v12  ;;  %v1845_v14 = vadd.f32 %v5518_v46, %v1644_v52 }
 0x206   :  { %3211 = vmatprep.subr.mxu1 %v7607_v10  ;;  %v5477_v4 = vpop.f32.mrf.mxu0  ;;  %v1838_v32 = vpop.f32.mrf.mxu1  ;;  %v1815_v51 = vadd.f32 %v1814_v35, %v1594_v2 }
 0x207   :  { %3213 = vmatpush1.msra.mxu1 %v7605_v47  ;;  %v1664_v22 = vadd.f32 %v5477_v4, %v8441_v60  ;;  %v1839_v41 = vadd.f32 %v1838_v32, %v1634_v54 }
 0x208   :  { %3248 = vmatmul.mubr.f32.vlgmr.msra.gmra.mxu1 %v7501_v53  ;;  %v1653_v43 = vpop.f32.mrf.mxu0  ;;  %v5521_v16 = vpop.f32.mrf.mxu1 }
 0x209   :  { %3253 = vmatprep.mubr.f32.mxu1 %v8427_v42  ;;  %v1654_v49 = vadd.f32 %v1653_v43, %v8442_v37 }
 0x20a   :  { %v5556_v9 = vpop.f32.mrf.mxu0  ;;  %v1850_v50 = vpop.f32.mrf.mxu1 }
 0x20b   :  { %v1968_v27 = vadd.f32 %v5556_v9, %v1821_v6 }
 0x20c   :  { %3255 = vmatmul.mubr.f32.gmra.mxu1 %v7513_v56  ;;  %v1960_v57 = vpop.f32.mrf.mxu0 }
 0x20d   :  { %5733 = vmatprep.mubr.f32.mxu1 %v7501_v53  ;;  %v1961_v11 = vadd.f32 %v1960_v57, %v1815_v51 }
 0x20e   :  { %v5559_v20 = vpop.f32.mrf.mxu0 }
 0x20f   :  { %v1982_v61 = vadd.f32 %v5559_v20, %v1833_v15  ;;  %v1857_v20 = vadd.f32 %v5521_v16, %v1664_v22 }
 0x210   :  { %v1974_v19 = vpop.f32.mrf.mxu0 }
 0x211   :  { %v5600_v34 = vpop.f32.mrf.mxu1  ;;  %v1975_v33 = vadd.f32 %v1974_v19, %v1827_v58  ;;  %v1851_v19 = vadd.f32 %v1850_v50, %v1654_v49 }
 0x212   :  { %v5562_v13 = vpop.f32.mrf.mxu0  ;;  %v2107_v45 = vadd.f32 %v5600_v34, %v1968_v27 }
 0x213   :  { %v2098_v0 = vpop.f32.mrf.mxu1  ;;  %v1996_v3 = vadd.f32 %v5562_v13, %v1845_v14 }
 0x214   :  { %v1988_v31 = vpop.f32.mrf.mxu0  ;;  %v2099_v35 = vadd.f32 %v2098_v0, %v1961_v11 }
 0x215   :  { %v5603_v21 = vpop.f32.mrf.mxu1  ;;  %v1989_v9 = vadd.f32 %v1988_v31, %v1839_v41 }
 0x216   :  { %v5565_v38 = vpop.f32.mrf.mxu0  ;;  %v2123_v55 = vadd.f32 %v5603_v21, %v1982_v61 }
 0x217   :  { %v2114_v5 = vpop.f32.mrf.mxu1  ;;  %v2010_v21 = vadd.f32 %v5565_v38, %v1857_v20 }
 0x218   :  { %v2002_v59 = vpop.f32.mrf.mxu0  ;;  %v2115_v8 = vadd.f32 %v2114_v5, %v1975_v33 }
 0x219   :  { %v5606_v1 = vpop.f32.mrf.mxu1  ;;  %v2003_v5 = vadd.f32 %v2002_v59, %v1851_v19 }
 0x21a   :  { %v2139_v2 = vadd.f32 %v5606_v1, %v1996_v3 }
 0x21b   :  { %v2130_v47 = vpop.f32.mrf.mxu1 }
 0x21c   :  { %v2131_v15 = vadd.f32 %v2130_v47, %v1989_v9 }
 0x21d   :  { %v5609_v24 = vpop.f32.mrf.mxu1 }
 0x21e   :  { %v2155_v0 = vadd.f32 %v5609_v24, %v2010_v21 }
 0x21f   :  { %v2146_v17 = vpop.f32.mrf.mxu1 }
 0x220   :  { %v2147_v1 = vadd.f32 %v2146_v17, %v2003_v5 }
 0x249   :  { %v5644_v10 = vpop.f32.mrf.mxu0 }
 0x24a   :  { %v2280_v40 = vadd.f32 %v5644_v10, %v2107_v45 }
 0x24b   :  { %v2273_v48 = vpop.f32.mrf.mxu0 }
 0x24c   :  { %v2274_v52 = vadd.f32 %v2273_v48, %v2099_v35 }
 0x24d   :  { %v5647_v23 = vpop.f32.mrf.mxu0 }
 0x24e   :  { %v2292_v30 = vadd.f32 %v5647_v23, %v2123_v55 }
 0x24f   :  { %v2285_v62 = vpop.f32.mrf.mxu0 }
 0x250   :  { %v2286_v7 = vadd.f32 %v2285_v62, %v2115_v8 }
 0x251   :  { %v5650_v29 = vpop.f32.mrf.mxu0  ;;  %v5688_v28 = vpop.f32.mrf.mxu1 }
 0x252   :  { %v2409_v43 = vadd.f32 %v5688_v28, %v2280_v40  ;;  %v2304_v6 = vadd.f32 %v5650_v29, %v2139_v2 }
 0x253   :  { %v2297_v25 = vpop.f32.mrf.mxu0  ;;  %v2402_v44 = vpop.f32.mrf.mxu1 }
 0x254   :  { %v2403_v23 = vadd.f32 %v2402_v44, %v2274_v52  ;;  %v2298_v10 = vadd.f32 %v2297_v25, %v2131_v15  ;;  %v2453_v62 = vmul.f32 0.5, %v2409_v43 }
 0x255   :  { %v5691_v4 = vpop.f32.mrf.mxu1  ;;  %v5653_v57 = vpop.f32.mrf.mxu0 }
 0x256   :  { %v2421_v46 = vadd.f32 %v5691_v4, %v2292_v30  ;;  %v2316_v38 = vadd.f32 %v5653_v57, %v2155_v0  ;;  %v2450_v61 = vmul.f32 0.5, %v2403_v23 }
 0x257   :  { %v2414_v34 = vpop.f32.mrf.mxu1  ;;  %v2309_v54 = vpop.f32.mrf.mxu0 }
 0x258   :  { %v2459_v32 = vmul.f32 0.5, %v2421_v46  ;;  %v2415_v13 = vadd.f32 %v2414_v34, %v2286_v7  ;;  %v2310_v51 = vadd.f32 %v2309_v54, %v2147_v1 }
 0x259   :  { %v5694_v16 = vpop.f32.mrf.mxu1 }
 0x25a   :  { %v2456_v12 = vmul.f32 0.5, %v2415_v13  ;;  %v2433_v31 = vadd.f32 %v5694_v16, %v2304_v6  ;;  %5893 = vtanh.f32 %v2459_v32 }
 0x25b   :  { %v2426_v50 = vpop.f32.mrf.mxu1 }
 0x25c   :  { %v2465_v48 = vmul.f32 0.5, %v2433_v31  ;;  %v2427_v58 = vadd.f32 %v2426_v50, %v2298_v10  ;;  %5895 = vtanh.f32 %v2456_v12 }
 0x25d   :  { %v5697_v47 = vpop.f32.mrf.mxu1 }
 0x25e   :  { %5897 = vtanh.f32 %v2465_v48  ;;  %v2462_v59 = vmul.f32 0.5, %v2427_v58  ;;  %v2445_v60 = vadd.f32 %v5697_v47, %v2316_v38 }
 0x25f   :  { %5899 = vtanh.f32 %v2453_v62  ;;  %v2438_v24 = vpop.f32.mrf.mxu1 }
 0x260   :  { %5901 = vtanh.f32 %v2462_v59  ;;  %v2471_v22 = vmul.f32 0.5, %v2445_v60  ;;  %v2439_v27 = vadd.f32 %v2438_v24, %v2310_v51 }
 0x261   :  { %5903 = vtanh.f32 %v2450_v61 }
 0x262   :  { %5905 = vtanh.f32 %v2471_v22  ;;  %v2468_v17 = vmul.f32 0.5, %v2439_v27 }
 0x264   :  { %5907 = vtanh.f32 %v2468_v17 }
 0x267   :  { %v5894_v29 = vpop.eup %5893 }
 0x268   :  { %v2507_v55 = vmul.f32 0.5, %v5894_v29 }
 0x269   :  { %v5896_v28 = vpop.eup %5895 }
 0x26a   :  { %v2504_v45 = vmul.f32 0.5, %v5896_v28  ;;  %v2531_v8 = vadd.f32 0.5, %v2507_v55 }
 0x26b   :  { %v5898_v14 = vpop.eup %5897 }
 0x26c   :  { %v5900_v33 = vpop.eup %5899  ;;  %v2513_v37 = vmul.f32 0.5, %v5898_v14  ;;  %v2528_v9 = vadd.f32 0.5, %v2504_v45  ;;  %v7812_v21 = vand.u32 4294901760, %v2531_v8 }
 0x26d   :  { %v5902_v49 = vpop.eup %5901  ;;  %v2501_v3 = vmul.f32 0.5, %v5900_v33 }
 0x26e   :  { %v5904_v11 = vpop.eup %5903  ;;  %v2537_v25 = vadd.f32 0.5, %v2513_v37  ;;  %v2510_v44 = vmul.f32 0.5, %v5902_v49  ;;  %v7819_v15 = vand.u32 4294901760, %v2528_v9  ;;  %v7832_v23 = vsub.f32 %v2531_v8, %v7812_v21 }
 0x26f   :  { %v5906_v41 = vpop.eup %5905  ;;  %v2498_v4 = vmul.f32 0.5, %v5904_v11  ;;  %v2525_v19 = vadd.f32 0.5, %v2501_v3 }
 0x270   :  { %v7808_v30 = vand.u32 4294901760, %v2537_v25  ;;  %v2534_v20 = vadd.f32 0.5, %v2510_v44  ;;  %v2519_v35 = vmul.f32 0.5, %v5906_v41  ;;  %v7845_v31 = vsub.f32 %v2528_v9, %v7819_v15  ;;  %v7971_v9 = vpop.permute.xlu0 %2555 }
 0x271   :  { %v5908_v40 = vpop.eup %5907  ;;  %v2522_v34 = vadd.f32 0.5, %v2498_v4  ;;  %v7828_v5 = vand.u32 4294901760, %v2525_v19  ;;  %v7863_v61 = vand.u32 4294901760, %v7832_v23 }
 0x272   :  { %v7810_v2 = vand.u32 4294901760, %v2534_v20  ;;  %v2543_v7 = vadd.f32 0.5, %v2519_v35  ;;  %v2516_v46 = vmul.f32 0.5, %v5908_v40  ;;  %v7815_v52 = vsub.f32 %v2537_v25, %v7808_v30 }
 0x273   :  { %v7841_v12 = vand.u32 4294901760, %v2522_v34  ;;  %v7855_v50 = vsub.f32 %v2525_v19, %v7828_v5  ;;  %v7873_v60 = vand.u32 4294901760, %v7845_v31  ;;  %v3402_v22 = vsub.f32 %v7832_v23, %v7863_v61 }
 0x274   :  { %v7817_v43 = vand.u32 4294901760, %v2543_v7  ;;  %v2540_v57 = vadd.f32 0.5, %v2516_v46  ;;  %v7822_v6 = vsub.f32 %v2534_v20, %v7810_v2  ;;  %v7839_v10 = vand.u32 4294901760, %v7815_v52  ;;  %v7968_v20 = vpop.permute.xlu1 %2550 }
 0x275   :  { %v7867_v47 = vsub.f32 %v2522_v34, %v7841_v12  ;;  %v7880_v27 = vand.u32 4294901760, %v7855_v50  ;;  %v3409_v29 = vsub.f32 %v7845_v31, %v7873_v60  ;;  %v3403_v14 = vand.u32 4294901760, %v3402_v22 }
 0x276   :  { %v3372_v32 = vsub.f32 %v2543_v7, %v7817_v43  ;;  %v7825_v13 = vand.u32 4294901760, %v2540_v57  ;;  %5698 = vmatprep.subr.mxu0 %v7817_v43  ;;  %v7852_v54 = vand.u32 4294901760, %v7822_v6  ;;  %v3388_v58 = vsub.f32 %v7815_v52, %v7839_v10 }
 0x277   :  { %5699 = vmatpush3.msra.mxu0 %v7817_v43  ;;  %v7887_v28 = vand.u32 4294901760, %v7867_v47  ;;  %v3416_v33 = vsub.f32 %v7855_v50, %v7880_v27  ;;  %v3410_v55 = vand.u32 4294901760, %v3409_v29 }
 0x278   :  { %v3379_v16 = vsub.f32 %v2540_v57, %v7825_v13  ;;  %5700 = vmatprep.subr.mxu0 %v7825_v13  ;;  %v7836_v0 = vand.u32 4294901760, %v3372_v32  ;;  %v3395_v59 = vsub.f32 %v7822_v6, %v7852_v54  ;;  %v3389_v24 = vand.u32 4294901760, %v3388_v58 }
 0x279   :  { %5701 = vmatpush3.msra.mxu0 %v7825_v13  ;;  %v3423_v37 = vsub.f32 %v7867_v47, %v7887_v28  ;;  %v3417_v49 = vand.u32 4294901760, %v3416_v33 }
 0x27a   :  { %5702 = vmatprep.subr.mxu0 %v7808_v30  ;;  %v3374_v1 = vsub.f32 %v3372_v32, %v7836_v0  ;;  %v7849_v62 = vand.u32 4294901760, %v3379_v16  ;;  %v3396_v17 = vand.u32 4294901760, %v3395_v59 }
 0x27b   :  { %5703 = vmatpush3.msra.mxu0 %v7808_v30  ;;  %v3424_v11 = vand.u32 4294901760, %v3423_v37 }
 0x27c   :  { %5704 = vmatprep.subr.mxu0 %v7810_v2  ;;  %v3375_v38 = vand.u32 4294901760, %v3374_v1  ;;  %v3381_v48 = vsub.f32 %v3379_v16, %v7849_v62 }
 0x27d   :  { %5705 = vmatpush3.msra.mxu0 %v7810_v2 }
 0x27e   :  { %5706 = vmatprep.subr.mxu0 %v7812_v21  ;;  %5717 = vmatprep.subr.mxu1 %v3375_v38  ;;  %v3382_v51 = vand.u32 4294901760, %v3381_v48 }
 0x27f   :  { %5707 = vmatpush3.msra.mxu0 %v7812_v21  ;;  %5718 = vmatpush3.msra.mxu1 %v3375_v38 }
 0x280   :  { %5708 = vmatprep.subr.mxu0 %v7819_v15  ;;  %5719 = vmatprep.subr.mxu1 %v3382_v51 }
 0x281   :  { %5709 = vmatpush3.msra.mxu0 %v7819_v15  ;;  %5720 = vmatpush3.msra.mxu1 %v3382_v51 }
 0x282   :  { %5710 = vmatprep.subr.mxu0 %v7828_v5  ;;  %5721 = vmatprep.subr.mxu1 %v3389_v24 }
 0x283   :  { %5711 = vmatpush3.msra.mxu0 %v7828_v5  ;;  %5722 = vmatpush3.msra.mxu1 %v3389_v24 }
 0x284   :  { %5712 = vmatprep.subr.mxu0 %v7841_v12  ;;  %5723 = vmatprep.subr.mxu1 %v3396_v17 }
 0x285   :  { %5713 = vmatpush3.msra.mxu0 %v7841_v12  ;;  %5724 = vmatpush3.msra.mxu1 %v3396_v17  ;;  %v3865_v17 = vld [vmem:[%s8041_s5] sm:$0xff]  ;;  %s5953_s5 = smov [#allocation3]  }
 0x286   :  { %5715 = vmatmul.mubr.f32.vlgmr.msra.gmra.mxu0 %v7690_v63  ;;  %5725 = vmatprep.subr.mxu1 %v3403_v14  ;;  %v3874_v29 = vsel %vm3872_vm2, %v3865_v17, 0  ;;  %s4916_s12 = sshll.u32 %s5953_s5, 4  ;;  %s4917_s12 = int_to_ptr.vmem [resolvable:$true] %s4916_s12 }
 0x287   :  { %5736 = vmatprep.subr.mxu0 %v3372_v32  ;;  %5726 = vmatpush3.msra.mxu1 %v3403_v14  ;;  %s5927_s13 = scalar_lea.vmem %s4917_s12, 48  ;;  %s5931_s14 = scalar_lea.vmem %s4917_s12, 64 }
 0x288   :  { %5737 = vmatpush3.msra.mxu0 %v3372_v32  ;;  %5727 = vmatprep.subr.mxu1 %v3410_v55  ;;  %p5928_p0 = scmp.ne.s32.totalorder %s4917_s12, %s5927_s13  ;;  %p5932_p1 = scmp.lt.s32.totalorder %s4917_s12, %s4917_s12 }
 0x289   :  { %5738 = vmatprep.subr.mxu0 %v3379_v16  ;;  %5728 = vmatpush3.msra.mxu1 %v3410_v55  ;;  %p5933_p2 = scmp.lt.s32.totalorder %s5931_s14, %s5927_s13 }
 0x28a   :  { %5739 = vmatpush3.msra.mxu0 %v3379_v16  ;;  %5729 = vmatprep.subr.mxu1 %v3417_v49 }
 0x28b   :  { %5740 = vmatprep.subr.mxu0 %v7815_v52  ;;  %5730 = vmatpush3.msra.mxu1 %v3417_v49  ;;  %p5934_p3 = por %p5933_p2, %p5932_p1 }
 0x28c   :  { %5741 = vmatpush3.msra.mxu0 %v7815_v52  ;;  %5731 = vmatprep.subr.mxu1 %v3424_v11 }
 0x28d   :  { %5742 = vmatprep.subr.mxu0 %v7822_v6  ;;  %5732 = vmatpush3.msra.mxu1 %v3424_v11  ;;  %p5935_p4 = pnand %p5934_p3, %p5928_p0 }
 0x28e   :  { %5743 = vmatpush3.msra.mxu0 %v7822_v6  ;;  %5734 = vmatmul.mubr.f32.vlgmr.msra.gmra.mxu1 %v7513_v56 }
 0x28f   :  { %5744 = vmatprep.subr.mxu0 %v7832_v23  ;;  %5755 = vmatprep.subr.mxu1 %v7817_v43 }
 0x290   :  { %5745 = vmatpush3.msra.mxu0 %v7832_v23  ;;  %5756 = vmatpush3.msra.mxu1 %v7817_v43 }
 0x291   :  { %5746 = vmatprep.subr.mxu0 %v7845_v31  ;;  %5757 = vmatprep.subr.mxu1 %v7825_v13 }
 0x292   :  { %5747 = vmatpush3.msra.mxu0 %v7845_v31  ;;  %5758 = vmatpush3.msra.mxu1 %v7825_v13 }
 0x293   :  { %5748 = vmatprep.subr.mxu0 %v7855_v50  ;;  %5759 = vmatprep.subr.mxu1 %v7808_v30 }
 0x294   :  { %5749 = vmatpush3.msra.mxu0 %v7855_v50  ;;  %5760 = vmatpush3.msra.mxu1 %v7808_v30 }
 0x295   :  { %5750 = vmatprep.subr.mxu0 %v7867_v47  ;;  %5761 = vmatprep.subr.mxu1 %v7810_v2 }
 0x296   :  { %5751 = vmatpush3.msra.mxu0 %v7867_v47  ;;  %5752 = vmatprep.mubr.f32.mxu0 %v7507_v39 }
 0x297   :  { %5762 = vmatpush3.msra.mxu1 %v7810_v2  ;;  %5753 = vmatmul.mubr.f32.vlgmr.msra.gmra.mxu0 %v7518_v18 }
 0x298   :  { %5763 = vmatprep.subr.mxu1 %v7812_v21  ;;  %5774 = vmatprep.subr.mxu0 %v7836_v0  ;;  %v2652_v39 = vpop.f32.mrf.mxu0 }
 0x299   :  { %5764 = vmatpush3.msra.mxu1 %v7812_v21  ;;  %5775 = vmatpush3.msra.mxu0 %v7836_v0  ;;  %v2653_v40 = vadd.f32 %v2652_v39, %v7968_v20 }
 0x29a   :  { %5765 = vmatprep.subr.mxu1 %v7819_v15  ;;  %5776 = vmatprep.subr.mxu0 %v7849_v62 }
 0x29b   :  { %5766 = vmatpush3.msra.mxu1 %v7819_v15  ;;  %5777 = vmatpush3.msra.mxu0 %v7849_v62 }
 0x29c   :  { %5767 = vmatprep.subr.mxu1 %v7828_v5  ;;  %5778 = vmatprep.subr.mxu0 %v7839_v10 }
 0x29d   :  { %5768 = vmatpush3.msra.mxu1 %v7828_v5  ;;  %5779 = vmatpush3.msra.mxu0 %v7839_v10 }
 0x29e   :  { %5769 = vmatprep.subr.mxu1 %v7841_v12  ;;  %5780 = vmatprep.subr.mxu0 %v7852_v54 }
 0x29f   :  { %5770 = vmatpush3.msra.mxu1 %v7841_v12  ;;  %5771 = vmatprep.mubr.f32.mxu1 %v7511_v26  ;;  %v2654_v26 = vpop.f32.mrf.mxu0 }
 0x2a0   :  { %5781 = vmatpush3.msra.mxu0 %v7852_v54  ;;  %5772 = vmatmul.mubr.f32.vlgmr.msra.gmra.mxu1 %v7646_v36 }
 0x2a1   :  { %5782 = vmatprep.subr.mxu0 %v7863_v61  ;;  %5793 = vmatprep.subr.mxu1 %v7817_v43  ;;  %v2663_v18 = vpop.f32.mrf.mxu0  ;;  %v2815_v36 = vpop.f32.mrf.mxu1 }
 0x2a2   :  { %5783 = vmatpush3.msra.mxu0 %v7863_v61  ;;  %5794 = vmatpush3.msra.mxu1 %v7817_v43  ;;  %v2816_v7 = vadd.f32 %v2815_v36, %v2653_v40  ;;  %v2664_v19 = vadd.f32 %v2663_v18, %v7971_v9 }
 0x2a3   :  { %5784 = vmatprep.subr.mxu0 %v7873_v60  ;;  %5795 = vmatprep.subr.mxu1 %v7825_v13  ;;  %v2665_v63 = vpop.f32.mrf.mxu0  ;;  %v2817_v45 = vpop.f32.mrf.mxu1 }
 0x2a4   :  { %5785 = vmatpush3.msra.mxu0 %v7873_v60  ;;  %5796 = vmatpush3.msra.mxu1 %v7825_v13  ;;  %v2666_v43 = vadd.f32 %v2665_v63, %v7971_v9 }
 0x2a5   :  { %5786 = vmatprep.subr.mxu0 %v7880_v27  ;;  %5797 = vmatprep.subr.mxu1 %v7808_v30 }
 0x2a6   :  { %5787 = vmatpush3.msra.mxu0 %v7880_v27  ;;  %5798 = vmatpush3.msra.mxu1 %v7808_v30 }
 0x2a7   :  { %5788 = vmatprep.subr.mxu0 %v7887_v28  ;;  %5799 = vmatprep.subr.mxu1 %v7810_v2  ;;  %v2822_v25 = vpop.f32.mrf.mxu1 }
 0x2a8   :  { %5789 = vmatpush3.msra.mxu0 %v7887_v28  ;;  %5790 = vmatprep.mubr.f32.mxu0 %v7501_v53  ;;  %v2823_v57 = vadd.f32 %v2822_v25, %v2664_v19  ;;  %v7979_v28 = vand.u32 4294901760, %v3874_v29 }
 0x2a9   :  { %5800 = vmatpush3.msra.mxu1 %v7810_v2  ;;  %5791 = vmatmul.mubr.f32.vlgmr.msra.gmra.mxu0 %v7513_v56  ;;  %v2824_v41 = vpop.f32.mrf.mxu1  ;;  %v2655_v2 = vadd.f32 %v2654_v26, %v7968_v20 }
 0x2aa   :  { %5801 = vmatprep.subr.mxu1 %v7812_v21  ;;  %5809 = vmatprep.mubr.f32.mxu1 %v7501_v53  ;;  %v2825_v13 = vadd.f32 %v2824_v41, %v2666_v43  ;;  %v7982_v55 = vsub.f32 %v3874_v29, %v7979_v28 }
 0x2ab   :  { %5802 = vmatpush3.msra.mxu1 %v7812_v21  ;;  %3944 = vmatprep.mubr.f32.mxu0 %v8427_v42  ;;  %v2927_v53 = vpop.f32.mrf.mxu0  ;;  %v2818_v21 = vadd.f32 %v2817_v45, %v2655_v2 }
 0x2ac   :  { %5803 = vmatprep.subr.mxu1 %v7819_v15  ;;  %v2928_v52 = vadd.f32 %v2927_v53, %v2816_v7  ;;  %v7985_v36 = vand.u32 4294901760, %v7982_v55 }
 0x2ad   :  { %5804 = vmatpush3.msra.mxu1 %v7819_v15  ;;  %v2929_v44 = vpop.f32.mrf.mxu0 }
 0x2ae   :  { %5805 = vmatprep.subr.mxu1 %v7828_v5  ;;  %v2930_v34 = vadd.f32 %v2929_v44, %v2818_v21 }
 0x2af   :  { %5806 = vmatpush3.msra.mxu1 %v7828_v5 }
 0x2b0   :  { %5807 = vmatprep.subr.mxu1 %v7841_v12 }
 0x2b1   :  { %5808 = vmatpush3.msra.mxu1 %v7841_v12  ;;  %v2935_v3 = vpop.f32.mrf.mxu0 }
 0x2b2   :  { %5810 = vmatmul.mubr.f32.vlgmr.msra.gmra.mxu1 %v7513_v56  ;;  %v2936_v5 = vadd.f32 %v2935_v3, %v2823_v57 }
 0x2b3   :  { %4040 = vmatprep.mubr.f32.mxu1 %v8427_v42  ;;  %v2937_v30 = vpop.f32.mrf.mxu0 }
 0x2b4   :  { %v2938_v10 = vadd.f32 %v2937_v30, %v2825_v13 }
 0x2b5   :  { %v3025_v8 = vpop.f32.mrf.mxu1 }
 0x2b6   :  { %v3026_v15 = vadd.f32 %v3025_v8, %v2928_v52  ;;  %v3948_v8 = vsub.f32 %v7982_v55, %v7985_v36 }
 0x2b7   :  { %v3027_v35 = vpop.f32.mrf.mxu1 }
 0x2b8   :  { %v3028_v23 = vadd.f32 %v3027_v35, %v2930_v34  ;;  %v7989_v2 = vand.u32 4294901760, %v3948_v8 }
 0x2bb   :  { %v3034_v56 = vpop.f32.mrf.mxu1 }
 0x2bc   :  { %v3035_v12 = vadd.f32 %v3034_v56, %v2936_v5 }
 0x2bd   :  { %v3036_v6 = vpop.f32.mrf.mxu1 }
 0x2be   :  { %v3037_v50 = vadd.f32 %v3036_v6, %v2938_v10 }
 0x2bf   :  { %v3154_v4 = vpop.f32.mrf.mxu0 }
 0x2c0   :  { %v3155_v16 = vadd.f32 %v3154_v4, %v3026_v15 }
 0x2c1   :  { %v3156_v46 = vpop.f32.mrf.mxu0 }
 0x2c2   :  { %v3157_v31 = vadd.f32 %v3156_v46, %v3028_v23 }
 0x2c3   :  { %v3161_v32 = vpop.f32.mrf.mxu0 }
 0x2c4   :  { %v3162_v38 = vadd.f32 %v3161_v32, %v3035_v12 }
 0x2c5   :  { %v3163_v62 = vpop.f32.mrf.mxu0 }
 0x2c6   :  { %v3164_v47 = vadd.f32 %v3163_v62, %v3037_v50 }
 0x2c8   :  { %v3249_v0 = vpop.f32.mrf.mxu1 }
 0x2c9   :  { %v3250_v1 = vadd.f32 %v3249_v0, %v3155_v16 }
 0x2ca   :  { %v3251_v54 = vpop.f32.mrf.mxu1 }
 0x2cb   :  { %v3841_v48 = vmul.f32 0.5, %v3250_v1  ;;  %v3252_v58 = vadd.f32 %v3251_v54, %v3157_v31 }
 0x2cc   :  { %v3256_v61 = vpop.f32.mrf.mxu1 }
 0x2cd   :  { %5909 = vtanh.f32 %v3841_v48  ;;  %v3842_v51 = vmul.f32 0.5, %v3252_v58  ;;  %v3257_v59 = vadd.f32 %v3256_v61, %v3162_v38 }
 0x2ce   :  { %v3258_v60 = vpop.f32.mrf.mxu1 }
 0x2cf   :  { %5911 = vtanh.f32 %v3842_v51  ;;  %v3844_v24 = vmul.f32 0.5, %v3257_v59  ;;  %v3259_v22 = vadd.f32 %v3258_v60, %v3164_v47 }
 0x2d1   :  { %5913 = vtanh.f32 %v3844_v24  ;;  %v3845_v27 = vmul.f32 0.5, %v3259_v22 }
 0x2d3   :  { %5915 = vtanh.f32 %v3845_v27 }
 0x2da   :  { %v5910_v14 = vpop.eup %5909 }
 0x2db   :  { %v3853_v33 = vmul.f32 0.5, %v5910_v14 }
 0x2dc   :  { %v5912_v37 = vpop.eup %5911 }
 0x2dd   :  { %v3859_v49 = vadd.f32 0.5, %v3853_v33  ;;  %v3854_v11 = vmul.f32 0.5, %v5912_v37 }
 0x2de   :  { %v5914_v39 = vpop.eup %5913 }
 0x2df   :  { %v3860_v26 = vadd.f32 0.5, %v3854_v11  ;;  %v3856_v18 = vmul.f32 0.5, %v5914_v39  ;;  %v3910_v45 = vand.u32 4294901760, %v3859_v49 }
 0x2e0   :  { %v5916_v63 = vpop.eup %5915 }
 0x2e1   :  { %v3862_v53 = vadd.f32 0.5, %v3856_v18  ;;  %v3857_v25 = vmul.f32 0.5, %v5916_v63  ;;  %v3908_v44 = vand.u32 4294901760, %v3860_v26  ;;  %v4003_v35 = vsub.f32 %v3859_v49, %v3910_v45 }
 0x2e3   :  { %v3863_v41 = vadd.f32 0.5, %v3857_v25  ;;  %v3906_v3 = vand.u32 4294901760, %v3862_v53  ;;  %v3997_v30 = vsub.f32 %v3860_v26, %v3908_v44  ;;  %v4004_v19 = vand.u32 4294901760, %v4003_v35 }
 0x2e5   :  { %v3904_v40 = vand.u32 4294901760, %v3863_v41  ;;  %v3991_v4 = vsub.f32 %v3862_v53, %v3906_v3  ;;  %v3998_v46 = vand.u32 4294901760, %v3997_v30  ;;  %v4005_v34 = vsub.f32 %v4003_v35, %v4004_v19 }
 0x2e7   :  { %3905 = vmatprep.subr.mxu0 %v3904_v40  ;;  %v3985_v7 = vsub.f32 %v3863_v41, %v3904_v40  ;;  %v3992_v56 = vand.u32 4294901760, %v3991_v4  ;;  %v3999_v57 = vsub.f32 %v3997_v30, %v3998_v46  ;;  %v4006_v13 = vand.u32 4294901760, %v4005_v34 }
 0x2e8   :  { %3907 = vmatpush1.msra.mxu0 %v3906_v3 }
 0x2e9   :  { %3909 = vmatprep.subr.mxu0 %v3908_v44  ;;  %v3986_v21 = vand.u32 4294901760, %v3985_v7  ;;  %v3993_v52 = vsub.f32 %v3991_v4, %v3992_v56  ;;  %v4000_v32 = vand.u32 4294901760, %v3999_v57 }
 0x2ea   :  { %3911 = vmatpush1.msra.mxu0 %v3910_v45 }
 0x2eb   :  { %3950 = vmatmul.mubr.f32.vlgmr.msra.gmra.mxu0 %v7989_v2  ;;  %4078 = vmatprep.subr.mxu0 %v3985_v7  ;;  %v3987_v43 = vsub.f32 %v3985_v7, %v3986_v21  ;;  %v3994_v6 = vand.u32 4294901760, %v3993_v52 }
 0x2ec   :  { %4081 = vmatpush1.msra.mxu0 %v3991_v4  ;;  %4120 = vmatprep.mubr.f32.mxu0 %v8427_v42 }
 0x2ed   :  { %4084 = vmatprep.subr.mxu0 %v3997_v30  ;;  %v3988_v15 = vand.u32 4294901760, %v3987_v43 }
 0x2ee   :  { %4087 = vmatpush1.msra.mxu0 %v4003_v35 }
 0x2ef   :  { %3989 = vmatprep.subr.mxu1 %v3988_v15  ;;  %4238 = vmatprep.subr.mxu0 %v3986_v21 }
 0x2f0   :  { %3995 = vmatpush1.msra.mxu1 %v3994_v6  ;;  %4123 = vmatmul.mubr.f32.vlgmr.msra.gmra.mxu0 %v7982_v55 }
 0x2f1   :  { %4242 = vmatpush1.msra.mxu0 %v3992_v56  ;;  %4001 = vmatprep.subr.mxu1 %v4000_v32 }
 0x2f2   :  { %4246 = vmatprep.subr.mxu0 %v3998_v46  ;;  %4007 = vmatpush1.msra.mxu1 %v4006_v13 }
 0x2f3   :  { %4250 = vmatpush1.msra.mxu0 %v4004_v19  ;;  %4042 = vmatmul.mubr.f32.vlgmr.msra.gmra.mxu1 %v7979_v28 }
 0x2f4   :  { %4158 = vmatprep.subr.mxu1 %v3904_v40  ;;  %4197 = vmatprep.mubr.f32.mxu1 %v8427_v42 }
 0x2f5   :  { %4160 = vmatpush1.msra.mxu1 %v3906_v3  ;;  %4283 = vmatprep.mubr.f32.mxu0 %v8427_v42 }
 0x2f6   :  { %4162 = vmatprep.subr.mxu1 %v3908_v44  ;;  %4285 = vmatmul.mubr.f32.vlgmr.msra.gmra.mxu0 %v7979_v28 }
 0x2f7   :  { %4164 = vmatpush1.msra.mxu1 %v3910_v45  ;;  %5812 = vmatprep.subr.mxu0 %v8427_v42 }
 0x2f8   :  { %4201 = vmatmul.mubr.f32.vlgmr.msra.gmra.mxu1 %v7985_v36  ;;  %4320 = vmatprep.subr.mxu1 %v3904_v40  ;;  %v3870_v40 = vpop.permute.xlu0 %3869 }
 0x2f9   :  { %4322 = vmatpush1.msra.mxu1 %v3906_v3  ;;  %4359 = vmatprep.mubr.f32.mxu1 %v8427_v42 }
 0x2fa   :  { %4324 = vmatprep.subr.mxu1 %v3908_v44  ;;  %5816 = vmatprep.mubr.msk.f32.mxu0 %vm5951_vm3, %v8427_v42 }
 0x2fb   :  { %4326 = vmatpush1.msra.mxu1 %v3910_v45 }
 0x2fc   :  { %4361 = vmatmul.mubr.f32.vlgmr.msra.gmra.mxu1 %v7979_v28  ;;  %5819 = vmatprep.subr.mxu1 %v8427_v42 }
 0x2fd   :  { %5823 = vmatprep.mubr.msk.f32.mxu1 %vm5951_vm3, %v8427_v42 }
 0x346   :  { %v5716_v5 = vpop.f32.mrf.mxu0 }
 0x347   :  { %v3351_v12 = vadd.f32 %v5716_v5, %v7971_v9 }
 0x348   :  { %v3340_v23 = vpop.f32.mrf.mxu0 }
 0x349   :  { %v3341_v62 = vadd.f32 %v3340_v23, %v7968_v20 }
 0x34e   :  { %v5735_v16 = vpop.f32.mrf.mxu1 }
 0x34f   :  { %v3468_v54 = vadd.f32 %v5735_v16, %v3351_v12 }
 0x350   :  { %v3461_v10 = vpop.f32.mrf.mxu1 }
 0x351   :  { %v3462_v38 = vadd.f32 %v3461_v10, %v3341_v62 }
 0x357   :  { %v5754_v0 = vpop.f32.mrf.mxu0 }
 0x358   :  { %v3563_v48 = vadd.f32 %v5754_v0, %v3468_v54 }
 0x359   :  { %v3555_v31 = vpop.f32.mrf.mxu0 }
 0x35a   :  { %v3556_v61 = vadd.f32 %v3555_v31, %v3462_v38 }
 0x360   :  { %v5773_v1 = vpop.f32.mrf.mxu1 }
 0x361   :  { %v3652_v47 = vadd.f32 %v5773_v1, %v3563_v48 }
 0x362   :  { %v3643_v58 = vpop.f32.mrf.mxu1 }
 0x363   :  { %v3644_v59 = vadd.f32 %v3643_v58, %v3556_v61 }
 0x369   :  { %v5792_v50 = vpop.f32.mrf.mxu0 }
 0x36a   :  { %v3753_v60 = vadd.f32 %v5792_v50, %v3652_v47 }
 0x36b   :  { %v3746_v51 = vpop.f32.mrf.mxu0 }
 0x36c   :  { %v3747_v22 = vadd.f32 %v3746_v51, %v3644_v59 }
 0x372   :  { %v5811_v24 = vpop.f32.mrf.mxu1 }
 0x373   :  { %v3838_v27 = vadd.f32 %v5811_v24, %v3753_v60 }
 0x374   :  { %v3831_v17 = vpop.f32.mrf.mxu1 }
 0x375   :  { %v3846_v29 = vmul.f32 0.5, %v3838_v27  ;;  %v3832_v9 = vadd.f32 %v3831_v17, %v3747_v22 }
 0x377   :  { %5917 = vtanh.f32 %v3846_v29  ;;  %v3843_v14 = vmul.f32 0.5, %v3832_v9 }
 0x379   :  { %5919 = vtanh.f32 %v3843_v14 }
 0x384   :  { %v5918_v20 = vpop.eup %5917 }
 0x385   :  { %v3858_v33 = vmul.f32 0.5, %v5918_v20 }
 0x386   :  { %v5920_v37 = vpop.eup %5919 }
 0x387   :  { %v3864_v49 = vadd.f32 0.5, %v3858_v33  ;;  %v3855_v11 = vmul.f32 0.5, %v5920_v37  ;;  %v4842_v37 = vpop.permute.xlu1 %4841 }
 0x389   :  { %v3861_v39 = vadd.f32 0.5, %v3855_v11  ;;  %v4396_v26 = vand.u32 4294901760, %v3864_v49 }
 0x38b   :  { %5813 = vmatpush3.msra.mxu0 %v4396_v26  ;;  %v4399_v18 = vand.u32 4294901760, %v3861_v39  ;;  %v4474_v63 = vsub.f32 %v3864_v49, %v4396_v26 }
 0x38c   :  { %5814 = vmatprep.subr.mxu0 %v8427_v42 }
 0x38d   :  { %5815 = vmatpush3.msra.mxu0 %v4399_v18  ;;  %v4481_v45 = vsub.f32 %v3861_v39, %v4399_v18  ;;  %v4475_v53 = vand.u32 4294901760, %v4474_v63 }
 0x38e   :  { %5817 = vmatmul.mubr.f32.vlgmr.msra.gmra.mxu0 %v7989_v2  ;;  %5826 = vmatprep.subr.mxu0 %v8427_v42 }
 0x38f   :  { %5827 = vmatpush3.msra.mxu0 %v4474_v63  ;;  %5830 = vmatprep.mubr.msk.f32.mxu0 %vm5951_vm3, %v8427_v42  ;;  %v4476_v25 = vsub.f32 %v4474_v63, %v4475_v53  ;;  %v4482_v44 = vand.u32 4294901760, %v4481_v45 }
 0x390   :  { %5828 = vmatprep.subr.mxu0 %v8427_v42 }
 0x391   :  { %5829 = vmatpush3.msra.mxu0 %v4481_v45  ;;  %v4477_v41 = vand.u32 4294901760, %v4476_v25  ;;  %v4483_v3 = vsub.f32 %v4481_v45, %v4482_v44 }
 0x392   :  { %5840 = vmatprep.subr.mxu0 %v8427_v42  ;;  %5831 = vmatmul.mubr.f32.vlgmr.msra.gmra.mxu0 %v7982_v55 }
 0x393   :  { %5820 = vmatpush3.msra.mxu1 %v4477_v41  ;;  %5841 = vmatpush3.msra.mxu0 %v4475_v53  ;;  %v4484_v8 = vand.u32 4294901760, %v4483_v3 }
 0x394   :  { %5821 = vmatprep.subr.mxu1 %v8427_v42  ;;  %5842 = vmatprep.subr.mxu0 %v8427_v42 }
 0x395   :  { %5822 = vmatpush3.msra.mxu1 %v4484_v8  ;;  %5843 = vmatpush3.msra.mxu0 %v4482_v44  ;;  %v4871_v44 = vlaneseq }
 0x396   :  { %5824 = vmatmul.mubr.f32.vlgmr.msra.gmra.mxu1 %v7979_v28  ;;  %5833 = vmatprep.subr.mxu1 %v8427_v42 }
 0x397   :  { %5834 = vmatpush3.msra.mxu1 %v4396_v26  ;;  %5837 = vmatprep.mubr.msk.f32.mxu1 %vm5951_vm3, %v8427_v42  ;;  %vm4907_vm4 = vcmp.lt.s32.totalorder %v4871_v44, 384 }
 0x398   :  { %5835 = vmatprep.subr.mxu1 %v8427_v42  ;;  %5844 = vmatprep.mubr.msk.f32.mxu0 %vm5951_vm3, %v8427_v42 }
 0x399   :  { %5836 = vmatpush3.msra.mxu1 %v4399_v18  ;;  %5845 = vmatmul.mubr.f32.vlgmr.msra.gmra.mxu0 %v7979_v28 }
 0x39a   :  { %5838 = vmatmul.mubr.f32.vlgmr.msra.gmra.mxu1 %v7985_v36  ;;  %5847 = vmatprep.subr.mxu1 %v8427_v42 }
 0x39b   :  { %5848 = vmatpush3.msra.mxu1 %v4396_v26  ;;  %5851 = vmatprep.mubr.msk.f32.mxu1 %vm5951_vm3, %v8427_v42 }
 0x39c   :  { %5849 = vmatprep.subr.mxu1 %v8427_v42 }
 0x39d   :  { %5850 = vmatpush3.msra.mxu1 %v4399_v18 }
 0x39e   :  { %5852 = vmatmul.mubr.f32.vlgmr.msra.gmra.mxu1 %v7979_v28 }
 0x3ab   :  { %v3951_v55 = vpop.f32.mrf.mxu0 }
 0x3ac   :  { %v3952_v56 = vadd.f32 %v3951_v55, %v3870_v40 }
 0x3ad   :  { %v3953_v35 = vpop.f32.mrf.mxu0 }
 0x3ae   :  { %v3954_v7 = vadd.f32 %v3953_v35, %v3870_v40 }
 0x3b0   :  { %v4124_v2 = vpop.f32.mrf.mxu0 }
 0x3b2   :  { %v4126_v46 = vpop.f32.mrf.mxu0 }
 0x3b3   :  { %v4043_v30 = vpop.f32.mrf.mxu1 }
 0x3b4   :  { %v4044_v21 = vadd.f32 %v4043_v30, %v3952_v56  ;;  %v4872_v30 = vshrl.u32 %v4871_v44, 7 }
 0x3b5   :  { %v4045_v4 = vpop.f32.mrf.mxu1 }
 0x3b6   :  { %v4046_v36 = vadd.f32 %v4045_v4, %v3954_v7  ;;  %v4286_v57 = vpop.f32.mrf.mxu0  ;;  %v4125_v34 = vadd.f32 %v4124_v2, %v4044_v21  ;;  %v4873_v7 = vsub.s32 0, %v4872_v30 }
 0x3b8   :  { %v4202_v19 = vpop.f32.mrf.mxu1  ;;  %v4127_v52 = vadd.f32 %v4126_v46, %v4046_v36  ;;  %v4288_v15 = vpop.f32.mrf.mxu0 }
 0x3b9   :  { %v4203_v28 = vadd.f32 %v4202_v19, %v4125_v34  ;;  %v4869_v46 = vpop.permute.xlu0 %4868  ;;  %v5952_v19 = vmov 1966171168  }
 0x3ba   :  { %v4204_v43 = vpop.f32.mrf.mxu1  ;;  %v4883_v21 = vunpack.c.l.s4 %v5952_v19 }
 0x3bb   :  { %v4205_v42 = vadd.f32 %v4204_v43, %v4127_v52  ;;  %v4287_v5 = vadd.f32 %v4286_v57, %v4203_v28  ;;  %v4874_v57 = vrot.slane %v4869_v46, %v4873_v7 }
 0x3bc   :  { %v4362_v6 = vpop.f32.mrf.mxu1 }
 0x3bd   :  { %v4289_v32 = vadd.f32 %v4288_v15, %v4205_v42  ;;  %v4363_v16 = vadd.f32 %v4362_v6, %v4287_v5  ;;  %v4884_v15 = vunpack.c.0.s8 %v4883_v21 }
 0x3be   :  { %v4364_v13 = vpop.f32.mrf.mxu1 }
 0x3bf   :  { %v4365_v23 = vadd.f32 %v4364_v13, %v4289_v32  ;;  %v4826_v10 = vmul.f32 0.5, %v4363_v16  ;;  %v4887_v5 = vsub.s32 %v4884_v15, %v4872_v30 }
 0x3c1   :  { %v4827_v0 = vmul.f32 0.5, %v4365_v23 }
 0x3c3   :  { %5921 = vtanh.f32 %v4827_v0 }
 0x3c4   :  { %5923 = vtanh.f32 %v4826_v10 }
 0x3d0   :  { %v5922_v50 = vpop.eup %5921 }
 0x3d1   :  { %v5924_v58 = vpop.eup %5923  ;;  %v4833_v47 = vmul.f32 0.5, %v5922_v50 }
 0x3d2   :  { %v4832_v24 = vmul.f32 0.5, %v5924_v58 }
 0x3d3   :  { %v4836_v29 = vadd.f32 0.5, %v4833_v47 }
 0x3d4   :  { %v4835_v20 = vadd.f32 0.5, %v4832_v24 }
 0x3d5   :  { %v4845_v11 = vmul.f32 %v4842_v37, %v4836_v29 }
 0x3d6   :  { %v4844_v26 = vmul.f32 %v4842_v37, %v4835_v20 }
 0x3d7   :  { %v4853_v18 = vrot.slane %v4845_v11, 4 }
 0x3d8   :  { %v4847_v63 = vrot.slane %v4844_v26, 4 }
 0x3d9   :  { %v4854_v45 = vadd.f32 %v4853_v18, %v4845_v11 }
 0x3da   :  { %v4848_v53 = vadd.f32 %v4847_v63, %v4844_v26 }
 0x3db   :  { %v4855_v25 = vrot.slane %v4854_v45, 2 }
 0x3dc   :  { %v4849_v41 = vrot.slane %v4848_v53, 2 }
 0x3dd   :  { %v4856_v8 = vadd.f32 %v4855_v25, %v4854_v45 }
 0x3de   :  { %v4850_v35 = vadd.f32 %v4849_v41, %v4848_v53 }
 0x3df   :  { %v4857_v4 = vrot.slane %v4856_v8, 1 }
 0x3e0   :  { %v4851_v56 = vrot.slane %v4850_v35, 1 }
 0x3e1   :  { %v4858_v52 = vadd.f32 %v4857_v4, %v4856_v8 }
 0x3e2   :  { %v4852_v34 = vadd.f32 %v4851_v56, %v4850_v35 }
 0x3e3   :  { %v4876_v28 = vadd.f32 %v4874_v57, %v4858_v52 }
 0x3e4   :  { %v4875_v13 = vadd.f32 %v4874_v57, %v4852_v34 }
 0x3e6   :  { %v4881_v16 = vcombine.low %v4875_v13, %v4876_v28 }
 0x3e8   :  { %v4888_v10 = vrot.slane %v4881_v16, %v4887_v5 }
 0x44e   :  { %v4440_v12 = vpop.f32.mrf.mxu0 }
 0x44f   :  { %v4441_v54 = vadd.f32 %v4440_v12, %v3870_v40 }
 0x450   :  { %v5818_v31 = vpop.f32.mrf.mxu0 }
 0x452   :  { %v4597_v1 = vpop.f32.mrf.mxu0 }
 0x454   :  { %v5832_v62 = vpop.f32.mrf.mxu0 }
 0x456   :  { %v4521_v38 = vpop.f32.mrf.mxu1 }
 0x457   :  { %v4522_v48 = vadd.f32 %v4521_v38, %v4441_v54 }
 0x458   :  { %v5825_v61 = vpop.f32.mrf.mxu1 }
 0x459   :  { %v4598_v51 = vadd.f32 %v4597_v1, %v4522_v48  ;;  %v4749_v59 = vpop.f32.mrf.mxu0 }
 0x45a   :  { %v4672_v60 = vpop.f32.mrf.mxu1 }
 0x45b   :  { %v4673_v22 = vadd.f32 %v4672_v60, %v4598_v51  ;;  %v5846_v27 = vpop.f32.mrf.mxu0 }
 0x45c   :  { %v5839_v17 = vpop.f32.mrf.mxu1 }
 0x45d   :  { %v4750_v9 = vadd.f32 %v4749_v59, %v4673_v22 }
 0x45e   :  { %v4822_v14 = vpop.f32.mrf.mxu1 }
 0x45f   :  { %v4823_v33 = vadd.f32 %v4822_v14, %v4750_v9 }
 0x460   :  { %v5853_v49 = vpop.f32.mrf.mxu1 }
 0x461   :  { %v4828_v39 = vmul.f32 0.5, %v4823_v33 }
 0x463   :  { %5925 = vtanh.f32 %v4828_v39 }
 0x470   :  { %v5926_v3 = vpop.eup %5925 }
 0x471   :  { %v4834_v55 = vmul.f32 0.5, %v5926_v3 }
 0x473   :  { %v4837_v40 = vadd.f32 0.5, %v4834_v55 }
 0x475   :  { %v4846_v2 = vmul.f32 %v4842_v37, %v4837_v40 }
 0x477   :  { %v4859_v36 = vrot.slane %v4846_v2, 4 }
 0x479   :  { %v4860_v43 = vadd.f32 %v4859_v36, %v4846_v2 }
 0x47b   :  { %v4861_v42 = vrot.slane %v4860_v43, 2 }
 0x47d   :  { %v4862_v6 = vadd.f32 %v4861_v42, %v4860_v43 }
 0x47f   :  { %v4863_v32 = vrot.slane %v4862_v6, 1 }
 0x481   :  { %v4864_v23 = vadd.f32 %v4863_v32, %v4862_v6 }
 0x483   :  { %v4877_v0 = vadd.f32 %v4874_v57, %v4864_v23 }
 0x485   :  { %v4895_v12 = vrot.slane %v4877_v0, %v4887_v5 }
 0x487   :  { %v4896_v31 = vcombine.low %v4888_v10, %v4895_v12 }
 0x489   :  { %v4903_v1 = vrot.slane %v4896_v31, %v4887_v5 }
 0x48b   :  { %4909 = vst.msk [vmem:[#allocation3] sm:$0x7] %vm4907_vm4, %v4903_v1 }
 0x48c   :  { %5938 = shalt.err (!%p5935_p4)
}
 0x48d   :  { %4919 = dma.vmem_to_hbm [thread:$0]  %s4917_s12, 48, %s8045_s9, [#allocation4]  }
 0x48e   :  { %5947 = dma.done.wait [#allocation4], 48  }
 0x48f   :  { %5948 = vsyncadd [#allocation4], 4294967248 }
 0x490   :  { %4923 = vsyncpa [#allocation4], 1 }

</bundles_post_ra>
